<compile_context>
chip_gen: v6e
topology: v6e:2x2x1
jax: 0.10.0
libtpu: 0.0.40
codegen_flags: <defaults>
</compile_context>

<pallas_src>
import math

import jax
import jax.numpy as jnp
from jax.experimental import pallas as pl
from jax.experimental.pallas import tpu as pltpu

SQRT_2_OVER_PI = math.sqrt(2.0 / math.pi)
LN_EPS = 1e-12  # config.layer_norm_eps


# ---------------- device-gen dispatch helpers (static, Python-level) ----------------
def _device_kind():
    return jax.devices()[0].device_kind.lower()


def _is_v7():
    kind = _device_kind()
    return ("v7" in kind) or ("7x" in kind)


def _use_bf16_tanh(hidden_size):
    # bf16 tanh only pays off where tanh (the single EUP) is the bottleneck
    # (small H) and only on gens with a bf16 EUP (v6e/v7x); v5e/v4/... stay f32.
    kind = _device_kind()
    old_gen = any(v in kind for v in ("v2", "v3", "v4", "v5"))
    return (hidden_size <= 256) and not old_gen


# ---------------- shared math (kernel and reference use the identical graph) ----------------
def _gelu_new(h, use_bf16_tanh):
    # gelu_new with the polynomial fused as h*(1 + 0.044715*h^2) (one fewer vmul)
    arg = (SQRT_2_OVER_PI * h) * (1.0 + 0.044715 * (h * h))
    if use_bf16_tanh:
        t = jnp.tanh(arg.astype(jnp.bfloat16)).astype(jnp.float32)
    else:
        t = jnp.tanh(arg)
    return 0.5 * h * (1.0 + t)


# ---------------- Pallas kernel (one (TN, H) token tile per grid step) ----------------
def _make_kernel(use_bf16_tanh):
    def disc_only_kernel(c_ref, hid_ref, lab_ref, w1_ref, b1_ref, gw_ref, out_ref):
        # ---- Last_layer.dense: bf16 MXU feed, f32 accumulate ----
        x = hid_ref[...].astype(jnp.bfloat16)          # no-op if hidden already bf16
        h = jnp.dot(x, w1_ref[...], preferred_element_type=jnp.float32) + b1_ref[...]

        # ---- gelu_new ----
        h = _gelu_new(h, use_bf16_tanh)

        # ---- LayerNorm affine folded into the binary head ----
        #   d = rsqrt(var+eps) * rowsum((h - mu) * gamma * w2d) + c
        mu = jnp.mean(h, axis=-1, keepdims=True)
        hc = h - mu
        var = jnp.mean(hc * hc, axis=-1, keepdims=True)
        d = (jax.lax.rsqrt(var + LN_EPS)
             * jnp.sum(hc * gw_ref[...], axis=-1, keepdims=True)
             + c_ref[0])                                # [TN,1]

        lab = lab_ref[...]                              # [TN,1] int32: 0 / 1, -1 == padded/garbage row
        valid = lab >= 0

        # cross entropy: label==0 -> softplus(d), label==1 -> softplus(-d)
        z = jnp.where(lab == 0, d, -d)
        sp = jnp.maximum(z, 0.0) + jnp.log1p(jnp.exp(-jnp.abs(z)))
        tile_loss = jnp.sum(jnp.where(valid, sp, 0.0))

        # accuracy: argmax(logits) == label; first-max tie-break => pred 0 when d <= 0
        correct = jnp.logical_and((d > 0.0) == (lab == 1), valid)
        tile_correct = jnp.sum(jnp.where(correct, 1.0, 0.0))

        # lane-dense per-tile partials: lane 0 = loss sum, lane 1 = correct count
        lane = jax.lax.broadcasted_iota(jnp.int32, out_ref.shape, 2)
        out_ref[...] = jnp.where(lane == 0, tile_loss,
                                 jnp.where(lane == 1, tile_correct, 0.0))

    return disc_only_kernel


# ---------------- wrapper ----------------
def disc_only_forward(hidden_bsh, input_ids, lm_label, params, tn=512):
    """hidden_bsh: [B,S,H] (base_model output, any float dtype);
    input_ids / lm_label: [B,S] int32. Returns (disc_loss, lm_score)."""
    B, S, H = hidden_bsh.shape
    assert H % 128 == 0, "TODO(synk): mask LayerNorm stats for H % 128 != 0"
    N = B * S
    w1, b1, gamma, beta, w2, b2 = params

    use_bf16_tanh = _use_bf16_tanh(H)
    is_v7 = _is_v7()
    # v7x: 64 MiB physical VMEM -> cap scoped limit ~48 MiB; v5e/v6e: 128 MiB -> 96 MiB.
    vmem_limit = (48 if is_v7 else 96) * 1024 * 1024

    # Don't tile wider than the (128-rounded) token count; on v7x keep >=2 tiles
    # when possible so dimension_semantics=("parallel",) feeds both TensorCores.
    tn = int(min(tn, pl.cdiv(N, 128) * 128))
    if is_v7 and pl.cdiv(N, tn) < 2 and N > 256:
        tn = int(pl.cdiv(pl.cdiv(N, 2), 128) * 128)
    num_tiles = int(pl.cdiv(N, tn))
    n_pad = num_tiles * tn

    # labels: 0 where unreplaced (input_ids == lm_label) else 1; -1 marks rows
    # past N.  Only this cheap [N,1] stream is padded; the [N,H] hidden tensor
    # is passed unpadded and uncast (the kernel casts to bf16 before the MXU),
    # so the wrapper adds no full-activation HBM pass.
    labels = jnp.where(input_ids == lm_label, 0, 1).reshape(N, 1).astype(jnp.int32)
    if n_pad != N:
        labels = jnp.pad(labels, ((0, n_pad - N), (0, 0)), constant_values=-1)
    hid2d = hidden_bsh.reshape(N, H)                      # metadata-only reshape

    # fold LayerNorm affine + 2-class decoder into one H-vector + one scalar
    w2d = (w2[:, 1] - w2[:, 0]).astype(jnp.float32).reshape(-1)           # [H]
    gw = (gamma.reshape(-1).astype(jnp.float32) * w2d).reshape(1, H)
    b2f = b2.reshape(-1).astype(jnp.float32)
    c = (jnp.sum(beta.reshape(-1).astype(jnp.float32) * w2d)
         + (b2f[1] - b2f[0])).reshape(1)

    kernel = _make_kernel(use_bf16_tanh)
    hid_spec = pl.BlockSpec((tn, H), lambda i: (i, 0))
    lab_spec = pl.BlockSpec((tn, 1), lambda i: (i, 0))
    smem_spec = pl.BlockSpec(memory_space=pltpu.MemorySpace.SMEM)
    out_spec = pl.BlockSpec((1, 1, 128), lambda i: (i, 0, 0))

    def run(single_buffer_consts):
        if single_buffer_consts:
            # constant-index weights need no second pipeline buffer (VMEM headroom on v7x)
            const = lambda shape: pl.BlockSpec(shape, lambda i: (0,) * len(shape),
                                               pipeline_mode=pl.Buffered(1))
        else:
            const = lambda shape: pl.BlockSpec(shape, lambda i: (0,) * len(shape))
        return pl.pallas_call(
            kernel,
            out_shape=jax.ShapeDtypeStruct((num_tiles, 1, 128), jnp.float32),
            grid=(num_tiles,),
            in_specs=[smem_spec,                          # c (SMEM scalar)
                      hid_spec,                           # hidden tile (native dtype)
                      lab_spec,                           # labels tile (int32)
                      const((H, H)),                      # dense weight (bf16, resident)
                      const((1, H)),                      # dense bias
                      const((1, H))],                     # gamma * (w2[:,1]-w2[:,0])
            out_specs=out_spec,
            compiler_params=pltpu.CompilerParams(
                dimension_semantics=("parallel",),
                vmem_limit_bytes=vmem_limit),
        )(c, hid2d, labels,
          w1.astype(jnp.bfloat16),
          b1.reshape(1, H).astype(jnp.float32),
          gw)

    try:
        partials = run(True)
    except Exception:
        # fall back to default double-buffered constants if Buffered(1) is
        # unsupported by the installed jax / Mosaic version
        partials = run(False)

    n_f = jnp.float32(N)
    disc_loss = jnp.sum(partials[:, 0, 0]) / n_f
    lm_score = jnp.sum(partials[:, 0, 1]) / n_f
    return disc_loss, lm_score


# ---------------- pure-JAX reference (original 2-class formulation) ----------------
def reference_forward(hidden_bsh, input_ids, lm_label, params, use_bf16_tanh):
    w1, b1, gamma, beta, w2, b2 = params
    B, S, H = hidden_bsh.shape
    x = hidden_bsh.reshape(-1, H).astype(jnp.bfloat16)    # same bf16 MXU feed as the kernel
    h = jnp.dot(x, w1.astype(jnp.bfloat16), preferred_element_type=jnp.float32) + b1
    h = _gelu_new(h, use_bf16_tanh)
    mu = h.mean(-1, keepdims=True)
    var = ((h - mu) ** 2).mean(-1, keepdims=True)
    h = (h - mu) / jnp.sqrt(var + LN_EPS) * gamma + beta
    logits = h @ w2 + b2                                  # [N, 2]
    labels = jnp.where(input_ids.reshape(-1) == lm_label.reshape(-1), 0, 1)
    lse = jax.scipy.special.logsumexp(logits, axis=-1)
    picked = jnp.take_along_axis(logits, labels[:, None], axis=-1)[:, 0]
    loss = jnp.mean(lse - picked)
    score = jnp.mean((jnp.argmax(logits, axis=-1) == labels).astype(jnp.float32))
    return loss, score


if __name__ == "__main__":
    B, S, H, O, VOCAB = 2, 120, 128, 2, 1000   # N=240 tokens

    key = jax.random.PRNGKey(0)
    (k_emb, k_w1, k_b1, k_g, k_beta, k_w2, k_b2,
     k_ids, k_lbl, k_mask) = jax.random.split(key, 10)

    # ---- parameter init (shapes from Last_layer.__init__) ----
    w1 = 0.02 * jax.random.normal(k_w1, (H, H), jnp.float32)           # dense.weight^T
    b1 = 0.02 * jax.random.normal(k_b1, (1, H), jnp.float32)           # dense.bias
    gamma = 1.0 + 0.1 * jax.random.normal(k_g, (1, H), jnp.float32)    # LayerNorm.weight
    beta = 0.02 * jax.random.normal(k_beta, (1, H), jnp.float32)       # LayerNorm.bias
    w2 = 0.02 * jax.random.normal(k_w2, (H, O), jnp.float32)           # decoder.weight^T
    b2 = 0.01 * jax.random.normal(k_b2, (1, O), jnp.float32)           # decoder bias
    params = (w1, b1, gamma, beta, w2, b2)

    # ---- synthetic token ids / labels; ~half the positions left unreplaced ----
    input_ids = jax.random.randint(k_ids, (B, S), 0, VOCAB, jnp.int32)
    lm_label = jax.random.randint(k_lbl, (B, S), 0, VOCAB, jnp.int32)
    keep_mask = jax.random.bernoulli(k_mask, 0.5, (B, S))
    lm_label = jnp.where(keep_mask, input_ids, lm_label)

    # ---- stubbed base_model: deterministic embedding lookup (plain-JAX glue) ----
    emb_table = 0.5 * jax.random.normal(k_emb, (VOCAB, H), jnp.float32)
    hidden_bsh = emb_table[input_ids]                                  # [B, S, H] f32

    # run 1: tn=128 -> 2 tiles, last one overhangs N (exercises garbage-row masking)
    loss_a, score_a = disc_only_forward(hidden_bsh, input_ids, lm_label, params, tn=128)
    # run 2: default tile size (clamped to a single 256-row tile at this N)
    loss_b, score_b = disc_only_forward(hidden_bsh, input_ids, lm_label, params)
    jax.block_until_ready((loss_a, score_a, loss_b, score_b))

    ref_loss, ref_score = reference_forward(hidden_bsh, input_ids, lm_label, params,
                                            _use_bf16_tanh(H))

    N = B * S
    for loss, score in ((loss_a, score_a), (loss_b, score_b)):
        assert jnp.allclose(loss, ref_loss, atol=5e-4, rtol=5e-4), (loss, ref_loss)
        # lm_score counts exact argmax matches; allow a couple of near-tie flips
        # between the kernel's collapsed-d path and the reference's [N,2] matmul.
        assert abs(float(score) - float(ref_score)) <= 2.5 / N, (score, ref_score)

    print("KERNEL_OK")
</pallas_src>

<mosaic_0001>
module attributes {stable_mosaic.version = 11 : i64} {
  func.func @disc_only_kernel(%arg0: i32, %arg1: memref<1xf32, #tpu.memory_space<smem>>, %arg2: memref<128x128xf32, #tpu.memory_space<vmem>>, %arg3: memref<128x1xi32, #tpu.memory_space<vmem>>, %arg4: memref<128x128xbf16, #tpu.memory_space<vmem>>, %arg5: memref<1x128xf32, #tpu.memory_space<vmem>>, %arg6: memref<1x128xf32, #tpu.memory_space<vmem>>, %arg7: memref<1x1x128xf32, #tpu.memory_space<vmem>>) attributes {dimension_semantics = [#tpu.dimension_semantics<parallel>], iteration_bounds = array<i64: 2>, scalar_prefetch = 0 : i64, scratch_operands = 0 : i64, tpu.core_type = #tpu.core_type<tc>, window_params = [{transform_indices = @transform_0, window_bounds = array<i64: 1>}, {transform_indices = @transform_1, window_bounds = array<i64: 128, 128>}, {transform_indices = @transform_2, window_bounds = array<i64: 128, 1>}, {pipeline_mode = #tpu.pipeline_mode<synchronous>, transform_indices = @transform_3, window_bounds = array<i64: 128, 128>}, {pipeline_mode = #tpu.pipeline_mode<synchronous>, transform_indices = @transform_4, window_bounds = array<i64: 1, 128>}, {pipeline_mode = #tpu.pipeline_mode<synchronous>, transform_indices = @transform_5, window_bounds = array<i64: 1, 128>}, {transform_indices = @transform_6, window_bounds = array<i64: 1, 1, 128>}]} {
    %c0 = arith.constant 0 : index
    %c0_0 = arith.constant 0 : index
    %0 = vector.load %arg2[%c0, %c0_0] : memref<128x128xf32, #tpu.memory_space<vmem>>, vector<128x128xf32>
    %1 = arith.truncf %0 : vector<128x128xf32> to vector<128x128xbf16>
    %c0_1 = arith.constant 0 : index
    %c0_2 = arith.constant 0 : index
    %2 = vector.load %arg4[%c0_1, %c0_2] : memref<128x128xbf16, #tpu.memory_space<vmem>>, vector<128x128xbf16>
    %cst = arith.constant dense<0.000000e+00> : vector<128x128xf32>
    %3 = tpu.matmul %1, %2, %cst {dimension_numbers = #tpu.dot_dimension_numbers<[1], [0], [0], [1], [0, 0, 1, 1], [], []>} : vector<128x128xbf16>, vector<128x128xbf16>, vector<128x128xf32> -> vector<128x128xf32>
    %c0_3 = arith.constant 0 : index
    %c0_4 = arith.constant 0 : index
    %4 = vector.load %arg5[%c0_3, %c0_4] : memref<1x128xf32, #tpu.memory_space<vmem>>, vector<1x128xf32>
    %5 = vector.broadcast %4 : vector<1x128xf32> to vector<128x128xf32>
    %6 = arith.addf %3, %5 : vector<128x128xf32>
    %cst_5 = arith.constant 0.797884583 : f32
    %7 = vector.broadcast %cst_5 : f32 to vector<128x128xf32>
    %8 = arith.mulf %7, %6 : vector<128x128xf32>
    %9 = arith.mulf %6, %6 : vector<128x128xf32>
    %cst_6 = arith.constant 4.471500e-02 : f32
    %10 = vector.broadcast %cst_6 : f32 to vector<128x128xf32>
    %11 = arith.mulf %10, %9 : vector<128x128xf32>
    %cst_7 = arith.constant 1.000000e+00 : f32
    %12 = vector.broadcast %cst_7 : f32 to vector<128x128xf32>
    %13 = arith.addf %12, %11 : vector<128x128xf32>
    %14 = arith.mulf %8, %13 : vector<128x128xf32>
    %15 = arith.truncf %14 : vector<128x128xf32> to vector<128x128xbf16>
    %16 = math.tanh %15 : vector<128x128xbf16>
    %17 = arith.extf %16 : vector<128x128xbf16> to vector<128x128xf32>
    %cst_8 = arith.constant 5.000000e-01 : f32
    %18 = vector.broadcast %cst_8 : f32 to vector<128x128xf32>
    %19 = arith.mulf %18, %6 : vector<128x128xf32>
    %cst_9 = arith.constant 1.000000e+00 : f32
    %20 = vector.broadcast %cst_9 : f32 to vector<128x128xf32>
    %21 = arith.addf %20, %17 : vector<128x128xf32>
    %22 = arith.mulf %19, %21 : vector<128x128xf32>
    %cst_10 = arith.constant dense<0.000000e+00> : vector<128xf32>
    %23 = vector.multi_reduction <add>, %22, %cst_10 [1] : vector<128x128xf32> to vector<128xf32>
    %24 = vector.shape_cast %23 : vector<128xf32> to vector<128x1xf32>
    %cst_11 = arith.constant 1.280000e+02 : f32
    %25 = vector.broadcast %cst_11 : f32 to vector<128x1xf32>
    %26 = arith.divf %24, %25 : vector<128x1xf32>
    %27 = vector.broadcast %26 : vector<128x1xf32> to vector<128x128xf32>
    %28 = arith.subf %22, %27 : vector<128x128xf32>
    %29 = arith.mulf %28, %28 : vector<128x128xf32>
    %cst_12 = arith.constant dense<0.000000e+00> : vector<128xf32>
    %30 = vector.multi_reduction <add>, %29, %cst_12 [1] : vector<128x128xf32> to vector<128xf32>
    %31 = vector.shape_cast %30 : vector<128xf32> to vector<128x1xf32>
    %cst_13 = arith.constant 1.280000e+02 : f32
    %32 = vector.broadcast %cst_13 : f32 to vector<128x1xf32>
    %33 = arith.divf %31, %32 : vector<128x1xf32>
    %cst_14 = arith.constant 9.99999996E-13 : f32
    %34 = vector.broadcast %cst_14 : f32 to vector<128x1xf32>
    %35 = arith.addf %33, %34 : vector<128x1xf32>
    %36 = math.rsqrt %35 : vector<128x1xf32>
    %c0_15 = arith.constant 0 : index
    %c0_16 = arith.constant 0 : index
    %37 = vector.load %arg6[%c0_15, %c0_16] : memref<1x128xf32, #tpu.memory_space<vmem>>, vector<1x128xf32>
    %38 = vector.broadcast %37 : vector<1x128xf32> to vector<128x128xf32>
    %39 = arith.mulf %28, %38 : vector<128x128xf32>
    %cst_17 = arith.constant dense<0.000000e+00> : vector<128xf32>
    %40 = vector.multi_reduction <add>, %39, %cst_17 [1] : vector<128x128xf32> to vector<128xf32>
    %41 = vector.shape_cast %40 : vector<128xf32> to vector<128x1xf32>
    %42 = arith.mulf %36, %41 : vector<128x1xf32>
    %c0_18 = arith.constant 0 : index
    %43 = memref.load %arg1[%c0_18] : memref<1xf32, #tpu.memory_space<smem>>
    %44 = vector.broadcast %43 : f32 to vector<128x1xf32>
    %45 = arith.addf %42, %44 : vector<128x1xf32>
    %c0_19 = arith.constant 0 : index
    %c0_20 = arith.constant 0 : index
    %46 = vector.load %arg3[%c0_19, %c0_20] : memref<128x1xi32, #tpu.memory_space<vmem>>, vector<128x1xi32>
    %c0_i32 = arith.constant 0 : i32
    %47 = vector.broadcast %c0_i32 : i32 to vector<128x1xi32>
    %48 = arith.cmpi sge, %46, %47 : vector<128x1xi32>
    %c0_i32_21 = arith.constant 0 : i32
    %49 = vector.broadcast %c0_i32_21 : i32 to vector<128x1xi32>
    %50 = arith.cmpi eq, %46, %49 : vector<128x1xi32>
    %cst_22 = arith.constant 0.000000e+00 : f32
    %51 = vector.broadcast %cst_22 : f32 to vector<128x1xf32>
    %52 = arith.subf %51, %45 : vector<128x1xf32>
    %53 = arith.select %50, %45, %52 : vector<128x1xi1>, vector<128x1xf32>
    %cst_23 = arith.constant 0.000000e+00 : f32
    %54 = vector.broadcast %cst_23 : f32 to vector<128x1xf32>
    %55 = arith.maximumf %53, %54 : vector<128x1xf32>
    %56 = math.absf %53 : vector<128x1xf32>
    %cst_24 = arith.constant 0.000000e+00 : f32
    %57 = vector.broadcast %cst_24 : f32 to vector<128x1xf32>
    %58 = arith.subf %57, %56 : vector<128x1xf32>
    %59 = math.exp %58 : vector<128x1xf32>
    %60 = math.log1p %59 : vector<128x1xf32>
    %61 = arith.addf %55, %60 : vector<128x1xf32>
    %cst_25 = arith.constant 0.000000e+00 : f32
    %62 = vector.broadcast %cst_25 : f32 to vector<128x1xf32>
    %63 = arith.select %48, %61, %62 : vector<128x1xi1>, vector<128x1xf32>
    %64 = vector.shape_cast %63 : vector<128x1xf32> to vector<1x128x1xf32>
    %cst_26 = arith.constant dense<0.000000e+00> : vector<1xf32>
    %65 = vector.multi_reduction <add>, %64, %cst_26 [1, 2] : vector<1x128x1xf32> to vector<1xf32>
    %66 = vector.shape_cast %65 : vector<1xf32> to vector<1x1x1xf32>
    %67 = vector.extract %66[0, 0, 0] : f32 from vector<1x1x1xf32>
    %cst_27 = arith.constant 0.000000e+00 : f32
    %68 = vector.broadcast %cst_27 : f32 to vector<128x1xf32>
    %69 = arith.cmpf ogt, %45, %68 : vector<128x1xf32>
    %c1_i32 = arith.constant 1 : i32
    %70 = vector.broadcast %c1_i32 : i32 to vector<128x1xi32>
    %71 = arith.cmpi eq, %46, %70 : vector<128x1xi32>
    %72 = arith.xori %69, %71 : vector<128x1xi1>
    %cst_28 = arith.constant dense<true> : vector<128x1xi1>
    %73 = arith.xori %72, %cst_28 : vector<128x1xi1>
    %74 = arith.andi %73, %48 : vector<128x1xi1>
    %cst_29 = arith.constant 1.000000e+00 : f32
    %cst_30 = arith.constant 0.000000e+00 : f32
    %75 = vector.broadcast %cst_29 : f32 to vector<128x1xf32>
    %76 = vector.broadcast %cst_30 : f32 to vector<128x1xf32>
    %77 = arith.select %74, %75, %76 : vector<128x1xi1>, vector<128x1xf32>
    %78 = vector.shape_cast %77 : vector<128x1xf32> to vector<1x128x1xf32>
    %cst_31 = arith.constant dense<0.000000e+00> : vector<1xf32>
    %79 = vector.multi_reduction <add>, %78, %cst_31 [1, 2] : vector<1x128x1xf32> to vector<1xf32>
    %80 = vector.shape_cast %79 : vector<1xf32> to vector<1x1x1xf32>
    %81 = vector.extract %80[0, 0, 0] : f32 from vector<1x1x1xf32>
    %82 = tpu.iota {dimensions = array<i32: 2>} : vector<1x1x128xi32>
    %c0_i32_32 = arith.constant 0 : i32
    %83 = vector.broadcast %c0_i32_32 : i32 to vector<1x1x128xi32>
    %84 = arith.cmpi eq, %82, %83 : vector<1x1x128xi32>
    %c1_i32_33 = arith.constant 1 : i32
    %85 = vector.broadcast %c1_i32_33 : i32 to vector<1x1x128xi32>
    %86 = arith.cmpi eq, %82, %85 : vector<1x1x128xi32>
    %cst_34 = arith.constant 0.000000e+00 : f32
    %87 = vector.broadcast %81 : f32 to vector<1x1x128xf32>
    %88 = vector.broadcast %cst_34 : f32 to vector<1x1x128xf32>
    %89 = arith.select %86, %87, %88 : vector<1x1x128xi1>, vector<1x1x128xf32>
    %90 = vector.broadcast %67 : f32 to vector<1x1x128xf32>
    %91 = arith.select %84, %90, %89 : vector<1x1x128xi1>, vector<1x1x128xf32>
    %c0_35 = arith.constant 0 : index
    %c0_36 = arith.constant 0 : index
    %c0_37 = arith.constant 0 : index
    %92 = vector.load %arg7[%c0_35, %c0_36, %c0_37] : memref<1x1x128xf32, #tpu.memory_space<vmem>>, vector<1x1x128xf32>
    tpu.vector_store %arg7[%c0_35, %c0_36, %c0_37], %91 {strides = array<i32>} : memref<1x1x128xf32, #tpu.memory_space<vmem>>, vector<1x1x128xf32>,
    return
  }
  func.func @transform_0(%arg0: i32) -> i32 {
    %c0_i32 = arith.constant 0 : i32
    %c0_i32_0 = arith.constant 0 : i32
    return %c0_i32 : i32
  }
  func.func @transform_1(%arg0: i32) -> (i32, i32) {
    %c0_i32 = arith.constant 0 : i32
    %c0_i32_0 = arith.constant 0 : i32
    return %arg0, %c0_i32 : i32, i32
  }
  func.func @transform_2(%arg0: i32) -> (i32, i32) {
    %c0_i32 = arith.constant 0 : i32
    %c0_i32_0 = arith.constant 0 : i32
    return %arg0, %c0_i32 : i32, i32
  }
  func.func @transform_3(%arg0: i32) -> (i32, i32) {
    %c0_i32 = arith.constant 0 : i32
    %c0_i32_0 = arith.constant 0 : i32
    %c0_i32_1 = arith.constant 0 : i32
    return %c0_i32, %c0_i32_0 : i32, i32
  }
  func.func @transform_4(%arg0: i32) -> (i32, i32) {
    %c0_i32 = arith.constant 0 : i32
    %c0_i32_0 = arith.constant 0 : i32
    %c0_i32_1 = arith.constant 0 : i32
    return %c0_i32, %c0_i32_0 : i32, i32
  }
  func.func @transform_5(%arg0: i32) -> (i32, i32) {
    %c0_i32 = arith.constant 0 : i32
    %c0_i32_0 = arith.constant 0 : i32
    %c0_i32_1 = arith.constant 0 : i32
    return %c0_i32, %c0_i32_0 : i32, i32
  }
  func.func @transform_6(%arg0: i32) -> (i32, i32, i32) {
    %c0_i32 = arith.constant 0 : i32
    %c0_i32_0 = arith.constant 0 : i32
    %c0_i32_1 = arith.constant 0 : i32
    return %arg0, %c0_i32, %c0_i32_0 : i32, i32, i32
  }
}

module attributes {stable_mosaic.version = 11 : i64} {
  func.func @disc_only_kernel(%arg0: i32, %arg1: memref<1xf32, #tpu.memory_space<smem>>, %arg2: memref<128x128xf32, #tpu.memory_space<vmem>>, %arg3: memref<128x1xi32, #tpu.memory_space<vmem>>, %arg4: memref<128x128xbf16, #tpu.memory_space<vmem>>, %arg5: memref<1x128xf32, #tpu.memory_space<vmem>>, %arg6: memref<1x128xf32, #tpu.memory_space<vmem>>, %arg7: memref<1x1x128xf32, #tpu.memory_space<vmem>>) attributes {dimension_semantics = [#tpu.dimension_semantics<parallel>], iteration_bounds = array<i64: 2>, scalar_prefetch = 0 : i64, scratch_operands = 0 : i64, tpu.core_type = #tpu.core_type<tc>, window_params = [{transform_indices = @transform_0, window_bounds = array<i64: 1>}, {transform_indices = @transform_1, window_bounds = array<i64: 128, 128>}, {transform_indices = @transform_2, window_bounds = array<i64: 128, 1>}, {pipeline_mode = #tpu.pipeline_mode<synchronous>, transform_indices = @transform_3, window_bounds = array<i64: 128, 128>}, {pipeline_mode = #tpu.pipeline_mode<synchronous>, transform_indices = @transform_4, window_bounds = array<i64: 1, 128>}, {pipeline_mode = #tpu.pipeline_mode<synchronous>, transform_indices = @transform_5, window_bounds = array<i64: 1, 128>}, {transform_indices = @transform_6, window_bounds = array<i64: 1, 1, 128>}]} {
    %c0 = arith.constant 0 : index
    %c0_0 = arith.constant 0 : index
    %0 = vector.load %arg2[%c0, %c0_0] : memref<128x128xf32, #tpu.memory_space<vmem>>, vector<128x128xf32>
    %1 = arith.truncf %0 : vector<128x128xf32> to vector<128x128xbf16>
    %c0_1 = arith.constant 0 : index
    %c0_2 = arith.constant 0 : index
    %2 = vector.load %arg4[%c0_1, %c0_2] : memref<128x128xbf16, #tpu.memory_space<vmem>>, vector<128x128xbf16>
    %cst = arith.constant dense<0.000000e+00> : vector<128x128xf32>
    %3 = tpu.matmul %1, %2, %cst {dimension_numbers = #tpu.dot_dimension_numbers<[1], [0], [0], [1], [0, 0, 1, 1], [], []>} : vector<128x128xbf16>, vector<128x128xbf16>, vector<128x128xf32> -> vector<128x128xf32>
    %c0_3 = arith.constant 0 : index
    %c0_4 = arith.constant 0 : index
    %4 = vector.load %arg5[%c0_3, %c0_4] : memref<1x128xf32, #tpu.memory_space<vmem>>, vector<1x128xf32>
    %5 = vector.broadcast %4 : vector<1x128xf32> to vector<128x128xf32>
    %6 = arith.addf %3, %5 : vector<128x128xf32>
    %cst_5 = arith.constant 0.797884583 : f32
    %7 = vector.broadcast %cst_5 : f32 to vector<128x128xf32>
    %8 = arith.mulf %7, %6 : vector<128x128xf32>
    %9 = arith.mulf %6, %6 : vector<128x128xf32>
    %cst_6 = arith.constant 4.471500e-02 : f32
    %10 = vector.broadcast %cst_6 : f32 to vector<128x128xf32>
    %11 = arith.mulf %10, %9 : vector<128x128xf32>
    %cst_7 = arith.constant 1.000000e+00 : f32
    %12 = vector.broadcast %cst_7 : f32 to vector<128x128xf32>
    %13 = arith.addf %12, %11 : vector<128x128xf32>
    %14 = arith.mulf %8, %13 : vector<128x128xf32>
    %15 = arith.truncf %14 : vector<128x128xf32> to vector<128x128xbf16>
    %16 = math.tanh %15 : vector<128x128xbf16>
    %17 = arith.extf %16 : vector<128x128xbf16> to vector<128x128xf32>
    %cst_8 = arith.constant 5.000000e-01 : f32
    %18 = vector.broadcast %cst_8 : f32 to vector<128x128xf32>
    %19 = arith.mulf %18, %6 : vector<128x128xf32>
    %cst_9 = arith.constant 1.000000e+00 : f32
    %20 = vector.broadcast %cst_9 : f32 to vector<128x128xf32>
    %21 = arith.addf %20, %17 : vector<128x128xf32>
    %22 = arith.mulf %19, %21 : vector<128x128xf32>
    %cst_10 = arith.constant dense<0.000000e+00> : vector<128xf32>
    %23 = vector.multi_reduction <add>, %22, %cst_10 [1] : vector<128x128xf32> to vector<128xf32>
    %24 = vector.shape_cast %23 : vector<128xf32> to vector<128x1xf32>
    %cst_11 = arith.constant 1.280000e+02 : f32
    %25 = vector.broadcast %cst_11 : f32 to vector<128x1xf32>
    %26 = arith.divf %24, %25 : vector<128x1xf32>
    %27 = vector.broadcast %26 : vector<128x1xf32> to vector<128x128xf32>
    %28 = arith.subf %22, %27 : vector<128x128xf32>
    %29 = arith.mulf %28, %28 : vector<128x128xf32>
    %cst_12 = arith.constant dense<0.000000e+00> : vector<128xf32>
    %30 = vector.multi_reduction <add>, %29, %cst_12 [1] : vector<128x128xf32> to vector<128xf32>
    %31 = vector.shape_cast %30 : vector<128xf32> to vector<128x1xf32>
    %cst_13 = arith.constant 1.280000e+02 : f32
    %32 = vector.broadcast %cst_13 : f32 to vector<128x1xf32>
    %33 = arith.divf %31, %32 : vector<128x1xf32>
    %cst_14 = arith.constant 9.99999996E-13 : f32
    %34 = vector.broadcast %cst_14 : f32 to vector<128x1xf32>
    %35 = arith.addf %33, %34 : vector<128x1xf32>
    %36 = math.rsqrt %35 : vector<128x1xf32>
    %c0_15 = arith.constant 0 : index
    %c0_16 = arith.constant 0 : index
    %37 = vector.load %arg6[%c0_15, %c0_16] : memref<1x128xf32, #tpu.memory_space<vmem>>, vector<1x128xf32>
    %38 = vector.broadcast %37 : vector<1x128xf32> to vector<128x128xf32>
    %39 = arith.mulf %28, %38 : vector<128x128xf32>
    %cst_17 = arith.constant dense<0.000000e+00> : vector<128xf32>
    %40 = vector.multi_reduction <add>, %39, %cst_17 [1] : vector<128x128xf32> to vector<128xf32>
    %41 = vector.shape_cast %40 : vector<128xf32> to vector<128x1xf32>
    %42 = arith.mulf %36, %41 : vector<128x1xf32>
    %c0_18 = arith.constant 0 : index
    %43 = memref.load %arg1[%c0_18] : memref<1xf32, #tpu.memory_space<smem>>
    %44 = vector.broadcast %43 : f32 to vector<128x1xf32>
    %45 = arith.addf %42, %44 : vector<128x1xf32>
    %c0_19 = arith.constant 0 : index
    %c0_20 = arith.constant 0 : index
    %46 = vector.load %arg3[%c0_19, %c0_20] : memref<128x1xi32, #tpu.memory_space<vmem>>, vector<128x1xi32>
    %c0_i32 = arith.constant 0 : i32
    %47 = vector.broadcast %c0_i32 : i32 to vector<128x1xi32>
    %48 = arith.cmpi sge, %46, %47 : vector<128x1xi32>
    %c0_i32_21 = arith.constant 0 : i32
    %49 = vector.broadcast %c0_i32_21 : i32 to vector<128x1xi32>
    %50 = arith.cmpi eq, %46, %49 : vector<128x1xi32>
    %cst_22 = arith.constant 0.000000e+00 : f32
    %51 = vector.broadcast %cst_22 : f32 to vector<128x1xf32>
    %52 = arith.subf %51, %45 : vector<128x1xf32>
    %53 = arith.select %50, %45, %52 : vector<128x1xi1>, vector<128x1xf32>
    %cst_23 = arith.constant 0.000000e+00 : f32
    %54 = vector.broadcast %cst_23 : f32 to vector<128x1xf32>
    %55 = arith.maximumf %53, %54 : vector<128x1xf32>
    %56 = math.absf %53 : vector<128x1xf32>
    %cst_24 = arith.constant 0.000000e+00 : f32
    %57 = vector.broadcast %cst_24 : f32 to vector<128x1xf32>
    %58 = arith.subf %57, %56 : vector<128x1xf32>
    %59 = math.exp %58 : vector<128x1xf32>
    %60 = math.log1p %59 : vector<128x1xf32>
    %61 = arith.addf %55, %60 : vector<128x1xf32>
    %cst_25 = arith.constant 0.000000e+00 : f32
    %62 = vector.broadcast %cst_25 : f32 to vector<128x1xf32>
    %63 = arith.select %48, %61, %62 : vector<128x1xi1>, vector<128x1xf32>
    %64 = vector.shape_cast %63 : vector<128x1xf32> to vector<1x128x1xf32>
    %cst_26 = arith.constant dense<0.000000e+00> : vector<1xf32>
    %65 = vector.multi_reduction <add>, %64, %cst_26 [1, 2] : vector<1x128x1xf32> to vector<1xf32>
    %66 = vector.shape_cast %65 : vector<1xf32> to vector<1x1x1xf32>
    %67 = vector.extract %66[0, 0, 0] : f32 from vector<1x1x1xf32>
    %cst_27 = arith.constant 0.000000e+00 : f32
    %68 = vector.broadcast %cst_27 : f32 to vector<128x1xf32>
    %69 = arith.cmpf ogt, %45, %68 : vector<128x1xf32>
    %c1_i32 = arith.constant 1 : i32
    %70 = vector.broadcast %c1_i32 : i32 to vector<128x1xi32>
    %71 = arith.cmpi eq, %46, %70 : vector<128x1xi32>
    %72 = arith.xori %69, %71 : vector<128x1xi1>
    %cst_28 = arith.constant dense<true> : vector<128x1xi1>
    %73 = arith.xori %72, %cst_28 : vector<128x1xi1>
    %74 = arith.andi %73, %48 : vector<128x1xi1>
    %cst_29 = arith.constant 1.000000e+00 : f32
    %cst_30 = arith.constant 0.000000e+00 : f32
    %75 = vector.broadcast %cst_29 : f32 to vector<128x1xf32>
    %76 = vector.broadcast %cst_30 : f32 to vector<128x1xf32>
    %77 = arith.select %74, %75, %76 : vector<128x1xi1>, vector<128x1xf32>
    %78 = vector.shape_cast %77 : vector<128x1xf32> to vector<1x128x1xf32>
    %cst_31 = arith.constant dense<0.000000e+00> : vector<1xf32>
    %79 = vector.multi_reduction <add>, %78, %cst_31 [1, 2] : vector<1x128x1xf32> to vector<1xf32>
    %80 = vector.shape_cast %79 : vector<1xf32> to vector<1x1x1xf32>
    %81 = vector.extract %80[0, 0, 0] : f32 from vector<1x1x1xf32>
    %82 = tpu.iota {dimensions = array<i32: 2>} : vector<1x1x128xi32>
    %c0_i32_32 = arith.constant 0 : i32
    %83 = vector.broadcast %c0_i32_32 : i32 to vector<1x1x128xi32>
    %84 = arith.cmpi eq, %82, %83 : vector<1x1x128xi32>
    %c1_i32_33 = arith.constant 1 : i32
    %85 = vector.broadcast %c1_i32_33 : i32 to vector<1x1x128xi32>
    %86 = arith.cmpi eq, %82, %85 : vector<1x1x128xi32>
    %cst_34 = arith.constant 0.000000e+00 : f32
    %87 = vector.broadcast %81 : f32 to vector<1x1x128xf32>
    %88 = vector.broadcast %cst_34 : f32 to vector<1x1x128xf32>
    %89 = arith.select %86, %87, %88 : vector<1x1x128xi1>, vector<1x1x128xf32>
    %90 = vector.broadcast %67 : f32 to vector<1x1x128xf32>
    %91 = arith.select %84, %90, %89 : vector<1x1x128xi1>, vector<1x1x128xf32>
    %c0_35 = arith.constant 0 : index
    %c0_36 = arith.constant 0 : index
    %c0_37 = arith.constant 0 : index
    %92 = vector.load %arg7[%c0_35, %c0_36, %c0_37] : memref<1x1x128xf32, #tpu.memory_space<vmem>>, vector<1x1x128xf32>
    tpu.vector_store %arg7[%c0_35, %c0_36, %c0_37], %91 {strides = array<i32>} : memref<1x1x128xf32, #tpu.memory_space<vmem>>, vector<1x1x128xf32>,
    return
  }
  func.func @transform_0(%arg0: i32) -> i32 {
    %c0_i32 = arith.constant 0 : i32
    %c0_i32_0 = arith.constant 0 : i32
    return %c0_i32 : i32
  }
  func.func @transform_1(%arg0: i32) -> (i32, i32) {
    %c0_i32 = arith.constant 0 : i32
    %c0_i32_0 = arith.constant 0 : i32
    return %arg0, %c0_i32 : i32, i32
  }
  func.func @transform_2(%arg0: i32) -> (i32, i32) {
    %c0_i32 = arith.constant 0 : i32
    %c0_i32_0 = arith.constant 0 : i32
    return %arg0, %c0_i32 : i32, i32
  }
  func.func @transform_3(%arg0: i32) -> (i32, i32) {
    %c0_i32 = arith.constant 0 : i32
    %c0_i32_0 = arith.constant 0 : i32
    %c0_i32_1 = arith.constant 0 : i32
    return %c0_i32, %c0_i32_0 : i32, i32
  }
  func.func @transform_4(%arg0: i32) -> (i32, i32) {
    %c0_i32 = arith.constant 0 : i32
    %c0_i32_0 = arith.constant 0 : i32
    %c0_i32_1 = arith.constant 0 : i32
    return %c0_i32, %c0_i32_0 : i32, i32
  }
  func.func @transform_5(%arg0: i32) -> (i32, i32) {
    %c0_i32 = arith.constant 0 : i32
    %c0_i32_0 = arith.constant 0 : i32
    %c0_i32_1 = arith.constant 0 : i32
    return %c0_i32, %c0_i32_0 : i32, i32
  }
  func.func @transform_6(%arg0: i32) -> (i32, i32, i32) {
    %c0_i32 = arith.constant 0 : i32
    %c0_i32_0 = arith.constant 0 : i32
    %c0_i32_1 = arith.constant 0 : i32
    return %arg0, %c0_i32, %c0_i32_0 : i32, i32, i32
  }
}

</mosaic_0001>

<bundles_post_ra>
// kernel: tpu_custom_call.1
= control target key start
LH: loop header
LB: loop body
LE: loop exit
PB: predicated region body
PF: predicated region fallthrough
CT: control target
= control target key end

     0   :  { %s3175_s0 = inlined_call_operand.<no memory space> [shape: f32[1], index: 0, kind: input, shape index: {}]   ;;  %s3176_s1 = inlined_call_operand.vmem [shape: f32[240,128], index: 1, kind: input, shape index: {}]   ;;  %s3177_s2 = inlined_call_operand.vmem [shape: s32[256,1], index: 2, kind: input, shape index: {}]   ;;  %s3178_s3 = inlined_call_operand.hbm [shape: bf16[128,128], index: 3, kind: input, shape index: {}]   ;;  %s3179_s4 = inlined_call_operand.vmem [shape: f32[1,128], index: 4, kind: input, shape index: {}]   ;;  %s3180_s5 = inlined_call_operand.vmem [shape: f32[1,128], index: 5, kind: input, shape index: {}]   ;;  %s3181_s6 = inlined_call_operand.hbm [shape: f32[2,1,128], index: 6, kind: output, shape index: {}]  }
   0x1   :  { %11 = sst [smem:[#allocation2]] %s3175_s0 }
   0x2   :  { %12 = vsyncpa [#allocation4], 0 }
   0x3   :  { %13 = vsyncpa [#allocation5], 0 }
   0x4   :  { %15 = vsyncpa [#allocation5 + $0x1], 0  ;;  %s1927_s23 = smov 0   ;;  %s1929_s24 = smov 0  }
   0x5   :  { %s1931_s25 = smov 0   ;;  %s1933_s26 = smov 0  }
   0x6 LB: > { %s1948_s0 = sadd.s32 4294967295, %s1881_s26   ;;  %s1526_s27 = sadd.s32 4294967294, %s1881_s26   ;;  %s1881_s26 = sphi %s1933_s26, %s3317_s26   ;;  %s1877_s25 = sphi %s1931_s25, %s3316_s25   ;;  %s1873_s24 = sphi %s1929_s24, %s3315_s24   ;;  %s1869_s23 = sphi %s1927_s23, %s3314_s23  }
   0x7   : > { %s1952_s28 = sadd.s32 1, %s1881_s26   ;;  %s164_s29 = sadd.s32 1, %s1877_s25 }
   0x8   : > { %s161_s30 = ssub.s32 %s1881_s26, %s1952_s28  ;;  %p174_p0 = scmp.ne.s32.totalorder %s1877_s25, %s1873_s24 }
   0x9   : > { %p162_p1 = scmp.eq.s32.totalorder %s161_s30, 0  ;;  %p175_p2 = scmp.eq.s32.totalorder %s1948_s0, 1 }
   0xa   : > { %p180_p3 = scmp.ne.s32.totalorder %s1873_s24, %s1869_s23  ;;  %p181_p4 = scmp.eq.s32.totalorder %s1526_s27, 1 }
   0xb   : > { %s1963_s7 = scalar_select %p162_p1, %s1877_s25, %s164_s29  }
   0xc   : > { %p1965_p5 = por %p175_p2, %p174_p0  ;;  %p1969_p6 = por %p181_p4, %p180_p3 }
   0xd   : > { %p1527_p7 = scmp.ge.s32.totalorder %s1881_s26, 1  ;;  %p188_p8 = scmp.lt.s32.totalorder %s1881_s26, 3 }
   0xe   : > { %s3192_s9 = scalar_select %p1969_p6, 1, 0 }
   0xf   : > { %p1631_p9 = scmp.eq.s32.totalorder %s1948_s0, 0  ;;  %p1976_p10 = pnand %p1527_p7, %p188_p8 }
  0x10   : > { %s1883_s11 = smov [#allocation3]  }
  0x11   : > { %s203_s12 = sshll.u32 %s1883_s11, 4  ;;  %p1623_p11 = pneg %p1976_p10  ;;  %s204_s12 = int_to_ptr.vmem [resolvable:$true] %s203_s12 }
  0x12   : > { %s1802_s13 = scalar_lea.vmem %s204_s12, 1024  ;;  %p1810_p3 = scmp.lt.s32.totalorder %s204_s12, %s204_s12 }
  0x13   : > { %p1624_p12 = pnand %p1631_p9, %p1623_p11  ;;  %p1803_p0 = scmp.ne.s32.totalorder %s204_s12, %s1802_s13 }
  0x14   : > { %p1811_p4 = scmp.lt.s32.totalorder %s1802_s13, %s1802_s13 }
  0x15   : > { %p1793_p13 = pneg %p1624_p12 }
  0x16   : > { %p1812_p6 = por %p1811_p4, %p1810_p3 }
  0x17   : > { %p1805_p1 = pnand %p1803_p0, %p1793_p13 }
  0x19   : > { %p1806_p2 = pneg %p1805_p1 }
  0x1b   : > { %p1813_p7 = pnand %p1812_p6, %p1806_p2 }
  0x1d   : > { %1816 = shalt.err (!%p1813_p7)
}
  0x1e   : > { %s1884_s14 = smov 64   ;;  %s1885_s15 = smov 4  }
  0x1f   : > { %1626 = dma.hbm_to_vmem [thread:$0]  (!%p1624_p12), %s3178_s3, 1024, %s204_s12, [#allocation4], %s1884_s14, %s1884_s14, %s1885_s15  }
  0x20   : > { %251 = sbr.rel (%p1976_p10) target bundleno = 976 (0x3d0), region = 44 }
  0x25   : > { %1860 = dma.done.wait (%p1631_p9), [#allocation4], 1024  }
  0x26   : > { %1862 = vsyncadd (%p1631_p9), [#allocation4], 4294966272  ;;  %s1994_s18 = sshll.u32 %s1948_s0, 4  ;;  %v1671_v0 = vld [vmem:[#allocation3 + $0x38] sm:$0xff]   ;;  %v1672_v1 = vld [vmem:[#allocation3 + $0x30] sm:$0xff]   ;;  %s894_s12 = sld [smem:[#allocation2]] }
  0x27   : > { %p294_p6 = scmp.lt.s32.totalorder %s1994_s18, 29  ;;  %1565 = vmatprep.subr.bf16.mxu0 %v1671_v0  ;;  %1597 = vmatprep.subr.bf16.mxu1 %v1671_v0  ;;  %v1673_v2 = vld [vmem:[#allocation3 + $0x28] sm:$0xff]   ;;  %v1674_v3 = vld [vmem:[#allocation3 + $0x20] sm:$0xff]   ;;  %v1675_v10 = vld [vmem:[#allocation3 + $0x18] sm:$0xff]   ;;  %p304_p8 = scmp.lt.s32.totalorder %s1994_s18, 31 }
  0x28   : > { %1566 = vmatpush3.bf16.msra.mxu0 %v1671_v0  ;;  %1605 = vmatpush3.bf16.msra.mxu1 %v1671_v0  ;;  %v1676_v11 = vld [vmem:[#allocation3 + $0x10] sm:$0xff]   ;;  %v1677_v12 = vld [vmem:[#allocation3 + $0x8] sm:$0xff]   ;;  %v1678_v13 = vld [vmem:[#allocation3] sm:$0xff]   ;;  %s287_s17 = sand.u32 1, %s1873_s24   ;;  %s3140_s29 = scalar_lea.hbm %s3181_s6, %s1994_s18 }
  0x29   : > { %s295_s19 = scalar_select %p294_p6, %s1994_s18, 29  ;;  %1567 = vmatprep.subr.bf16.mxu0 %v1672_v1  ;;  %1598 = vmatprep.subr.bf16.mxu1 %v1672_v1  ;;  %v2022_v32 = vld [vmem:[%s3179_s4] ss:$0 sm:$0xff] }
  0x2a   : > { %s305_s11 = scalar_select %p304_p8, %s1994_s18, 31 }
  0x2b   : > { %s1533_s20 = sshll.u32 %s295_s19, 3  ;;  %s1435_s30 = scalar_lea.sflag [#allocation5], %s287_s17 }
  0x2c   : > { %s2001_s27 = scalar_lea.vmem %s3176_s1, %s1533_s20  ;;  %1568 = vmatpush3.bf16.msra.mxu0 %v1672_v1  ;;  %1606 = vmatpush3.bf16.msra.mxu1 %v1672_v1  ;;  %s1535_s13 = sshll.u32 %s305_s11, 3 }
  0x2d   : > { %1569 = vmatprep.subr.bf16.mxu0 %v1673_v2  ;;  %1599 = vmatprep.subr.bf16.mxu1 %v1673_v2  ;;  %v310_v4 = vld [vmem:[%s2001_s27] sm:$0xff]  ;;  %v311_v5 = vld [vmem:[%s2001_s27 + $0x8] sm:$0xff]  ;;  %v312_v14 = vld [vmem:[%s2001_s27 + $0x10] sm:$0xff]  ;;  %s2251_s16 = scalar_lea.vmem %s3177_s2, %s1535_s13  ;;  %s288_s20 = scalar_lea.vmem [#allocation6], %s287_s17 }
  0x2e   : > { %v318_v6 = vld [vmem:[%s2001_s27 + $0x40] sm:$0xff]  ;;  %v326_v7 = vpack.c.bf16 %v311_v5, %v310_v4  ;;  %v319_v8 = vld [vmem:[%s2001_s27 + $0x48] sm:$0xff]  ;;  %v313_v15 = vld [vmem:[%s2001_s27 + $0x18] sm:$0xff]  ;;  %s1447_s21 = sshll.u32 %s288_s20, 4  ;;  %s1888_s11 = smov [#allocation6]   ;;  %s1448_s21 = int_to_ptr.vmem [resolvable:$true] %s1447_s21 }
  0x2f   : > { %v330_v9 = vpack.c.bf16 %v319_v8, %v318_v6  ;;  %v320_v16 = vld [vmem:[%s2001_s27 + $0x50] sm:$0xff]  ;;  %v321_v17 = vld [vmem:[%s2001_s27 + $0x58] sm:$0xff]  ;;  %v314_v18 = vld [vmem:[%s2001_s27 + $0x20] sm:$0xff]  ;;  %v327_v22 = vpack.c.bf16 %v313_v15, %v312_v14  ;;  %s1817_s10 = scalar_lea.vmem %s1448_s21, 16 }
  0x30   : > { %1570 = vmatpush3.bf16.msra.mxu0 %v1673_v2  ;;  %1607 = vmatpush3.bf16.msra.mxu1 %v1673_v2  ;;  %v315_v19 = vld [vmem:[%s2001_s27 + $0x28] sm:$0xff]  ;;  %v322_v20 = vld [vmem:[%s2001_s27 + $0x60] sm:$0xff]  ;;  %v331_v23 = vpack.c.bf16 %v321_v17, %v320_v16  ;;  %v316_v26 = vld [vmem:[%s2001_s27 + $0x30] sm:$0xff]  ;;  %p1818_p9 = scmp.ne.s32.totalorder %s1448_s21, %s1817_s10 }
  0x31   : > { %1571 = vmatprep.subr.bf16.mxu0 %v1674_v3  ;;  %1600 = vmatprep.subr.bf16.mxu1 %v1674_v3  ;;  %v323_v21 = vld [vmem:[%s2001_s27 + $0x68] sm:$0xff]  ;;  %v328_v24 = vpack.c.bf16 %v315_v19, %v314_v18  ;;  %v317_v27 = vld [vmem:[%s2001_s27 + $0x38] sm:$0xff]  ;;  %v324_v28 = vld [vmem:[%s2001_s27 + $0x70] sm:$0xff] }
  0x32   : > { %1581 = vmatprep.mubr.bf16.mxu0 %v326_v7  ;;  %1589 = vmatprep.mubr.bf16.mxu1 %v330_v9  ;;  %v332_v25 = vpack.c.bf16 %v323_v21, %v322_v20  ;;  %v325_v29 = vld [vmem:[%s2001_s27 + $0x78] sm:$0xff]  ;;  %v329_v30 = vpack.c.bf16 %v317_v27, %v316_v26  ;;  %p1819_p10 = pnand %p1818_p9, %p1965_p5 }
  0x33   : > { %v333_v31 = vpack.c.bf16 %v325_v29, %v324_v28 }
  0x34   : > { %1572 = vmatpush3.bf16.msra.mxu0 %v1674_v3  ;;  %1608 = vmatpush3.bf16.msra.mxu1 %v1674_v3  ;;  %p1820_p11 = pneg %p1819_p10 }
  0x35   : > { %1573 = vmatprep.subr.bf16.mxu0 %v1675_v10  ;;  %1601 = vmatprep.subr.bf16.mxu1 %v1675_v10 }
  0x38   : > { %1574 = vmatpush3.bf16.msra.mxu0 %v1675_v10  ;;  %1609 = vmatpush3.bf16.msra.mxu1 %v1675_v10 }
  0x39   : > { %1575 = vmatprep.subr.bf16.mxu0 %v1676_v11  ;;  %1602 = vmatprep.subr.bf16.mxu1 %v1676_v11 }
  0x3c   : > { %1576 = vmatpush3.bf16.msra.mxu0 %v1676_v11  ;;  %1610 = vmatpush3.bf16.msra.mxu1 %v1676_v11 }
  0x3d   : > { %1577 = vmatprep.subr.bf16.mxu0 %v1677_v12  ;;  %1603 = vmatprep.subr.bf16.mxu1 %v1677_v12 }
  0x40   : > { %1578 = vmatpush3.bf16.msra.mxu0 %v1677_v12  ;;  %1611 = vmatpush3.bf16.msra.mxu1 %v1677_v12 }
  0x41   : > { %1579 = vmatprep.subr.bf16.mxu0 %v1678_v13  ;;  %1604 = vmatprep.subr.bf16.mxu1 %v1678_v13 }
  0x44   : > { %1580 = vmatpush3.bf16.msra.mxu0 %v1678_v13  ;;  %1612 = vmatpush3.bf16.msra.mxu1 %v1678_v13 }
  0x47   : > { %1582 = vmatmul.mubr.bf16.vlgmr.msra.gmra.mxu0 %v327_v22  ;;  %1590 = vmatmul.mubr.bf16.vlgmr.msra.gmra.mxu1 %v331_v23 }
  0x48   : > { %1585 = vmatprep.mubr.bf16.mxu0 %v328_v24  ;;  %1593 = vmatprep.mubr.bf16.mxu1 %v332_v25 }
  0x4f   : > { %1586 = vmatmul.mubr.bf16.gmra.mxu0 %v329_v30  ;;  %1594 = vmatmul.mubr.bf16.gmra.mxu1 %v333_v31 }
 0x107   : > { %v1583_v33 = vpop.f32.mrf.mxu0  ;;  %v1591_v34 = vpop.f32.mrf.mxu1 }
 0x108   : > { %v2025_v35 = vadd.f32 %v1583_v33, %v2022_v32  ;;  %v2047_v56 = vadd.f32 %v1591_v34, %v2022_v32 }
 0x109   : > { %v439_v36 = vpop.f32.mrf.mxu0  ;;  %v471_v37 = vpop.f32.mrf.mxu1 }
 0x10a   : > { %v520_v38 = vmul.f32 %v2025_v35, %v2025_v35  ;;  %v2030_v39 = vadd.f32 %v2022_v32, %v439_v36  ;;  %v2040_v48 = vadd.f32 %v2022_v32, %v471_v37  ;;  %v504_v55 = vmul.f32 0.7978846, %v2025_v35 }
 0x10b   : > { %v1584_v40 = vpop.f32.mrf.mxu0  ;;  %v1592_v41 = vpop.f32.mrf.mxu1  ;;  %v528_v5 = vmul.f32 %v2047_v56, %v2047_v56  ;;  %v512_v31 = vmul.f32 0.7978846, %v2047_v56 }
 0x10c   : > { %v536_v42 = vmul.f32 0.044715, %v520_v38  ;;  %v2033_v43 = vadd.f32 %v1584_v40, %v2022_v32  ;;  %v518_v44 = vmul.f32 %v2030_v39, %v2030_v39  ;;  %v526_v62 = vmul.f32 %v2040_v48, %v2040_v48 }
 0x10d   : > { %v442_v45 = vpop.f32.mrf.mxu0  ;;  %v474_v46 = vpop.f32.mrf.mxu1  ;;  %v502_v6 = vmul.f32 0.7978846, %v2030_v39  ;;  %v2064_v7 = vadd.f32 %v1592_v41, %v2022_v32  ;;  %v544_v19 = vmul.f32 0.044715, %v528_v5  ;;  %v510_v26 = vmul.f32 0.7978846, %v2040_v48 }
 0x10e   : > { %v521_v47 = vmul.f32 %v2033_v43, %v2033_v43  ;;  %v552_v50 = vadd.f32 1.0, %v536_v42  ;;  %v534_v51 = vmul.f32 0.044715, %v518_v44  ;;  %v2043_v53 = vadd.f32 %v2022_v32, %v442_v45 }
 0x10f   : > { %v1587_v49 = vpop.f32.mrf.mxu0  ;;  %v1595_v54 = vpop.f32.mrf.mxu1  ;;  %v505_v57 = vmul.f32 0.7978846, %v2033_v43  ;;  %v2053_v60 = vadd.f32 %v2022_v32, %v474_v46  ;;  %v542_v15 = vmul.f32 0.044715, %v526_v62  ;;  %v529_v20 = vmul.f32 %v2064_v7, %v2064_v7 }
 0x110   : > { %v537_v52 = vmul.f32 0.044715, %v521_v47  ;;  %v519_v59 = vmul.f32 %v2043_v53, %v2043_v53  ;;  %v2056_v61 = vadd.f32 %v1587_v49, %v2022_v32  ;;  %v568_v63 = vmul.f32 %v552_v50, %v504_v55 }
 0x111   : > { %v550_v0 = vadd.f32 1.0, %v534_v51  ;;  %v455_v3 = vpop.f32.mrf.mxu0  ;;  %v487_v4 = vpop.f32.mrf.mxu1  ;;  %v503_v8 = vmul.f32 0.7978846, %v2043_v53  ;;  %v527_v11 = vmul.f32 %v2053_v60, %v2053_v60  ;;  %v558_v27 = vadd.f32 1.0, %v542_v15 }
 0x112   : > { %v553_v58 = vadd.f32 1.0, %v537_v52  ;;  %v535_v2 = vmul.f32 0.044715, %v519_v59  ;;  %v524_v12 = vmul.f32 %v2056_v61, %v2056_v61  ;;  %v2072_v13 = vadd.f32 %v2022_v32, %v455_v3 }
 0x113   : > { %v566_v14 = vmul.f32 %v550_v0, %v502_v6  ;;  %v1588_v17 = vpop.f32.mrf.mxu0  ;;  %v1596_v18 = vpop.f32.mrf.mxu1  ;;  %v543_v22 = vmul.f32 0.044715, %v527_v11  ;;  %v2083_v28 = vadd.f32 %v2022_v32, %v487_v4  ;;  %v560_v33 = vadd.f32 1.0, %v544_v19 }
 0x114   : > { %v569_v1 = vmul.f32 %v553_v58, %v505_v57  ;;  %v551_v10 = vadd.f32 1.0, %v535_v2  ;;  %v540_v23 = vmul.f32 0.044715, %v524_v12  ;;  %v522_v24 = vmul.f32 %v2072_v13, %v2072_v13 }
 0x115   : > { %v2079_v25 = vadd.f32 %v1588_v17, %v2022_v32  ;;  %v458_v29 = vpop.f32.mrf.mxu0  ;;  %v490_v30 = vpop.f32.mrf.mxu1  ;;  %v545_v34 = vmul.f32 0.044715, %v529_v20  ;;  %v511_v37 = vmul.f32 0.7978846, %v2053_v60  ;;  %v559_v38 = vadd.f32 1.0, %v543_v22 }
 0x116   : > { %v583_v9 = vpack.c.bf16 %v569_v1, %v568_v63  ;;  %v567_v16 = vmul.f32 %v551_v10, %v503_v8  ;;  %v556_v40 = vadd.f32 1.0, %v540_v23  ;;  %v2090_v41 = vadd.f32 %v1595_v54, %v2022_v32 }
 0x117   : > { %v525_v36 = vmul.f32 %v2079_v25, %v2079_v25  ;;  %v538_v42 = vmul.f32 0.044715, %v522_v24  ;;  %v2093_v45 = vadd.f32 %v2022_v32, %v458_v29  ;;  %v2096_v46 = vadd.f32 %v2022_v32, %v490_v30 }
 0x118   : > { %1679 = vtanh.bf16 %v583_v9  ;;  %v582_v21 = vpack.c.bf16 %v567_v16, %v566_v14  ;;  %v574_v47 = vmul.f32 %v558_v27, %v510_v26  ;;  %v513_v49 = vmul.f32 0.7978846, %v2064_v7 }
 0x119   : > { %v541_v44 = vmul.f32 0.044715, %v525_v36  ;;  %v530_v50 = vmul.f32 %v2083_v28, %v2083_v28  ;;  %v2102_v51 = vadd.f32 %v1596_v18, %v2022_v32  ;;  %v508_v52 = vmul.f32 0.7978846, %v2056_v61 }
 0x11a   : > { %1681 = vtanh.bf16 %v582_v21  ;;  %v509_v54 = vmul.f32 0.7978846, %v2079_v25  ;;  %v523_v57 = vmul.f32 %v2093_v45, %v2093_v45  ;;  %v561_v58 = vadd.f32 1.0, %v545_v34 }
 0x11b   : > { %v557_v55 = vadd.f32 1.0, %v541_v44  ;;  %v575_v59 = vmul.f32 %v559_v38, %v511_v37  ;;  %v532_v62 = vmul.f32 %v2090_v41, %v2090_v41  ;;  %v531_v63 = vmul.f32 %v2096_v46, %v2096_v46 }
 0x11c   : > { %v572_v0 = vmul.f32 %v556_v40, %v508_v52  ;;  %v554_v1 = vadd.f32 1.0, %v538_v42  ;;  %v539_v2 = vmul.f32 0.044715, %v523_v57  ;;  %v576_v3 = vmul.f32 %v560_v33, %v512_v31 }
 0x11d   : > { %v573_v32 = vmul.f32 %v557_v55, %v509_v54  ;;  %v506_v4 = vmul.f32 0.7978846, %v2072_v13  ;;  %v546_v5 = vmul.f32 0.044715, %v530_v50  ;;  %v533_v6 = vmul.f32 %v2102_v51, %v2102_v51 }
 0x11e   : > { %v507_v9 = vmul.f32 0.7978846, %v2093_v45  ;;  %v555_v10 = vadd.f32 1.0, %v539_v2  ;;  %v547_v11 = vmul.f32 0.044715, %v531_v63  ;;  %v577_v14 = vmul.f32 %v561_v58, %v513_v49 }
 0x11f   : > { %v585_v8 = vpack.c.bf16 %v573_v32, %v572_v0  ;;  %v586_v15 = vpack.c.bf16 %v575_v59, %v574_v47  ;;  %v548_v16 = vmul.f32 0.044715, %v532_v62  ;;  %v514_v17 = vmul.f32 0.7978846, %v2083_v28 }
 0x120   : > { %v570_v18 = vmul.f32 %v554_v1, %v506_v4  ;;  %v571_v19 = vmul.f32 %v555_v10, %v507_v9  ;;  %v562_v22 = vadd.f32 1.0, %v546_v5  ;;  %v549_v23 = vmul.f32 0.044715, %v533_v6 }
 0x121   : > { %v515_v24 = vmul.f32 0.7978846, %v2096_v46  ;;  %v616_v26 = vmul.f32 0.5, %v2025_v35  ;;  %1683 = vtanh.bf16 %v585_v8  ;;  %v563_v29 = vadd.f32 1.0, %v547_v11 }
 0x122   : > { %v584_v27 = vpack.c.bf16 %v571_v19, %v570_v18  ;;  %v587_v33 = vpack.c.bf16 %v577_v14, %v576_v3  ;;  %1685 = vtanh.bf16 %v586_v15  ;;  %v516_v34 = vmul.f32 0.7978846, %v2090_v41 }
 0x123   : > { %v564_v36 = vadd.f32 1.0, %v548_v16  ;;  %v578_v42 = vmul.f32 %v562_v22, %v514_v17  ;;  %v517_v44 = vmul.f32 0.7978846, %v2102_v51  ;;  %v614_v35 = vmul.f32 0.5, %v2030_v39 }
 0x124   : > { %1687 = vtanh.bf16 %v584_v27  ;;  %v565_v49 = vadd.f32 1.0, %v549_v23  ;;  %v579_v50 = vmul.f32 %v563_v29, %v515_v24  ;;  %v617_v54 = vmul.f32 0.5, %v2033_v43 }
 0x125   : > { %1689 = vtanh.bf16 %v587_v33  ;;  %v580_v59 = vmul.f32 %v564_v36, %v516_v34  ;;  %v615_v39 = vmul.f32 0.5, %v2043_v53  ;;  %v619_v8 = vmul.f32 0.5, %v2093_v45 }
 0x126   : > { %v1680_v12 = vpop.eup %1679  ;;  %v581_v62 = vmul.f32 %v565_v49, %v517_v44  ;;  %v588_v63 = vpack.c.bf16 %v579_v50, %v578_v42  ;;  %v618_v10 = vmul.f32 0.5, %v2072_v13  ;;  %v621_v19 = vmul.f32 0.5, %v2079_v25 }
 0x127   : > { %v600_v20 = vunpack.c.l.bf16 %v1680_v12  ;;  %v601_v21 = vunpack.c.h.bf16 %v1680_v12  ;;  %v620_v45 = vmul.f32 0.5, %v2056_v61  ;;  %v623_v27 = vmul.f32 0.5, %v2053_v60 }
 0x128   : > { %v1682_v31 = vpop.eup %1681  ;;  %v589_v1 = vpack.c.bf16 %v581_v62, %v580_v59  ;;  %1691 = vtanh.bf16 %v588_v63  ;;  %v622_v29 = vmul.f32 0.5, %v2040_v48  ;;  %v627_v48 = vmul.f32 0.5, %v2096_v46 }
 0x129   : > { %v632_v30 = vadd.f32 1.0, %v600_v20  ;;  %v598_v38 = vunpack.c.l.bf16 %v1682_v31  ;;  %v633_v40 = vadd.f32 1.0, %v601_v21  ;;  %v599_v47 = vunpack.c.h.bf16 %v1682_v31 }
 0x12a   : > { %1693 = vtanh.bf16 %v589_v1  ;;  %v626_v44 = vmul.f32 0.5, %v2083_v28 }
 0x12b   : > { %v2120_v37 = vmul.f32 %v632_v30, %v616_v26  ;;  %v630_v52 = vadd.f32 1.0, %v598_v38  ;;  %v2128_v57 = vmul.f32 %v633_v40, %v617_v54  ;;  %v631_v58 = vadd.f32 1.0, %v599_v47 }
 0x12c   : > { %v625_v38 = vmul.f32 0.5, %v2064_v7  ;;  %v624_v40 = vmul.f32 0.5, %v2047_v56  ;;  %v629_v7 = vmul.f32 0.5, %v2102_v51  ;;  %v628_v56 = vmul.f32 0.5, %v2090_v41 }
 0x12d   : > { %666 = vadd.xlane.f32.xlu1 %v2120_v37  ;;  %v2126_v55 = vmul.f32 %v630_v52, %v614_v35  ;;  %v2133_v0 = vmul.f32 %v631_v58, %v615_v39 }
 0x12f   : > { %662 = vadd.xlane.f32.xlu0 %v2126_v55  ;;  %v1684_v43 = vpop.eup %1683 }
 0x130   : > { %v1686_v32 = vpop.eup %1685  ;;  %v605_v5 = vunpack.c.h.bf16 %v1684_v43  ;;  %v604_v6 = vunpack.c.l.bf16 %v1684_v43 }
 0x131   : > { %668 = vadd.xlane.f32.xlu1 %v2128_v57  ;;  %v607_v11 = vunpack.c.h.bf16 %v1686_v32  ;;  %v606_v12 = vunpack.c.l.bf16 %v1686_v32 }
 0x132   : > { %v1688_v2 = vpop.eup %1687  ;;  %v637_v17 = vadd.f32 1.0, %v605_v5  ;;  %v636_v18 = vadd.f32 1.0, %v604_v6 }
 0x133   : > { %664 = vadd.xlane.f32.xlu0 %v2133_v0  ;;  %v603_v3 = vunpack.c.h.bf16 %v1688_v2  ;;  %v602_v4 = vunpack.c.l.bf16 %v1688_v2  ;;  %v1690_v14 = vpop.eup %1689  ;;  %v639_v23 = vadd.f32 1.0, %v607_v11  ;;  %v638_v24 = vadd.f32 1.0, %v606_v12 }
 0x134   : > { %v609_v20 = vunpack.c.h.bf16 %v1690_v14  ;;  %v608_v13 = vunpack.c.l.bf16 %v1690_v14  ;;  %v2146_v21 = vmul.f32 %v637_v17, %v621_v19  ;;  %v2148_v22 = vmul.f32 %v636_v18, %v620_v45 }
 0x135   : > { %v635_v9 = vadd.f32 1.0, %v603_v3  ;;  %v634_v53 = vadd.f32 1.0, %v602_v4  ;;  %v655_v61 = vmul.f32 %v639_v23, %v623_v27  ;;  %v2154_v31 = vmul.f32 %v638_v24, %v622_v29  ;;  %v2203_v24 = vld [vmem:[%s3180_s5] ss:$0 sm:$0xff] }
 0x136   : > { %v1692_v26 = vpop.eup %1691  ;;  %v641_v25 = vadd.f32 1.0, %v609_v20  ;;  %v640_v30 = vadd.f32 1.0, %v608_v13 }
 0x137   : > { %v2138_v15 = vmul.f32 %v635_v9, %v619_v8  ;;  %v2140_v16 = vmul.f32 %v634_v53, %v618_v10  ;;  %v611_v33 = vunpack.c.h.bf16 %v1692_v26  ;;  %v610_v34 = vunpack.c.l.bf16 %v1692_v26 }
 0x138   : > { %v1694_v36 = vpop.eup %1693  ;;  %v2159_v42 = vmul.f32 %v641_v25, %v625_v38  ;;  %v656_v60 = vmul.f32 %v640_v30, %v624_v40 }
 0x139   : > { %672 = vadd.xlane.f32.xlu1 %v2138_v15  ;;  %670 = vadd.xlane.f32.xlu0 %v2140_v16  ;;  %v643_v35 = vadd.f32 1.0, %v611_v33  ;;  %v642_v47 = vadd.f32 1.0, %v610_v34  ;;  %v613_v49 = vunpack.c.h.bf16 %v1694_v36  ;;  %v612_v50 = vunpack.c.l.bf16 %v1694_v36 }
 0x13b   : > { %v2166_v52 = vmul.f32 %v643_v35, %v627_v48  ;;  %v2168_v54 = vmul.f32 %v642_v47, %v626_v44  ;;  %v645_v58 = vadd.f32 1.0, %v613_v49  ;;  %v644_v59 = vadd.f32 1.0, %v612_v50 }
 0x13d   : > { %676 = vadd.xlane.f32.xlu1 %v2146_v21  ;;  %674 = vadd.xlane.f32.xlu0 %v2148_v22  ;;  %v2172_v28 = vmul.f32 %v645_v58, %v629_v7  ;;  %v2174_v46 = vmul.f32 %v644_v59, %v628_v56 }
 0x141   : > { %680 = vadd.xlane.f32.xlu1 %v655_v61  ;;  %678 = vadd.xlane.f32.xlu0 %v2154_v31 }
 0x145   : > { %684 = vadd.xlane.f32.xlu1 %v2159_v42  ;;  %682 = vadd.xlane.f32.xlu0 %v656_v60 }
 0x149   : > { %688 = vadd.xlane.f32.xlu1 %v2166_v52  ;;  %686 = vadd.xlane.f32.xlu0 %v2168_v54 }
 0x14d   : > { %692 = vadd.xlane.f32.xlu1 %v2172_v28  ;;  %690 = vadd.xlane.f32.xlu0 %v2174_v46 }
 0x1b6   : > { %v667_v51 = vpop.xlane.xlu1 %666 }
 0x1b7   : > { %v697_v41 = vmul.f32 0.0078125, %v667_v51 }
 0x1b8   : > { %v663_v63 = vpop.xlane.xlu0 %662 }
 0x1b9   : > { %v2179_v62 = vsub.f32 %v2120_v37, %v697_v41  ;;  %v695_v11 = vmul.f32 0.0078125, %v663_v63 }
 0x1ba   : > { %v669_v39 = vpop.xlane.xlu1 %668 }
 0x1bb   : > { %v698_v1 = vmul.f32 0.0078125, %v669_v39  ;;  %v729_v43 = vmul.f32 %v2179_v62, %v2179_v62  ;;  %v711_v18 = vsub.f32 %v2126_v55, %v695_v11 }
 0x1bc   : > { %v665_v2 = vpop.xlane.xlu0 %664 }
 0x1bd   : > { %v2184_v32 = vsub.f32 %v2128_v57, %v698_v1  ;;  %747 = vadd.xlane.f32.xlu0 %v729_v43  ;;  %v696_v3 = vmul.f32 0.0078125, %v665_v2  ;;  %v830_v55 = vmul.f32 %v2203_v24, %v711_v18  ;;  %v832_v1 = vmul.f32 %v2203_v24, %v2179_v62 }
 0x1bf   : > { %v730_v4 = vmul.f32 %v2184_v32, %v2184_v32  ;;  %v2189_v5 = vsub.f32 %v2133_v0, %v696_v3  ;;  %v833_v43 = vmul.f32 %v2203_v24, %v2184_v32 }
 0x1c1   : > { %749 = vadd.xlane.f32.xlu1 %v730_v4  ;;  %v728_v37 = vmul.f32 %v2189_v5, %v2189_v5 }
 0x1c2   : > { %v673_v6 = vpop.xlane.xlu1 %672  ;;  %v671_v8 = vpop.xlane.xlu0 %670 }
 0x1c3   : > { %v700_v13 = vmul.f32 0.0078125, %v673_v6 }
 0x1c5   : > { %745 = vadd.xlane.f32.xlu1 %v728_v37  ;;  %v716_v30 = vsub.f32 %v2138_v15, %v700_v13 }
 0x1c6   : > { %v677_v9 = vpop.xlane.xlu1 %676  ;;  %v675_v10 = vpop.xlane.xlu0 %674 }
 0x1c7   : > { %v702_v0 = vmul.f32 0.0078125, %v677_v9  ;;  %v701_v33 = vmul.f32 0.0078125, %v675_v10 }
 0x1c9   : > { %v718_v26 = vsub.f32 %v2146_v21, %v702_v0  ;;  %v699_v21 = vmul.f32 0.0078125, %v671_v8  ;;  %v717_v48 = vsub.f32 %v2148_v22, %v701_v33 }
 0x1ca   : > { %v681_v57 = vpop.xlane.xlu1 %680  ;;  %v679_v53 = vpop.xlane.xlu0 %678 }
 0x1cb   : > { %v704_v12 = vmul.f32 0.0078125, %v681_v57  ;;  %v703_v27 = vmul.f32 0.0078125, %v679_v53  ;;  %v734_v38 = vmul.f32 %v718_v26, %v718_v26  ;;  %v715_v15 = vsub.f32 %v2140_v16, %v699_v21 }
 0x1cc   : > { %v733_v56 = vmul.f32 %v717_v48, %v717_v48  ;;  %v831_v16 = vmul.f32 %v2203_v24, %v2189_v5  ;;  %v837_v3 = vmul.f32 %v2203_v24, %v718_v26  ;;  %v836_v4 = vmul.f32 %v2203_v24, %v717_v48 }
 0x1cd   : > { %v2193_v14 = vsub.f32 %v655_v61, %v704_v12  ;;  %v727_v61 = vmul.f32 %v711_v18, %v711_v18  ;;  %v719_v34 = vsub.f32 %v2154_v31, %v703_v27  ;;  %v731_v22 = vmul.f32 %v715_v15, %v715_v15 }
 0x1ce   : > { %v683_v17 = vpop.xlane.xlu0 %682  ;;  %v685_v25 = vpop.xlane.xlu1 %684  ;;  %v2253_v48 = vstv %s894_s12  ;;  %s1821_s12 = sshll.u32 %s1888_s11, 4  ;;  %s1822_s12 = int_to_ptr.vmem [resolvable:$false] %s1821_s12 }
 0x1cf   : > { %v705_v19 = vmul.f32 0.0078125, %v683_v17  ;;  %v736_v45 = vmul.f32 %v2193_v14, %v2193_v14  ;;  %v706_v36 = vmul.f32 0.0078125, %v685_v25  ;;  %v735_v47 = vmul.f32 %v719_v34, %v719_v34  ;;  %s1823_s13 = scalar_lea.vmem %s1822_s12, 32  ;;  %p1824_p12 = scmp.lt.s32.totalorder %s1448_s21, %s1822_s12 }
 0x1d0   : > { %v839_v62 = vmul.f32 %v2203_v24, %v2193_v14  ;;  %v838_v5 = vmul.f32 %v2203_v24, %v719_v34  ;;  %p1825_p13 = scmp.lt.s32.totalorder %s1823_s13, %s1817_s10 }
 0x1d1   : > { %v2198_v20 = vsub.f32 %v656_v60, %v705_v19  ;;  %761 = vadd.xlane.f32.xlu1 %v736_v45  ;;  %v732_v60 = vmul.f32 %v716_v30, %v716_v30  ;;  %v722_v44 = vsub.f32 %v2159_v42, %v706_v36 }
 0x1d2   : > { %v687_v23 = vpop.xlane.xlu0 %686  ;;  %v689_v49 = vpop.xlane.xlu1 %688  ;;  %p1826_p0 = por %p1825_p13, %p1824_p12 }
 0x1d3   : > { %v737_v29 = vmul.f32 %v2198_v20, %v2198_v20  ;;  %v707_v50 = vmul.f32 0.0078125, %v687_v23  ;;  %v738_v7 = vmul.f32 %v722_v44, %v722_v44  ;;  %v708_v58 = vmul.f32 0.0078125, %v689_v49 }
 0x1d4   : > { %v841_v32 = vmul.f32 %v2203_v24, %v722_v44  ;;  %v840_v6 = vmul.f32 %v2203_v24, %v2198_v20  ;;  %p1827_p1 = pnand %p1826_p0, %p1820_p11 }
 0x1d5   : > { %846 = vadd.xlane.f32.xlu1 %v830_v55  ;;  %763 = vadd.xlane.f32.xlu0 %v737_v29  ;;  %v723_v59 = vsub.f32 %v2168_v54, %v707_v50  ;;  %v724_v41 = vsub.f32 %v2166_v52, %v708_v58  ;;  %v834_v52 = vmul.f32 %v2203_v24, %v715_v15  ;;  %v2258_v15 = vld [vmem:[%s2251_s16 + $0x8] sm:$0xff]  ;;  %v2264_v58 = vld [vmem:[%s2251_s16] sm:$0xff] }
 0x1d6   : > { %v691_v40 = vpop.xlane.xlu0 %690  ;;  %v693_v42 = vpop.xlane.xlu1 %692  ;;  %vm945_vm0 = vcmp.eq.s32.totalorder %v2258_v15, 0  ;;  %vm944_vm1 = vcmp.eq.s32.totalorder %v2264_v58, 0  ;;  %vm3183_vm3 = vcmp.ge.s32.totalorder %v2258_v15, 0  ;;  %vm3182_vm5 = vcmp.ge.s32.totalorder %v2264_v58, 0 }
 0x1d7   : > { %v709_v35 = vmul.f32 0.0078125, %v691_v40  ;;  %v710_v63 = vmul.f32 0.0078125, %v693_v42  ;;  %v739_v39 = vmul.f32 %v723_v59, %v723_v59  ;;  %v740_v54 = vmul.f32 %v724_v41, %v724_v41 }
 0x1d8   : > { %v843_v37 = vmul.f32 %v2203_v24, %v724_v41  ;;  %v842_v9 = vmul.f32 %v2203_v24, %v723_v59  ;;  %vm1305_vm6 = vcmp.eq.s32.totalorder %v2264_v58, 1  ;;  %vm1306_vm7 = vcmp.eq.s32.totalorder %v2258_v15, 1 }
 0x1d9   : > { %757 = vadd.xlane.f32.xlu1 %v734_v38  ;;  %743 = vadd.xlane.f32.xlu0 %v727_v61  ;;  %v725_v31 = vsub.f32 %v2174_v46, %v709_v35  ;;  %v726_v46 = vsub.f32 %v2172_v28, %v710_v63  ;;  %v835_v28 = vmul.f32 %v2203_v24, %v716_v30 }
 0x1db   : > { %v741_v51 = vmul.f32 %v725_v31, %v725_v31  ;;  %v742_v2 = vmul.f32 %v726_v46, %v726_v46  ;;  %v845_v8 = vmul.f32 %v2203_v24, %v726_v46  ;;  %v844_v10 = vmul.f32 %v2203_v24, %v725_v31  ;;  %v2276_v46 = vld [vmem:[%s2251_s16 + $0x10] sm:$0xff] }
 0x1dc   : > { %vm946_vm2 = vcmp.eq.s32.totalorder %v2276_v46, 0  ;;  %vm1307_vm11 = vcmp.eq.s32.totalorder %v2276_v46, 1 }
 0x1dd   : > { %753 = vadd.xlane.f32.xlu1 %v732_v60  ;;  %759 = vadd.xlane.f32.xlu0 %v735_v47 }
 0x1e1   : > { %765 = vadd.xlane.f32.xlu1 %v738_v7  ;;  %755 = vadd.xlane.f32.xlu0 %v733_v56 }
 0x1e5   : > { %751 = vadd.xlane.f32.xlu0 %v731_v22  ;;  %771 = vadd.xlane.f32.xlu1 %v741_v51 }
 0x1e9   : > { %848 = vadd.xlane.f32.xlu0 %v831_v16  ;;  %767 = vadd.xlane.f32.xlu1 %v739_v39 }
 0x1ed   : > { %850 = vadd.xlane.f32.xlu0 %v832_v1  ;;  %769 = vadd.xlane.f32.xlu1 %v740_v54 }
 0x1f1   : > { %852 = vadd.xlane.f32.xlu0 %v833_v43  ;;  %773 = vadd.xlane.f32.xlu1 %v742_v2 }
 0x1f5   : > { %854 = vadd.xlane.f32.xlu0 %v834_v52  ;;  %860 = vadd.xlane.f32.xlu1 %v837_v3 }
 0x1f9   : > { %856 = vadd.xlane.f32.xlu0 %v835_v28  ;;  %864 = vadd.xlane.f32.xlu1 %v839_v62 }
 0x1fd   : > { %858 = vadd.xlane.f32.xlu0 %v836_v4  ;;  %868 = vadd.xlane.f32.xlu1 %v841_v32 }
 0x201   : > { %862 = vadd.xlane.f32.xlu0 %v838_v5  ;;  %872 = vadd.xlane.f32.xlu1 %v843_v37 }
 0x205   : > { %866 = vadd.xlane.f32.xlu0 %v840_v6  ;;  %876 = vadd.xlane.f32.xlu1 %v845_v8 }
 0x209   : > { %870 = vadd.xlane.f32.xlu0 %v842_v9 }
 0x20d   : > { %874 = vadd.xlane.f32.xlu0 %v844_v10 }
 0x246   : > { %v748_v11 = vpop.xlane.xlu0 %747 }
 0x247   : > { %v777_v19 = vmul.f32 0.0078125, %v748_v11  ;;  %v2296_v11 = vld [vmem:[%s2251_s16 + $0x18] sm:$0xff] }
 0x248   : > { %vm947_vm4 = vcmp.eq.s32.totalorder %v2296_v11, 0 }
 0x249   : > { %v793_v24 = vadd.f32 1e-12, %v777_v19 }
 0x24a   : > { %v750_v57 = vpop.xlane.xlu1 %749 }
 0x24b   : > { %v778_v26 = vmul.f32 0.0078125, %v750_v57 }
 0x24d   : > { %v794_v25 = vadd.f32 1e-12, %v778_v26 }
 0x24e   : > { %v746_v53 = vpop.xlane.xlu1 %745 }
 0x24f   : > { %v776_v14 = vmul.f32 0.0078125, %v746_v53 }
 0x251   : > { %v792_v0 = vadd.f32 1e-12, %v776_v14 }
 0x253   : > { %1695 = vrsqrt.f32 %v792_v0 }
 0x25a   : > { %v762_v12 = vpop.xlane.xlu1 %761 }
 0x25b   : > { %v784_v47 = vmul.f32 0.0078125, %v762_v12 }
 0x25d   : > { %v800_v42 = vadd.f32 1e-12, %v784_v47 }
 0x25e   : > { %v847_v17 = vpop.xlane.xlu1 %846  ;;  %v2238_v18 = vpop.xlane.xlu0 %763 }
 0x25f   : > { %v785_v47 = vmul.f32 0.0078125, %v2238_v18 }
 0x260   : > { %v1696_v60 = vpop.eup %1695 }
 0x262   : > { %v758_v45 = vpop.xlane.xlu1 %757  ;;  %v744_v20 = vpop.xlane.xlu0 %743 }
 0x263   : > { %v775_v13 = vmul.f32 0.0078125, %v744_v20  ;;  %v782_v29 = vmul.f32 0.0078125, %v758_v45 }
 0x265   : > { %v791_v23 = vadd.f32 1e-12, %v775_v13  ;;  %v798_v33 = vadd.f32 1e-12, %v782_v29 }
 0x266   : > { %v754_v27 = vpop.xlane.xlu1 %753  ;;  %v2241_v55 = vpop.xlane.xlu0 %759 }
 0x267   : > { %1697 = vrsqrt.f32 %v791_v23  ;;  %v780_v40 = vmul.f32 0.0078125, %v754_v27  ;;  %v2311_v27 = vld [vmem:[%s2251_s16 + $0x38] sm:$0xff] }
 0x268   : > { %1699 = vrsqrt.f32 %v793_v24  ;;  %vm951_vm12 = vcmp.eq.s32.totalorder %v2311_v27, 0 }
 0x269   : > { %1701 = vrsqrt.f32 %v794_v25  ;;  %v796_v50 = vadd.f32 1e-12, %v780_v40 }
 0x26a   : > { %v766_v30 = vpop.xlane.xlu1 %765  ;;  %v2244_v61 = vpop.xlane.xlu0 %755  ;;  %1703 = vrsqrt.f32 %v798_v33 }
 0x26b   : > { %v786_v0 = vmul.f32 0.0078125, %v766_v30  ;;  %v781_v20 = vmul.f32 0.0078125, %v2244_v61  ;;  %v2314_v30 = vld [vmem:[%s2251_s16 + $0x20] sm:$0xff] }
 0x26c   : > { %vm948_vm14 = vcmp.eq.s32.totalorder %v2314_v30, 0 }
 0x26d   : > { %v802_v25 = vadd.f32 1e-12, %v786_v0  ;;  %v797_v40 = vadd.f32 1e-12, %v781_v20 }
 0x26e   : > { %v2246_v34 = vpop.xlane.xlu1 %771  ;;  %v752_v36 = vpop.xlane.xlu0 %751 }
 0x26f   : > { %v779_v38 = vmul.f32 0.0078125, %v752_v36 }
 0x271   : > { %v795_v21 = vadd.f32 1e-12, %v779_v38 }
 0x272   : > { %v2255_v44 = vpop.xlane.xlu1 %767  ;;  %v849_v35 = vpop.xlane.xlu0 %848 }
 0x273   : > { %v879_v49 = vmul.f32 %v1696_v60, %v849_v35  ;;  %1705 = vrsqrt.f32 %v795_v21 }
 0x274   : > { %v1698_v31 = vpop.eup %1697  ;;  %1707 = vrsqrt.f32 %v796_v50 }
 0x275   : > { %v2261_v7 = vadd.f32 %v2253_v48, %v879_v49  ;;  %v878_v56 = vmul.f32 %v1698_v31, %v847_v17  ;;  %v1700_v51 = vpop.eup %1699  ;;  %1709 = vrsqrt.f32 %v800_v42 }
 0x276   : > { %v2267_v59 = vpop.xlane.xlu1 %769  ;;  %v851_v22 = vpop.xlane.xlu0 %850 }
 0x277   : > { %v961_v41 = vsub.f32 0.0, %v2261_v7  ;;  %v896_v63 = vadd.f32 %v2253_v48, %v878_v56  ;;  %v880_v16 = vmul.f32 %v1700_v51, %v851_v22  ;;  %v1702_v52 = vpop.eup %1701  ;;  %vm1290_vm8 = vcmp.gt.f32.partialorder %v2261_v7, 0.0 }
 0x278   : > { %v1704_v37 = vpop.eup %1703  ;;  %vm2324_vm10 = vmxor %vm1290_vm8, %vm1306_vm7  ;;  %v783_v22 = vmul.f32 0.0078125, %v2241_v55  ;;  %v789_v55 = vmul.f32 0.0078125, %v2246_v34  ;;  %vm1309_vm8 = vcmp.eq.s32.totalorder %v2314_v30, 1  ;;  %v2530_v34 = vld [vmem:[%s2251_s16 + $0x30] sm:$0xff] }
 0x279   : > { %v2273_v39 = vsel %vm945_vm0, %v2261_v7, %v961_v41  ;;  %v960_v1 = vsub.f32 0.0, %v896_v63  ;;  %v2282_v3 = vadd.f32 %v2253_v48, %v880_v16  ;;  %vm1289_vm9 = vcmp.gt.f32.partialorder %v896_v63, 0.0 }
 0x27a   : > { %v1009_v54 = vand.u32 2147483647, %v2273_v39  ;;  %v2279_v43 = vpop.xlane.xlu1 %773  ;;  %v853_v2 = vpop.xlane.xlu0 %852  ;;  %vm2334_vm13 = vmxor %vm1289_vm9, %vm1305_vm6  ;;  %vm1886_vm0 = vmmov 1   ;;  %vm1248_vm6 = vcmask 7168   ;;  %vm1312_vm9 = vcmp.eq.s32.totalorder %v2311_v27, 1 }
 0x27b   : > { %v2284_v28 = vsel %vm944_vm1, %v896_v63, %v960_v1  ;;  %v881_v4 = vmul.f32 %v1702_v52, %v853_v2  ;;  %v962_v5 = vsub.f32 0.0, %v2282_v3  ;;  %vm1291_vm15 = vcmp.gt.f32.partialorder %v2282_v3, 0.0  ;;  %vm2346_vm1 = vmxor %vm2324_vm10, %vm1886_vm0  ;;  %v2387_v1 = vld [vmem:[%s2251_s16 + $0x48] sm:$0xff] }
 0x27c   : > { %v1025_v62 = vsub.f32 0.0, %v1009_v54  ;;  %v1008_v32 = vand.u32 2147483647, %v2284_v28  ;;  %vm2359_vm7 = vmxor %vm2334_vm13, %vm1886_vm0  ;;  %v788_v63 = vmul.f32 0.0078125, %v2267_v59  ;;  %v2390_v59 = vld [vmem:[%s2251_s16 + $0x28] sm:$0xff]  ;;  %vm953_vm13 = vcmp.eq.s32.totalorder %v2387_v1, 0 }
 0x27d   : > { %v2290_v6 = vadd.f32 %v2253_v48, %v881_v4  ;;  %v2293_v53 = vsel %vm946_vm2, %v2282_v3, %v962_v5  ;;  %vm930_vm2 = vcmp.ge.s32.totalorder %v2276_v46, 0  ;;  %vm2375_vm10 = vmxor %vm1291_vm15, %vm1307_vm11  ;;  %v801_v54 = vadd.f32 1e-12, %v785_v47 }
 0x27e   : > { %v861_v8 = vpop.xlane.xlu1 %860  ;;  %v855_v9 = vpop.xlane.xlu0 %854  ;;  %v1024_v10 = vsub.f32 0.0, %v1008_v32  ;;  %v1042_v57 = vmul.f32 1.442695, %v1025_v62  ;;  %v1010_v14 = vand.u32 2147483647, %v2293_v53  ;;  %vm2396_vm11 = vmand %vm2346_vm1, %vm3183_vm3 }
 0x27f   : > { %v885_v12 = vmul.f32 %v1704_v37, %v861_v8  ;;  %v963_v45 = vsub.f32 0.0, %v2290_v6  ;;  %v799_v62 = vadd.f32 1e-12, %v783_v22  ;;  %v805_v37 = vadd.f32 1e-12, %v789_v55  ;;  %vm2418_vm1 = vmxor %vm2375_vm10, %vm1886_vm0 }
 0x280   : > { %v1706_v17 = vpop.eup %1705  ;;  %v1040_v19 = vmul.f32 1.442695, %v1024_v10  ;;  %1711 = vpow2.f32 %v1042_v57  ;;  %v1026_v26 = vsub.f32 0.0, %v1010_v14  ;;  %v787_v57 = vmul.f32 0.0078125, %v2255_v44 }
 0x281   : > { %v2305_v13 = vadd.f32 %v2253_v48, %v885_v12  ;;  %v882_v23 = vmul.f32 %v1706_v17, %v855_v9  ;;  %v1708_v29 = vpop.eup %1707  ;;  %v2322_v33 = vsel %vm947_vm4, %v2290_v6, %v963_v45  ;;  %vm1308_vm4 = vcmp.eq.s32.totalorder %v2296_v11, 1 }
 0x282   : > { %v857_v24 = vpop.xlane.xlu0 %856  ;;  %1713 = vpow2.f32 %v1040_v19  ;;  %v865_v36 = vpop.xlane.xlu1 %864  ;;  %v1044_v50 = vmul.f32 1.442695, %v1026_v26  ;;  %v1011_v7 = vand.u32 2147483647, %v2322_v33  ;;  %v804_v12 = vadd.f32 1e-12, %v788_v63 }
 0x283   : > { %v2317_v61 = vadd.f32 %v2253_v48, %v882_v23  ;;  %v883_v38 = vmul.f32 %v1708_v29, %v857_v24  ;;  %v967_v60 = vsub.f32 0.0, %v2305_v13  ;;  %v1710_v35 = vpop.eup %1709  ;;  %1715 = vrsqrt.f32 %v802_v25 }
 0x284   : > { %v887_v56 = vmul.f32 %v1710_v35, %v865_v36  ;;  %1717 = vrsqrt.f32 %v797_v40  ;;  %v1027_v52 = vsub.f32 0.0, %v1011_v7  ;;  %vm1296_vm15 = vcmp.gt.f32.partialorder %v2305_v13, 0.0 }
 0x285   : > { %v964_v31 = vsub.f32 0.0, %v2317_v61  ;;  %v2353_v51 = vadd.f32 %v2253_v48, %v883_v38  ;;  %v2368_v41 = vsel %vm951_vm12, %v2305_v13, %v967_v60  ;;  %1719 = vpow2.f32 %v1044_v50  ;;  %v2505_v50 = vld [vmem:[%s2251_s16 + $0x58] sm:$0xff] }
 0x286   : > { %vm1292_vm12 = vcmp.gt.f32.partialorder %v2290_v6, 0.0  ;;  %v2402_v3 = vadd.f32 %v2253_v48, %v887_v56  ;;  %v1015_v32 = vand.u32 2147483647, %v2368_v41  ;;  %vm3188_vm10 = vcmp.ge.s32.totalorder %v2314_v30, 0  ;;  %v869_v60 = vpop.xlane.xlu1 %868  ;;  %v859_v18 = vpop.xlane.xlu0 %858 }
 0x287   : > { %v2384_v16 = vsel %vm948_vm14, %v2317_v61, %v964_v31  ;;  %vm2408_vm14 = vmand %vm2359_vm7, %vm3182_vm5  ;;  %v965_v5 = vsub.f32 0.0, %v2353_v51  ;;  %vm949_vm5 = vcmp.eq.s32.totalorder %v2390_v59, 0  ;;  %vm1310_vm7 = vcmp.eq.s32.totalorder %v2390_v59, 1 }
 0x288   : > { %v1012_v9 = vand.u32 2147483647, %v2384_v16  ;;  %vm2432_vm3 = vmxor %vm1292_vm12, %vm1308_vm4  ;;  %1721 = vrsqrt.f32 %v801_v54  ;;  %v1887_v17 = vmov 0.0   ;;  %v1046_v0 = vmul.f32 1.442695, %v1027_v52 }
 0x289   : > { %v1369_v44 = vsel %vm2408_vm14, 1.0, %v1887_v17  ;;  %vm2446_vm4 = vmxor %vm1296_vm15, %vm1312_vm9  ;;  %v969_v19 = vsub.f32 0.0, %v2402_v3  ;;  %1723 = vrsqrt.f32 %v799_v62  ;;  %v1031_v23 = vsub.f32 0.0, %v1015_v32  ;;  %v2641_v62 = vld [vmem:[%s2251_s16 + $0x68] sm:$0xff] }
 0x28a   : > { %vm2457_vm12 = vmand %vm2418_vm1, %vm930_vm2  ;;  %vm1293_vm14 = vcmp.gt.f32.partialorder %v2317_v61, 0.0  ;;  %v2465_v13 = vsel %vm949_vm5, %v2353_v51, %v965_v5  ;;  %1725 = vrsqrt.f32 %v805_v37  ;;  %v1370_v26 = vsel %vm2396_vm11, 1.0, %v1887_v17 }
 0x28b   : > { %vm2474_vm9 = vmxor %vm2432_vm3, %vm1886_vm0  ;;  %v1028_v25 = vsub.f32 0.0, %v1012_v9  ;;  %v803_v36 = vadd.f32 1e-12, %v787_v57  ;;  %v1385_v38 = vsel %vm1248_vm6, %v1369_v44, 0.0  ;;  %1727 = vrsqrt.f32 %v804_v12 }
 0x28c   : > { %v790_v40 = vmul.f32 0.0078125, %v2279_v43  ;;  %vm2483_vm5 = vmxor %vm2446_vm4, %vm1886_vm0  ;;  %vm3185_vm11 = vcmp.ge.s32.totalorder %v2387_v1, 0  ;;  %1729 = vpow2.f32 %v1046_v0  ;;  %v2500_v43 = vsel %vm953_vm13, %v2402_v3, %v969_v19 }
 0x28d   : > { %v2425_v10 = vpop.eup %1711  ;;  %vm2493_vm3 = vmxor %vm1293_vm14, %vm1309_vm8  ;;  %vm3187_vm15 = vcmp.ge.s32.totalorder %v2390_v59, 0  ;;  %v1013_v49 = vand.u32 2147483647, %v2465_v13  ;;  %v1386_v7 = vsel %vm1248_vm6, %v1370_v26, 0.0  ;;  %v1371_v61 = vsel %vm2457_vm12, 1.0, %v1887_v17 }
 0x28e   : > { %v1081_v24 = vadd.f32 1.0, %v2425_v10  ;;  %vm3222_vm8 = vcmp.ge.s32.totalorder %v2296_v11, 0  ;;  %v1054_v22 = vmul.f32 1.442695, %v1031_v23  ;;  %vm1298_vm1 = vcmp.gt.f32.partialorder %v2402_v3, 0.0 }
 0x28f   : > { %v2451_v45 = vpop.eup %1713  ;;  %vm2515_vm13 = vmand %vm2474_vm9, %vm3222_vm8  ;;  %vm3225_vm4 = vcmp.ge.s32.totalorder %v2311_v27, 0  ;;  %v1048_v42 = vmul.f32 1.442695, %v1028_v25  ;;  %vm1294_vm12 = vcmp.gt.f32.partialorder %v2353_v51, 0.0  ;;  %v1387_v2 = vadd.f32 %v1386_v7, %v1385_v38 }
 0x290   : > { %v1072_v35 = vadd.f32 1.0, %v2451_v45  ;;  %v1716_v31 = vpop.eup %1715  ;;  %1731 = vlog2.f32 %v1081_v24  ;;  %vm2524_vm14 = vmand %vm2483_vm5, %vm3225_vm4  ;;  %v806_v52 = vadd.f32 1e-12, %v790_v40  ;;  %v1017_v4 = vand.u32 2147483647, %v2500_v43 }
 0x291   : > { %v889_v63 = vmul.f32 %v1716_v31, %v869_v60  ;;  %v1718_v54 = vpop.eup %1717  ;;  %1733 = vrsqrt.f32 %v803_v36  ;;  %vm2535_vm9 = vmxor %vm2493_vm3, %vm1886_vm0  ;;  %vm1316_vm5 = vcmp.eq.s32.totalorder %v2505_v50, 1  ;;  %v1372_v5 = vsel %vm2515_vm13, 1.0, %v1887_v17 }
 0x292   : > { %v2541_v32 = vpop.eup %1719  ;;  %1735 = vlog2.f32 %v1072_v35  ;;  %vm3230_vm8 = vcmp.eq.s32.totalorder %v2387_v1, 1  ;;  %v1029_v8 = vsub.f32 0.0, %v1013_v49  ;;  %v884_v9 = vmul.f32 %v1718_v54, %v859_v18  ;;  %vm2559_vm3 = vmxor %vm1294_vm12, %vm1310_vm7 }
 0x293   : > { %vm2550_vm4 = vmxor %vm1298_vm1, %vm3230_vm8  ;;  %v1388_v57 = vsel %vm1248_vm6, %v1371_v61, 0.0  ;;  %1737 = vpow2.f32 %v1054_v22  ;;  %vm955_vm13 = vcmp.eq.s32.totalorder %v2505_v50, 0  ;;  %vm950_vm1 = vcmp.eq.s32.totalorder %v2530_v34, 0 }
 0x294   : > { %v992_v3 = vmax.f32 %v2284_v28, 0.0  ;;  %v993_v14 = vmax.f32 %v2273_v39, 0.0  ;;  %1739 = vpow2.f32 %v1048_v42  ;;  %vm2571_vm8 = vmand %vm2535_vm9, %vm3188_vm10  ;;  %v907_v51 = vadd.f32 %v2253_v48, %v889_v63  ;;  %v873_v42 = vpop.xlane.xlu1 %872 }
 0x295   : > { %v1090_v0 = vadd.f32 1.0, %v2541_v32  ;;  %v1390_v6 = vsel %vm1248_vm6, %v1372_v5, 0.0  ;;  %v1033_v19 = vsub.f32 0.0, %v1017_v4  ;;  %vm2581_vm7 = vmxor %vm2550_vm4, %vm1886_vm0  ;;  %vm1311_vm12 = vcmp.eq.s32.totalorder %v2530_v34, 1  ;;  %v2597_v36 = vpop.eup %1721 }
 0x296   : > { %v2587_v23 = vadd.f32 %v2253_v48, %v884_v9  ;;  %v1389_v26 = vadd.f32 %v1388_v57, %v1387_v2  ;;  %1741 = vrsqrt.f32 %v806_v52  ;;  %v1050_v29 = vmul.f32 1.442695, %v1029_v8  ;;  %vm2593_vm9 = vmxor %vm2559_vm3, %vm1886_vm0  ;;  %v2608_v35 = vpop.eup %1723 }
 0x297   : > { %v1376_v40 = vsel %vm2524_vm14, 1.0, %v1887_v17  ;;  %v1373_v21 = vsel %vm2571_vm8, 1.0, %v1887_v17  ;;  %vm3184_vm4 = vcmp.ge.s32.totalorder %v2505_v50, 0  ;;  %v1084_v47 = vmul.f32 -0.5, %v2425_v10  ;;  %vm2616_vm14 = vmand %vm2581_vm7, %vm3185_vm11  ;;  %v2620_v56 = vpop.eup %1725 }
 0x298   : > { %v966_v60 = vsub.f32 0.0, %v2587_v23  ;;  %v1391_v49 = vadd.f32 %v1390_v6, %v1389_v26  ;;  %v971_v61 = vsub.f32 0.0, %v907_v51  ;;  %1743 = vlog2.f32 %v1090_v0  ;;  %vm2626_vm3 = vmand %vm2593_vm9, %vm3187_vm15  ;;  %v1728_v63 = vpop.eup %1727 }
 0x299   : > { %v1058_v22 = vmul.f32 1.442695, %v1033_v19  ;;  %vm1300_vm8 = vcmp.gt.f32.partialorder %v907_v51, 0.0  ;;  %v2636_v54 = vsel %vm1248_vm6, %v1376_v40, 0.0  ;;  %v1392_v52 = vsel %vm1248_vm6, %v1373_v21, 0.0  ;;  %v2643_v4 = vpop.eup %1729 }
 0x29a   : > { %v2633_v55 = vsel %vm950_vm1, %v2587_v23, %v966_v60  ;;  %1745 = vpow2.f32 %v1050_v29  ;;  %v1075_v5 = vmul.f32 -0.5, %v2451_v45  ;;  %v1087_v37 = vand.u32 2147483647, %v2425_v10  ;;  %vm2662_vm7 = vmxor %vm1300_vm8, %vm1316_vm5  ;;  %v2675_v60 = vld [vmem:[%s2251_s16 + $0x40] sm:$0xff] }
 0x29b   : > { %v1378_v8 = vsel %vm2616_vm14, 1.0, %v1887_v17  ;;  %vm3186_vm1 = vcmp.ge.s32.totalorder %v2530_v34, 0  ;;  %v1014_v9 = vand.u32 2147483647, %v2633_v55  ;;  %v1085_v57 = vadd.f32 1.0, %v1084_v47 }
 0x29c   : > { %v1374_v12 = vsel %vm2626_vm3, 1.0, %v1887_v17  ;;  %v2657_v44 = vsel %vm955_vm13, %v907_v51, %v971_v61  ;;  %v891_v6 = vmul.f32 %v1728_v63, %v873_v42  ;;  %v1093_v20 = vmul.f32 -0.5, %v2541_v32  ;;  %vm2688_vm13 = vmxor %vm2662_vm7, %vm1886_vm0 }
 0x29d   : > { %v1732_v19 = vpop.eup %1731  ;;  %1747 = vpow2.f32 %v1058_v22  ;;  %v1030_v26 = vsub.f32 0.0, %v1014_v9  ;;  %vm1295_vm9 = vcmp.gt.f32.partialorder %v2587_v23, 0.0  ;;  %vm957_vm14 = vcmp.eq.s32.totalorder %v2641_v62, 0  ;;  %v863_v9 = vpop.xlane.xlu0 %862 }
 0x29e   : > { %v2669_v29 = vpop.eup %1733  ;;  %v1078_v25 = vand.u32 2147483647, %v2451_v45  ;;  %v1099_v51 = vadd.f32 1.0, %v2643_v4  ;;  %v1102_v40 = vmul.f32 -0.5, %v2643_v4  ;;  %v1393_v21 = vadd.f32 %v1392_v52, %v1391_v49  ;;  %vm2700_vm3 = vmxor %vm1295_vm9, %vm1311_vm12 }
 0x29f   : > { %v1736_v47 = vpop.eup %1735  ;;  %v1076_v7 = vadd.f32 1.0, %v1075_v5  ;;  %vm2677_vm5 = vcmp.lt.f32.partialorder %v1087_v37, 0.0004427343  ;;  %v2682_v22 = vsel %vm1248_vm6, %v1378_v8, 0.0  ;;  %v1019_v18 = vand.u32 2147483647, %v2657_v44  ;;  %vm2719_vm12 = vmand %vm2688_vm13, %vm3184_vm4 }
 0x2a0   : > { %v2692_v49 = vpop.eup %1737  ;;  %v1083_v63 = vmul.f32 0.6931472, %v1732_v19  ;;  %v1086_v52 = vmul.f32 %v2425_v10, %v1085_v57  ;;  %v1394_v5 = vsel %vm1248_vm6, %v1374_v12, 0.0  ;;  %v2705_v8 = vadd.f32 %v2253_v48, %v891_v6  ;;  %vm2734_vm9 = vmxor %vm2700_vm3, %vm1886_vm0 }
 0x2a1   : > { %v2707_v0 = vpop.eup %1739  ;;  %v1094_v19 = vadd.f32 1.0, %v1093_v20  ;;  %v1096_v10 = vand.u32 2147483647, %v2541_v32  ;;  %v1052_v12 = vmul.f32 1.442695, %v1030_v26  ;;  %1749 = vlog2.f32 %v1099_v51  ;;  %v2725_v20 = vld [vmem:[%s2251_s16 + $0x78] sm:$0xff]  ;;  %vm2773_vm11 = vmand %vm2734_vm9, %vm3186_vm1  ;;  %v867_v2 = vpop.xlane.xlu0 %866 }
 0x2a2   : > { %v1074_v31 = vmul.f32 0.6931472, %v1736_v47  ;;  %vm2711_vm8 = vcmp.lt.f32.partialorder %v1078_v25, 0.0004427343  ;;  %v1103_v23 = vadd.f32 1.0, %v1102_v40  ;;  %vm1313_vm7 = vcmp.eq.s32.totalorder %v2675_v60, 1 }
 0x2a3   : > { %v1742_v26 = vpop.eup %1741  ;;  %v1077_v25 = vmul.f32 %v2451_v45, %v1076_v7  ;;  %v1135_v47 = vadd.f32 1.0, %v2692_v49  ;;  %v2729_v57 = vadd.f32 %v1394_v5, %v1393_v21  ;;  %v1035_v51 = vsub.f32 0.0, %v1019_v18 }
 0x2a4   : > { %vm952_vm13 = vcmp.eq.s32.totalorder %v2675_v60, 0  ;;  %v1089_v42 = vsel %vm2677_vm5, %v1086_v52, %v1083_v63  ;;  %v1138_v45 = vmul.f32 -0.5, %v2692_v49  ;;  %v1108_v7 = vadd.f32 1.0, %v2707_v0  ;;  %v877_v63 = vpop.xlane.xlu1 %876  ;;  %v2756_v52 = vld [vmem:[%s2251_s16 + $0x50] sm:$0xff] }
 0x2a5   : > { %v973_v21 = vsub.f32 0.0, %v2705_v8  ;;  %vm3189_vm4 = vcmp.ge.s32.totalorder %v2675_v60, 0  ;;  %v2746_v18 = vmul.f32 %v2541_v32, %v1094_v19  ;;  %vm2748_vm3 = vcmp.lt.f32.partialorder %v1096_v10, 0.0004427343  ;;  %v1744_v38 = vpop.eup %1743 }
 0x2a6   : > { %v1105_v37 = vand.u32 2147483647, %v2643_v4  ;;  %v1111_v61 = vmul.f32 -0.5, %v2707_v0  ;;  %1751 = vpow2.f32 %v1052_v12  ;;  %vm959_vm5 = vcmp.eq.s32.totalorder %v2725_v20, 0  ;;  %v2827_v12 = vld [vmem:[%s2251_s16 + $0x60] sm:$0xff] }
 0x2a7   : > { %v1080_v24 = vsel %vm2711_vm8, %v1077_v25, %v1074_v31  ;;  %v2761_v32 = vmul.f32 %v2643_v4, %v1103_v23  ;;  %v2767_v10 = vsel %vm2719_vm12, 1.0, %v1887_v17  ;;  %v2777_v31 = vpop.eup %1745  ;;  %v1217_v4 = vadd.f32 %v1089_v42, %v993_v14 }
 0x2a8   : > { %1753 = vlog2.f32 %v1135_v47  ;;  %v1062_v23 = vmul.f32 1.442695, %v1035_v51  ;;  %vm1318_vm8 = vcmp.eq.s32.totalorder %v2641_v62, 1  ;;  %v886_v6 = vmul.f32 %v2608_v35, %v863_v9 }
 0x2a9   : > { %v2783_v25 = vadd.f32 1.0, %v1138_v45  ;;  %1755 = vlog2.f32 %v1108_v7  ;;  %v2788_v40 = vsel %vm957_vm14, %v2705_v8, %v973_v21  ;;  %v893_v19 = vmul.f32 %v1742_v26, %v877_v63 }
 0x2aa   : > { %vm954_vm12 = vcmp.eq.s32.totalorder %v2756_v52, 0  ;;  %vm1315_vm9 = vcmp.eq.s32.totalorder %v2756_v52, 1  ;;  %v1216_v39 = vadd.f32 %v1080_v24, %v992_v3  ;;  %v1112_v14 = vadd.f32 1.0, %v1111_v61  ;;  %v2798_v47 = vpop.eup %1747 }
 0x2ab   : > { %v1375_v35 = vsel %vm2773_vm11, 1.0, %v1887_v17  ;;  %v888_v9 = vmul.f32 %v2597_v36, %v867_v2  ;;  %v1092_v51 = vmul.f32 0.6931472, %v1744_v38  ;;  %v1114_v42 = vand.u32 2147483647, %v2707_v0 }
 0x2ac   : > { %v1117_v26 = vadd.f32 1.0, %v2777_v31  ;;  %v904_v45 = vadd.f32 %v2253_v48, %v886_v6  ;;  %vm3263_vm1 = vcmp.ge.s32.totalorder %v2258_v15, 0  ;;  %1757 = vpow2.f32 %v1062_v23 }
 0x2ad   : > { %v1233_v28 = vsel %vm3263_vm1, %v1217_v4, 0.0  ;;  %v998_v3 = vmax.f32 %v2633_v55, 0.0  ;;  %v1021_v24 = vand.u32 2147483647, %v2788_v40  ;;  %v1396_v36 = vsel %vm1248_vm6, %v1375_v35, 0.0  ;;  %v2855_v35 = vld [vmem:[%s2251_s16 + $0x70] sm:$0xff] }
 0x2ae   : > { %v968_v38 = vsub.f32 0.0, %v904_v45  ;;  %vm1297_vm11 = vcmp.gt.f32.partialorder %v904_v45, 0.0  ;;  %v2810_v7 = vadd.f32 %v2253_v48, %v893_v19  ;;  %vm1320_vm15 = vcmp.eq.s32.totalorder %v2725_v20, 1  ;;  %v1750_v2 = vpop.eup %1749 }
 0x2af   : > { %vm3264_vm10 = vcmp.ge.s32.totalorder %v2264_v58, 0  ;;  %vm2815_vm14 = vcmp.lt.f32.partialorder %v1105_v37, 0.0004427343  ;;  %v2820_v61 = vmul.f32 %v2707_v0, %v1112_v14  ;;  %v1153_v63 = vadd.f32 1.0, %v2798_v47  ;;  %vm1329_vm1 = vmxor %vm1297_vm11, %vm1313_vm7 }
 0x2b0   : > { %v1232_v21 = vsel %vm3264_vm10, %v1216_v39, 0.0  ;;  %v906_v19 = vadd.f32 %v2253_v48, %v888_v9  ;;  %v1098_v58 = vsel %vm2748_vm3, %v2746_v18, %v1092_v51  ;;  %1759 = vlog2.f32 %v1117_v26  ;;  %vm1345_vm10 = vmxor %vm1329_vm1, %vm1886_vm0 }
 0x2b1   : > { %v2834_v37 = vsel %vm952_vm13, %v904_v45, %v968_v38  ;;  %v975_v0 = vsub.f32 0.0, %v2810_v7  ;;  %vm3190_vm7 = vcmp.ge.s32.totalorder %v2641_v62, 0  ;;  %v1397_v4 = vadd.f32 %v1396_v36, %v2729_v57  ;;  %vm1361_vm3 = vmand %vm1345_vm10, %vm3189_vm4  ;;  %v871_v57 = vpop.xlane.xlu0 %870 }
 0x2b2   : > { %v1037_v23 = vsub.f32 0.0, %v1021_v24  ;;  %vm1302_vm11 = vcmp.gt.f32.partialorder %v2705_v8, 0.0  ;;  %v1016_v18 = vand.u32 2147483647, %v2834_v37  ;;  %v1250_v5 = vsel %vm1248_vm6, %v1233_v28, 0.0 }
 0x2b3   : > { %v2846_v6 = vmul.f32 -0.5, %v2798_v47  ;;  %v2851_v39 = vsel %vm959_vm5, %v2810_v7, %v975_v0  ;;  %v970_v14 = vsub.f32 0.0, %v906_v19  ;;  %vm1317_vm13 = vcmp.eq.s32.totalorder %v2827_v12, 1  ;;  %v2862_v24 = vpop.eup %1751  ;;  %vm2868_vm5 = vmxor %vm1302_vm11, %vm1318_vm8 }
 0x2b4   : > { %v1249_v9 = vsel %vm1248_vm6, %v1232_v21, 0.0  ;;  %v3267_v51 = vmax.f32 %v2293_v53, 0.0  ;;  %v1032_v45 = vsub.f32 0.0, %v1016_v18  ;;  %v1377_v28 = vsel %vm1361_vm3, 1.0, %v1887_v17 }
 0x2b5   : > { %v1101_v36 = vmul.f32 0.6931472, %v1750_v2  ;;  %1761 = vlog2.f32 %v1153_v63  ;;  %v1023_v53 = vand.u32 2147483647, %v2851_v39  ;;  %vm1299_vm10 = vcmp.gt.f32.partialorder %v906_v19, 0.0  ;;  %v1754_v8 = vpop.eup %1753 }
 0x2b6   : > { %v1218_v26 = vadd.f32 %v1098_v58, %v3267_v51  ;;  %v1126_v21 = vadd.f32 1.0, %v2862_v24  ;;  %v1066_v58 = vmul.f32 1.442695, %v1037_v23  ;;  %v1399_v0 = vadd.f32 %v2636_v54, %v1397_v4  ;;  %vm1331_vm8 = vmxor %vm1299_vm10, %vm1315_vm9 }
 0x2b7   : > { %v2878_v63 = vsel %vm954_vm12, %v906_v19, %v970_v14  ;;  %vm1319_vm11 = vcmp.eq.s32.totalorder %v2855_v35, 1  ;;  %vm2883_vm3 = vcmp.lt.f32.partialorder %v1114_v42, 0.0004427343  ;;  %v1056_v18 = vmul.f32 1.442695, %v1032_v45  ;;  %vm1347_vm1 = vmxor %vm1331_vm8, %vm1886_vm0  ;;  %v1756_v19 = vpop.eup %1755 }
 0x2b8   : > { %v1400_v51 = vsel %vm1248_vm6, %v1377_v28, 0.0  ;;  %vm1304_vm4 = vcmp.gt.f32.partialorder %v2810_v7, 0.0  ;;  %v890_v54 = vmul.f32 %v2669_v29, %v871_v57  ;;  %vm958_vm12 = vcmp.eq.s32.totalorder %v2855_v35, 0 }
 0x2b9   : > { %v2892_v4 = vadd.f32 %v1250_v5, %v1249_v9  ;;  %v1234_v42 = vsel %vm930_vm2, %v1218_v26, 0.0  ;;  %1763 = vlog2.f32 %v1126_v21  ;;  %v1039_v23 = vsub.f32 0.0, %v1023_v53  ;;  %vm2910_vm2 = vmxor %vm2868_vm5, %vm1886_vm0  ;;  %v875_v9 = vpop.xlane.xlu0 %874  ;;  %v2925_v15 = vpop.eup %1757 }
 0x2ba   : > { %vm3272_vm9 = vcmp.ge.s32.totalorder %v2756_v52, 0  ;;  %vm942_vm8 = vcmp.ge.s32.totalorder %v2855_v35, 0  ;;  %v1107_v29 = vsel %vm2815_vm14, %v2761_v32, %v1101_v36  ;;  %v1120_v5 = vmul.f32 -0.5, %v2777_v31 }
 0x2bb   : > { %vm2898_vm10 = vmand %vm1347_vm1, %vm3272_vm9  ;;  %1765 = vpow2.f32 %v1056_v18  ;;  %v1018_v57 = vand.u32 2147483647, %v2878_v63  ;;  %v1123_v26 = vand.u32 2147483647, %v2777_v31  ;;  %v1401_v45 = vadd.f32 %v1400_v51, %v1399_v0 }
 0x2bc   : > { %1767 = vpow2.f32 %v1066_v58  ;;  %v1070_v28 = vmul.f32 1.442695, %v1039_v23  ;;  %vm2921_vm1 = vmxor %vm1304_vm4, %vm1320_vm15  ;;  %v2928_v36 = vsel %vm1248_vm6, %v1234_v42, 0.0  ;;  %v1379_v53 = vsel %vm2898_vm10, 1.0, %v1887_v17 }
 0x2bd   : > { %v1034_v38 = vsub.f32 0.0, %v1018_v57  ;;  %v908_v21 = vadd.f32 %v2253_v48, %v890_v54  ;;  %v3279_v58 = vmax.f32 %v2322_v33, 0.0  ;;  %v2936_v7 = vmul.f32 0.6931472, %v1754_v8  ;;  %vm2943_vm15 = vmand %vm2910_vm2, %vm3190_vm7 }
 0x2be   : > { %v1110_v18 = vmul.f32 0.6931472, %v1756_v19  ;;  %v892_v51 = vmul.f32 %v2620_v56, %v875_v9  ;;  %v1129_v23 = vmul.f32 -0.5, %v2862_v24  ;;  %vm2951_vm5 = vmxor %vm2921_vm1, %vm1886_vm0  ;;  %v1760_v56 = vpop.eup %1759  ;;  %1769 = vpow2.f32 %v1070_v28 }
 0x2bf   : > { %v1219_v0 = vadd.f32 %v1107_v29, %v3279_v58  ;;  %v1060_v14 = vmul.f32 1.442695, %v1034_v38  ;;  %v972_v54 = vsub.f32 0.0, %v908_v21  ;;  %vm1301_vm4 = vcmp.gt.f32.partialorder %v908_v21, 0.0 }
 0x2c0   : > { %v1404_v8 = vsel %vm1248_vm6, %v1379_v53, 0.0  ;;  %vm1333_vm9 = vmxor %vm1301_vm4, %vm1317_vm13  ;;  %v910_v19 = vadd.f32 %v2253_v48, %v892_v51  ;;  %v1403_v29 = vadd.f32 %v2682_v22, %v1401_v45  ;;  %v1121_v46 = vadd.f32 1.0, %v1120_v5 }
 0x2c1   : > { %vm2960_vm10 = vcmp.lt.f32.partialorder %v1123_v26, 0.0004427343  ;;  %1771 = vpow2.f32 %v1060_v14  ;;  %vm3286_vm2 = vcmp.eq.s32.totalorder %v2827_v12, 0  ;;  %vm1349_vm1 = vmxor %vm1333_vm9, %vm1886_vm0  ;;  %v1116_v28 = vsel %vm2883_vm3, %v2820_v61, %v1110_v18 }
 0x2c2   : > { %v2966_v9 = vsel %vm3286_vm2, %v908_v21, %v972_v54  ;;  %vm3287_vm13 = vcmp.ge.s32.totalorder %v2827_v12, 0  ;;  %v974_v22 = vsub.f32 0.0, %v910_v19  ;;  %vm1303_vm7 = vcmp.gt.f32.partialorder %v910_v19, 0.0  ;;  %v1762_v38 = vpop.eup %1761 }
 0x2c3   : > { %v1020_v48 = vand.u32 2147483647, %v2966_v9  ;;  %vm1365_vm4 = vmand %vm1349_vm1, %vm3287_vm13  ;;  %v1119_v5 = vmul.f32 0.6931472, %v1760_v56  ;;  %v1130_v26 = vadd.f32 1.0, %v1129_v23  ;;  %v1405_v32 = vadd.f32 %v1404_v8, %v1403_v29 }
 0x2c4   : > { %vm1335_vm14 = vmxor %vm1303_vm7, %vm1319_vm11  ;;  %v1381_v45 = vsel %vm1365_vm4, 1.0, %v1887_v17  ;;  %v2980_v61 = vsel %vm958_vm12, %v910_v19, %v974_v22  ;;  %v1406_v2 = vsel %vm1248_vm6, %v2767_v10, 0.0  ;;  %v1122_v58 = vmul.f32 %v2777_v31, %v1121_v46 }
 0x2c5   : > { %v1036_v53 = vsub.f32 0.0, %v1020_v48  ;;  %vm1351_vm3 = vmxor %vm1335_vm14, %vm1886_vm0  ;;  %v1408_v21 = vsel %vm1248_vm6, %v1381_v45, 0.0  ;;  %v1171_v18 = vadd.f32 1.0, %v2925_v15  ;;  %v1022_v51 = vand.u32 2147483647, %v2980_v61 }
 0x2c6   : > { %vm1367_vm7 = vmand %vm1351_vm3, %vm942_vm8  ;;  %v1407_v23 = vadd.f32 %v1406_v2, %v1405_v32  ;;  %v1132_v14 = vand.u32 2147483647, %v2862_v24  ;;  %v1382_v56 = vsel %vm2943_vm15, 1.0, %v1887_v17  ;;  %v1764_v8 = vpop.eup %1763  ;;  %vm3288_vm0 = vcmp.ge.s32.totalorder %v2296_v11, 0 }
 0x2c7   : > { %v1064_v54 = vmul.f32 1.442695, %v1036_v53  ;;  %v1383_v10 = vsel %vm1367_vm7, 1.0, %v1887_v17  ;;  %v1235_v31 = vsel %vm3288_vm0, %v1219_v0, 0.0  ;;  %v3289_v19 = vmax.f32 %v2384_v16, 0.0 }
 0x2c8   : > { %v1038_v46 = vsub.f32 0.0, %v1022_v51  ;;  %vm3290_vm11 = vcmp.ge.s32.totalorder %v2725_v20, 0  ;;  %v1409_v48 = vadd.f32 %v1408_v21, %v1407_v23  ;;  %v3004_v22 = vpop.eup %1765  ;;  %v1125_v42 = vsel %vm2960_vm10, %v1122_v58, %v1119_v5 }
 0x2c9   : > { %v1220_v29 = vadd.f32 %v1116_v28, %v3289_v19  ;;  %vm1368_vm12 = vmand %vm2951_vm5, %vm3290_vm11  ;;  %v1128_v45 = vmul.f32 0.6931472, %v1764_v8  ;;  %v1131_v32 = vmul.f32 %v2862_v24, %v1130_v26  ;;  %1773 = vpow2.f32 %v1064_v54  ;;  %v3009_v11 = vpop.eup %1767 }
 0x2ca   : > { %v1144_v16 = vadd.f32 1.0, %v3004_v22  ;;  %v1068_v0 = vmul.f32 1.442695, %v1038_v46  ;;  %v1410_v28 = vsel %vm1248_vm6, %v1382_v56, 0.0  ;;  %v1412_v33 = vsel %vm1248_vm6, %v1383_v10, 0.0 }
 0x2cb   : > { %1775 = vlog2.f32 %v1171_v18  ;;  %vm3014_vm14 = vcmp.lt.f32.partialorder %v1132_v14, 0.0004427343  ;;  %v1384_v57 = vsel %vm1368_vm12, 1.0, %v1887_v17  ;;  %v1411_v5 = vadd.f32 %v1410_v28, %v1409_v48  ;;  %v3027_v23 = vpop.eup %1769 }
 0x2cc   : > { %v1254_v24 = vsel %vm1248_vm6, %v1235_v31, 0.0  ;;  %vm3293_vm15 = vcmp.ge.s32.totalorder %v2314_v30, 0  ;;  %v1134_v2 = vsel %vm3014_vm14, %v1131_v32, %v1128_v45  ;;  %1777 = vlog2.f32 %v1144_v16 }
 0x2cd   : > { %v1236_v26 = vsel %vm3293_vm15, %v1220_v29, 0.0  ;;  %v3294_v21 = vmax.f32 %v2465_v13, 0.0  ;;  %1779 = vpow2.f32 %v1068_v0  ;;  %v1413_v18 = vadd.f32 %v1412_v33, %v1411_v5 }
 0x2ce   : > { %v1189_v51 = vadd.f32 1.0, %v3009_v11  ;;  %v1253_v17 = vadd.f32 %v2928_v36, %v2892_v4  ;;  %v1140_v30 = vmul.f32 %v2692_v49, %v2783_v25  ;;  %v3295_v14 = vand.u32 2147483647, %v2692_v49  ;;  %v3040_v56 = vpop.eup %1771 }
 0x2cf   : > { %v1221_v58 = vadd.f32 %v1125_v42, %v3294_v21  ;;  %v1414_v13 = vsel %vm1248_vm6, %v1384_v57, 0.0  ;;  %v1157_v10 = vadd.f32 1.0, %v2846_v6  ;;  %v1159_v8 = vand.u32 2147483647, %v2798_v47 }
 0x2d0   : > { %vm3035_vm5 = vcmp.lt.f32.partialorder %v3295_v14, 0.0004427343  ;;  %v1222_v4 = vadd.f32 %v1134_v2, %v998_v3  ;;  %v1415_v36 = vadd.f32 %v1414_v13, %v1413_v18  ;;  %v1255_v31 = vadd.f32 %v1254_v24, %v1253_v17 }
 0x2d1   : > { %v1143_v49 = vsel %vm3035_vm5, %v1140_v30, %v2936_v7  ;;  %v1256_v25 = vsel %vm1248_vm6, %v1236_v26, 0.0  ;;  %v1162_v19 = vadd.f32 1.0, %v3040_v56  ;;  %v1155_v29 = vmul.f32 0.6931472, %v1762_v38 }
 0x2d2   : > { %vm3298_vm9 = vcmp.ge.s32.totalorder %v2390_v59, 0  ;;  %1416 = vadd.xlane.f32.xlu1 %v1415_v36  ;;  %1781 = vlog2.f32 %v1189_v51  ;;  %v1207_v6 = vadd.f32 1.0, %v3027_v23  ;;  %v1147_v55 = vmul.f32 -0.5, %v3004_v22 }
 0x2d3   : > { %v1237_v46 = vsel %vm3298_vm9, %v1221_v58, 0.0  ;;  %1783 = vlog2.f32 %v1162_v19  ;;  %v3299_v3 = vmax.f32 %v2368_v41, 0.0  ;;  %v1257_v42 = vadd.f32 %v1256_v25, %v1255_v31 }
 0x2d4   : > { %v1158_v7 = vmul.f32 %v2798_v47, %v1157_v10  ;;  %vm3300_vm10 = vcmp.ge.s32.totalorder %v2530_v34, 0  ;;  %vm1160_vm2 = vcmp.lt.f32.partialorder %v1159_v8, 0.0004427343  ;;  %v1258_v59 = vsel %vm1248_vm6, %v1237_v46, 0.0 }
 0x2d5   : > { %v1223_v48 = vadd.f32 %v1143_v49, %v3299_v3  ;;  %v1238_v45 = vsel %vm3300_vm10, %v1222_v4, 0.0  ;;  %v1174_v38 = vmul.f32 -0.5, %v2925_v15  ;;  %1785 = vlog2.f32 %v1207_v6 }
 0x2d6   : > { %v1161_v32 = vsel %vm1160_vm2, %v1158_v7, %v1155_v29  ;;  %v3062_v16 = vpop.eup %1773  ;;  %v1001_v0 = vmax.f32 %v2500_v43, 0.0  ;;  %v1260_v41 = vsel %vm1248_vm6, %v1238_v45, 0.0  ;;  %v1148_v28 = vadd.f32 1.0, %v1147_v55 }
 0x2d7   : > { %vm3301_vm1 = vcmp.ge.s32.totalorder %v2311_v27, 0  ;;  %v1259_v33 = vadd.f32 %v1258_v59, %v1257_v42  ;;  %v1150_v34 = vand.u32 2147483647, %v3004_v22  ;;  %v1180_v53 = vadd.f32 1.0, %v3062_v16 }
 0x2d8   : > { %v1239_v47 = vsel %vm3301_vm1, %v1223_v48, 0.0  ;;  %v1776_v57 = vpop.eup %1775  ;;  %v1225_v5 = vadd.f32 %v1161_v32, %v1001_v0  ;;  %v1175_v24 = vadd.f32 1.0, %v1174_v38  ;;  %v1165_v26 = vmul.f32 -0.5, %v3040_v56 }
 0x2d9   : > { %v1778_v2 = vpop.eup %1777  ;;  %v1177_v21 = vand.u32 2147483647, %v2925_v15  ;;  %v1261_v43 = vadd.f32 %v1260_v41, %v1259_v33  ;;  %1787 = vlog2.f32 %v1180_v53  ;;  %v1262_v27 = vsel %vm1248_vm6, %v1239_v47, 0.0 }
 0x2da   : > { %v3072_v58 = vpop.eup %1779  ;;  %v1146_v18 = vmul.f32 0.6931472, %v1778_v2  ;;  %v1149_v51 = vmul.f32 %v3004_v22, %v1148_v28  ;;  %v1192_v17 = vmul.f32 -0.5, %v3009_v11  ;;  %v1173_v30 = vmul.f32 0.6931472, %v1776_v57 }
 0x2db   : > { %v1000_v14 = vmax.f32 %v2834_v37, 0.0  ;;  %vm1151_vm13 = vcmp.lt.f32.partialorder %v1150_v34, 0.0004427343  ;;  %v1198_v54 = vadd.f32 1.0, %v3072_v58  ;;  %vm3302_vm4 = vcmp.ge.s32.totalorder %v2387_v1, 0 }
 0x2dc   : > { %v1241_v13 = vsel %vm3302_vm4, %v1225_v5, 0.0  ;;  %v1176_v10 = vmul.f32 %v2925_v15, %v1175_v24  ;;  %v1152_v8 = vsel %vm1151_vm13, %v1149_v51, %v1146_v18  ;;  %v1166_v4 = vadd.f32 1.0, %v1165_v26 }
 0x2dd   : > { %v1263_v36 = vadd.f32 %v1262_v27, %v1261_v43  ;;  %v1224_v31 = vadd.f32 %v1152_v8, %v1000_v14  ;;  %v1168_v49 = vand.u32 2147483647, %v3040_v56  ;;  %1789 = vlog2.f32 %v1198_v54 }
 0x2de   : > { %v1003_v25 = vmax.f32 %v2657_v44, 0.0  ;;  %vm3084_vm3 = vcmp.lt.f32.partialorder %v1177_v21, 0.0004427343  ;;  %v1193_v19 = vadd.f32 1.0, %v1192_v17  ;;  %v1210_v1 = vmul.f32 -0.5, %v3027_v23 }
 0x2df   : > { %v1782_v22 = vpop.eup %1781  ;;  %v1266_v15 = vsel %vm1248_vm6, %v1241_v13, 0.0  ;;  %v1179_v46 = vsel %vm3084_vm3, %v1176_v10, %v1173_v30  ;;  %vm3305_vm7 = vcmp.ge.s32.totalorder %v2675_v60, 0  ;;  %v1183_v55 = vmul.f32 -0.5, %v3062_v16 }
 0x2e0   : > { %v1784_v29 = vpop.eup %1783  ;;  %v1240_v6 = vsel %vm3305_vm7, %v1224_v31, 0.0  ;;  %v1167_v48 = vmul.f32 %v3040_v56, %v1166_v4  ;;  %v1195_v42 = vand.u32 2147483647, %v3009_v11  ;;  %v1002_v45 = vmax.f32 %v2878_v63, 0.0 }
 0x2e1   : > { %v1264_v44 = vsel %vm1248_vm6, %v1240_v6, 0.0  ;;  %v1164_v3 = vmul.f32 0.6931472, %v1784_v29  ;;  %vm1169_vm0 = vcmp.lt.f32.partialorder %v1168_v49, 0.0004427343  ;;  %v1227_v32 = vadd.f32 %v1179_v46, %v1003_v25 }
 0x2e2   : > { %v1265_v7 = vadd.f32 %v1264_v44, %v1263_v36  ;;  %v1191_v59 = vmul.f32 0.6931472, %v1782_v22  ;;  %v1786_v38 = vpop.eup %1785  ;;  %v1194_v60 = vmul.f32 %v3009_v11, %v1193_v19  ;;  %v1211_v41 = vadd.f32 1.0, %v1210_v1 }
 0x2e3   : > { %v1170_v0 = vsel %vm1169_vm0, %v1167_v48, %v1164_v3  ;;  %v1184_v47 = vadd.f32 1.0, %v1183_v55  ;;  %v1201_v33 = vmul.f32 -0.5, %v3072_v58  ;;  %v1186_v56 = vand.u32 2147483647, %v3062_v16 }
 0x2e4   : > { %v1226_v28 = vadd.f32 %v1170_v0, %v1002_v45  ;;  %v1267_v34 = vadd.f32 %v1266_v15, %v1265_v7  ;;  %vm3102_vm11 = vcmp.lt.f32.partialorder %v1195_v42, 0.0004427343  ;;  %v1213_v63 = vand.u32 2147483647, %v3027_v23 }
 0x2e5   : > { %v1005_v57 = vmax.f32 %v2788_v40, 0.0  ;;  %vm3308_vm12 = vcmp.ge.s32.totalorder %v2756_v52, 0  ;;  %v1197_v11 = vsel %vm3102_vm11, %v1194_v60, %v1191_v59  ;;  %v1209_v24 = vmul.f32 0.6931472, %v1786_v38 }
 0x2e6   : > { %v1242_v5 = vsel %vm3308_vm12, %v1226_v28, 0.0  ;;  %v1788_v26 = vpop.eup %1787  ;;  %v1004_v2 = vmax.f32 %v2966_v9, 0.0  ;;  %v1212_v21 = vmul.f32 %v3027_v23, %v1211_v41  ;;  %vm3309_vm14 = vcmp.ge.s32.totalorder %v2505_v50, 0 }
 0x2e7   : > { %v1243_v43 = vsel %vm3309_vm14, %v1227_v32, 0.0  ;;  %v1268_v27 = vsel %vm1248_vm6, %v1242_v5, 0.0  ;;  %v1182_v18 = vmul.f32 0.6931472, %v1788_v26  ;;  %v1185_v40 = vmul.f32 %v3062_v16, %v1184_v47 }
 0x2e8   : > { %v1202_v51 = vadd.f32 1.0, %v1201_v33  ;;  %v1269_v52 = vadd.f32 %v1268_v27, %v1267_v34  ;;  %vm1187_vm15 = vcmp.lt.f32.partialorder %v1186_v56, 0.0004427343  ;;  %v1204_v17 = vand.u32 2147483647, %v3072_v58 }
 0x2e9   : > { %vm1214_vm5 = vcmp.lt.f32.partialorder %v1213_v63, 0.0004427343  ;;  %v1229_v30 = vadd.f32 %v1197_v11, %v1005_v57  ;;  %v1188_v14 = vsel %vm1187_vm15, %v1185_v40, %v1182_v18  ;;  %v1270_v9 = vsel %vm1248_vm6, %v1243_v43, 0.0 }
 0x2ea   : > { %v1215_v54 = vsel %vm1214_vm5, %v1212_v21, %v1209_v24  ;;  %v1790_v23 = vpop.eup %1789  ;;  %v1228_v13 = vadd.f32 %v1188_v14, %v1004_v2  ;;  %v1007_v50 = vmax.f32 %v2851_v39, 0.0  ;;  %v1271_v10 = vadd.f32 %v1270_v9, %v1269_v52 }
 0x2eb   : > { %v1006_v8 = vmax.f32 %v2980_v61, 0.0  ;;  %v1200_v4 = vmul.f32 0.6931472, %v1790_v23  ;;  %v1203_v16 = vmul.f32 %v3072_v58, %v1202_v51  ;;  %vm1205_vm9 = vcmp.lt.f32.partialorder %v1204_v17, 0.0004427343 }
 0x2ec   : > { %v1231_v36 = vadd.f32 %v1215_v54, %v1007_v50  ;;  %vm3310_vm10 = vcmp.ge.s32.totalorder %v2827_v12, 0  ;;  %vm3311_vm2 = vcmp.ge.s32.totalorder %v2641_v62, 0  ;;  %vm3312_vm1 = vcmp.ge.s32.totalorder %v2725_v20, 0 }
 0x2ed   : > { %v1244_v31 = vsel %vm3310_vm10, %v1228_v13, 0.0  ;;  %v1245_v49 = vsel %vm3311_vm2, %v1229_v30, 0.0  ;;  %v1206_v22 = vsel %vm1205_vm9, %v1203_v16, %v1200_v4  ;;  %v1425_v0 = vlaneseq }
 0x2ee   : > { %v1272_v25 = vsel %vm1248_vm6, %v1244_v31, 0.0  ;;  %v1230_v37 = vadd.f32 %v1206_v22, %v1006_v8  ;;  %v1274_v39 = vsel %vm1248_vm6, %v1245_v49, 0.0  ;;  %v1247_v58 = vsel %vm3312_vm1, %v1231_v36, 0.0 }
 0x2ef   : > { %v1273_v19 = vadd.f32 %v1272_v25, %v1271_v10  ;;  %v1278_v62 = vsel %vm1248_vm6, %v1247_v58, 0.0  ;;  %v1426_v60 = vand.u32 127, %v1425_v0 }
 0x2f0   : > { %v1246_v61 = vsel %vm942_vm8, %v1230_v37, 0.0 }
 0x2f1   : > { %v1275_v1 = vadd.f32 %v1274_v39, %v1273_v19  ;;  %v1276_v12 = vsel %vm1248_vm6, %v1246_v61, 0.0  ;;  %vm1428_vm6 = vcmp.eq.s32.totalorder %v1426_v60, 1  ;;  %vm1427_vm8 = vcmp.eq.s32.totalorder %v1426_v60, 0 }
 0x2f3   : > { %v1277_v29 = vadd.f32 %v1276_v12, %v1275_v1 }
 0x2f5   : > { %v1279_v15 = vadd.f32 %v1278_v62, %v1277_v29 }
 0x2f7   : > { %1280 = vadd.xlane.f32.xlu0 %v1279_v15 }
 0x35b   : > { %v1417_v46 = vpop.xlane.xlu1 %1416 }
 0x35c   : > { %v1418_v6 = vrot.slane %v1417_v46, 4 }
 0x35e   : > { %v1419_v55 = vadd.f32 %v1418_v6, %v1417_v46 }
 0x360   : > { %v1420_v44 = vrot.slane %v1419_v55, 2 }
 0x362   : > { %v1421_v42 = vadd.f32 %v1420_v44, %v1419_v55 }
 0x364   : > { %v1422_v45 = vrot.slane %v1421_v42, 1 }
 0x366   : > { %v1423_v32 = vadd.f32 %v1422_v45, %v1421_v42 }
 0x380   : > { %v1281_v3 = vpop.xlane.xlu0 %1280 }
 0x381   : > { %v1282_v48 = vrot.slane %v1281_v3, 4 }
 0x383   : > { %v1283_v35 = vadd.f32 %v1282_v48, %v1281_v3 }
 0x385   : > { %v1284_v7 = vrot.slane %v1283_v35, 2 }
 0x387   : > { %v1285_v20 = vadd.f32 %v1284_v7, %v1283_v35 }
 0x389   : > { %v1286_v59 = vrot.slane %v1285_v20, 1 }
 0x38b   : > { %v1287_v38 = vadd.f32 %v1286_v59, %v1285_v20 }
 0x38d   : > { %1613 = vpush %v1287_v38 }
 0x38e   : > { %1615 = vpush %v1423_v32 }
 0x3be   : > { %s1614_s19 = spop %1613 }
 0x3bf   : > { %v1431_v41 = vstv %s1614_s19  ;;  %s1616_s22 = spop %1615 }
 0x3c0   : > { %v1429_v28 = vstv %s1616_s22 }
 0x3c1   : > { %v1430_v47 = vsel %vm1428_vm6, %v1429_v28, 0.0 }
 0x3c2   : > { %v1432_v33 = vsel %vm1427_vm8, %v1431_v41, %v1430_v47 }
 0x3c3   : > { %1433 = vst [vmem:[%s288_s20] sm:$0x1] %v1432_v33 }
 0x3c4   : > { %1830 = shalt.err (!%p1827_p1)
}
 0x3c5   : > { %s1831_s18 = scalar_lea.hbm %s3140_s29, 16  ;;  %s1835_s16 = scalar_lea.hbm %s3181_s6, 32 }
 0x3c6   : > { %p1832_p2 = scmp.ne.s32.totalorder %s3140_s29, %s1831_s18  ;;  %p1836_p7 = scmp.lt.s32.totalorder %s3140_s29, %s3181_s6 }
 0x3c7   : > { %p1837_p6 = scmp.lt.s32.totalorder %s1835_s16, %s1831_s18 }
 0x3c8   : > { %p1833_p3 = pnand %p1832_p2, %p1965_p5 }
 0x3c9   : > { %p1838_p8 = por %p1837_p6, %p1836_p7 }
 0x3ca   : > { %p1834_p4 = pneg %p1833_p3 }
 0x3cc   : > { %p1839_p9 = pnand %p1838_p8, %p1834_p4 }
 0x3ce   : > { %1842 = shalt.err (!%p1839_p9)
}
 0x3cf   : > { %1621 = dma.vmem_to_hbm [thread:$0]  (%p1965_p5), %s1448_s21, 16, %s3140_s29, %s1435_s30  }
 0x3d0 PF: > { %p1633_p10 = scmp.ge.s32.totalorder %s1881_s26, 2  ;;  %s1459_s20 = sand.u32 1, %s1869_s23  }
 0x3d1   : > { %p3313_p11 = scmp.ne.s32.totalorder %s3192_s9, 0  ;;  %s1460_s22 = scalar_lea.sflag [#allocation5], %s1459_s20 }
 0x3d3   : > { %p1628_p12 = pnand %p1633_p10, %p3313_p11 }
 0x3d5   : > { %p1629_p13 = pneg %p1628_p12 }
 0x3d7   : > { %1864 = dma.done.wait (%p1629_p13), %s1460_s22, 16  }
 0x3d8   : > { %1866 = vsyncadd (%p1629_p13), %s1460_s22, 4294967280  ;;  %p18_p0 = scmp.ge.s32.totalorder %s1952_s28, 4   ;;  %s3314_s23 = smov %s1873_s24 }
 0x3d9   : > { %s3315_s24 = smov %s1877_s25  ;;  %s3316_s25 = smov %s1963_s7 }
 0x3da   : > { %s3317_s26 = smov %s1952_s28  ;;  %20 = sbr.rel (!%p18_p0) target bundleno = 6 (0x6), region = 87 }
 0x3df   :  { %1464 = vsyncpa [#allocation4], 1 }
 0x3e0   :  { %1466 = vsyncpa [#allocation4 + $0x1], 1 }
 0x3e1   :  { %1467 = vsyncpa [#allocation5], 1 }
 0x3e2   :  { %1469 = vsyncpa [#allocation5 + $0x1], 1 }

// kernel: tpu_custom_call.1
= control target key start
LH: loop header
LB: loop body
LE: loop exit
PB: predicated region body
PF: predicated region fallthrough
CT: control target
= control target key end

     0   :  { %s3175_s0 = inlined_call_operand.<no memory space> [shape: f32[1], index: 0, kind: input, shape index: {}]   ;;  %s3176_s1 = inlined_call_operand.vmem [shape: f32[240,128], index: 1, kind: input, shape index: {}]   ;;  %s3177_s2 = inlined_call_operand.vmem [shape: s32[256,1], index: 2, kind: input, shape index: {}]   ;;  %s3178_s3 = inlined_call_operand.hbm [shape: bf16[128,128], index: 3, kind: input, shape index: {}]   ;;  %s3179_s4 = inlined_call_operand.vmem [shape: f32[1,128], index: 4, kind: input, shape index: {}]   ;;  %s3180_s5 = inlined_call_operand.vmem [shape: f32[1,128], index: 5, kind: input, shape index: {}]   ;;  %s3181_s6 = inlined_call_operand.hbm [shape: f32[2,1,128], index: 6, kind: output, shape index: {}]  }
   0x1   :  { %11 = sst [smem:[#allocation2]] %s3175_s0 }
   0x2   :  { %12 = vsyncpa [#allocation4], 0 }
   0x3   :  { %13 = vsyncpa [#allocation5], 0 }
   0x4   :  { %15 = vsyncpa [#allocation5 + $0x1], 0  ;;  %s1927_s23 = smov 0   ;;  %s1929_s24 = smov 0  }
   0x5   :  { %s1931_s25 = smov 0   ;;  %s1933_s26 = smov 0  }
   0x6 LB: > { %s1948_s0 = sadd.s32 4294967295, %s1881_s26   ;;  %s1526_s27 = sadd.s32 4294967294, %s1881_s26   ;;  %s1881_s26 = sphi %s1933_s26, %s3317_s26   ;;  %s1877_s25 = sphi %s1931_s25, %s3316_s25   ;;  %s1873_s24 = sphi %s1929_s24, %s3315_s24   ;;  %s1869_s23 = sphi %s1927_s23, %s3314_s23  }
   0x7   : > { %s1952_s28 = sadd.s32 1, %s1881_s26   ;;  %s164_s29 = sadd.s32 1, %s1877_s25 }
   0x8   : > { %s161_s30 = ssub.s32 %s1881_s26, %s1952_s28  ;;  %p174_p0 = scmp.ne.s32.totalorder %s1877_s25, %s1873_s24 }
   0x9   : > { %p162_p1 = scmp.eq.s32.totalorder %s161_s30, 0  ;;  %p175_p2 = scmp.eq.s32.totalorder %s1948_s0, 1 }
   0xa   : > { %p180_p3 = scmp.ne.s32.totalorder %s1873_s24, %s1869_s23  ;;  %p181_p4 = scmp.eq.s32.totalorder %s1526_s27, 1 }
   0xb   : > { %s1963_s7 = scalar_select %p162_p1, %s1877_s25, %s164_s29  }
   0xc   : > { %p1965_p5 = por %p175_p2, %p174_p0  ;;  %p1969_p6 = por %p181_p4, %p180_p3 }
   0xd   : > { %p1527_p7 = scmp.ge.s32.totalorder %s1881_s26, 1  ;;  %p188_p8 = scmp.lt.s32.totalorder %s1881_s26, 3 }
   0xe   : > { %s3192_s9 = scalar_select %p1969_p6, 1, 0 }
   0xf   : > { %p1631_p9 = scmp.eq.s32.totalorder %s1948_s0, 0  ;;  %p1976_p10 = pnand %p1527_p7, %p188_p8 }
  0x10   : > { %s1883_s11 = smov [#allocation3]  }
  0x11   : > { %s203_s12 = sshll.u32 %s1883_s11, 4  ;;  %p1623_p11 = pneg %p1976_p10  ;;  %s204_s12 = int_to_ptr.vmem [resolvable:$true] %s203_s12 }
  0x12   : > { %s1802_s13 = scalar_lea.vmem %s204_s12, 1024  ;;  %p1810_p3 = scmp.lt.s32.totalorder %s204_s12, %s204_s12 }
  0x13   : > { %p1624_p12 = pnand %p1631_p9, %p1623_p11  ;;  %p1803_p0 = scmp.ne.s32.totalorder %s204_s12, %s1802_s13 }
  0x14   : > { %p1811_p4 = scmp.lt.s32.totalorder %s1802_s13, %s1802_s13 }
  0x15   : > { %p1793_p13 = pneg %p1624_p12 }
  0x16   : > { %p1812_p6 = por %p1811_p4, %p1810_p3 }
  0x17   : > { %p1805_p1 = pnand %p1803_p0, %p1793_p13 }
  0x19   : > { %p1806_p2 = pneg %p1805_p1 }
  0x1b   : > { %p1813_p7 = pnand %p1812_p6, %p1806_p2 }
  0x1d   : > { %1816 = shalt.err (!%p1813_p7)
}
  0x1e   : > { %s1884_s14 = smov 64   ;;  %s1885_s15 = smov 4  }
  0x1f   : > { %1626 = dma.hbm_to_vmem [thread:$0]  (!%p1624_p12), %s3178_s3, 1024, %s204_s12, [#allocation4], %s1884_s14, %s1884_s14, %s1885_s15  }
  0x20   : > { %251 = sbr.rel (%p1976_p10) target bundleno = 976 (0x3d0), region = 44 }
  0x25   : > { %1860 = dma.done.wait (%p1631_p9), [#allocation4], 1024  }
  0x26   : > { %1862 = vsyncadd (%p1631_p9), [#allocation4], 4294966272  ;;  %s1994_s18 = sshll.u32 %s1948_s0, 4  ;;  %v1671_v0 = vld [vmem:[#allocation3 + $0x38] sm:$0xff]   ;;  %v1672_v1 = vld [vmem:[#allocation3 + $0x30] sm:$0xff]   ;;  %s894_s12 = sld [smem:[#allocation2]] }
  0x27   : > { %p294_p6 = scmp.lt.s32.totalorder %s1994_s18, 29  ;;  %1565 = vmatprep.subr.bf16.mxu0 %v1671_v0  ;;  %1597 = vmatprep.subr.bf16.mxu1 %v1671_v0  ;;  %v1673_v2 = vld [vmem:[#allocation3 + $0x28] sm:$0xff]   ;;  %v1674_v3 = vld [vmem:[#allocation3 + $0x20] sm:$0xff]   ;;  %v1675_v10 = vld [vmem:[#allocation3 + $0x18] sm:$0xff]   ;;  %p304_p8 = scmp.lt.s32.totalorder %s1994_s18, 31 }
  0x28   : > { %1566 = vmatpush3.bf16.msra.mxu0 %v1671_v0  ;;  %1605 = vmatpush3.bf16.msra.mxu1 %v1671_v0  ;;  %v1676_v11 = vld [vmem:[#allocation3 + $0x10] sm:$0xff]   ;;  %v1677_v12 = vld [vmem:[#allocation3 + $0x8] sm:$0xff]   ;;  %v1678_v13 = vld [vmem:[#allocation3] sm:$0xff]   ;;  %s287_s17 = sand.u32 1, %s1873_s24   ;;  %s3140_s29 = scalar_lea.hbm %s3181_s6, %s1994_s18 }
  0x29   : > { %s295_s19 = scalar_select %p294_p6, %s1994_s18, 29  ;;  %1567 = vmatprep.subr.bf16.mxu0 %v1672_v1  ;;  %1598 = vmatprep.subr.bf16.mxu1 %v1672_v1  ;;  %v2022_v32 = vld [vmem:[%s3179_s4] ss:$0 sm:$0xff] }
  0x2a   : > { %s305_s11 = scalar_select %p304_p8, %s1994_s18, 31 }
  0x2b   : > { %s1533_s20 = sshll.u32 %s295_s19, 3  ;;  %s1435_s30 = scalar_lea.sflag [#allocation5], %s287_s17 }
  0x2c   : > { %s2001_s27 = scalar_lea.vmem %s3176_s1, %s1533_s20  ;;  %1568 = vmatpush3.bf16.msra.mxu0 %v1672_v1  ;;  %1606 = vmatpush3.bf16.msra.mxu1 %v1672_v1  ;;  %s1535_s13 = sshll.u32 %s305_s11, 3 }
  0x2d   : > { %1569 = vmatprep.subr.bf16.mxu0 %v1673_v2  ;;  %1599 = vmatprep.subr.bf16.mxu1 %v1673_v2  ;;  %v310_v4 = vld [vmem:[%s2001_s27] sm:$0xff]  ;;  %v311_v5 = vld [vmem:[%s2001_s27 + $0x8] sm:$0xff]  ;;  %v312_v14 = vld [vmem:[%s2001_s27 + $0x10] sm:$0xff]  ;;  %s2251_s16 = scalar_lea.vmem %s3177_s2, %s1535_s13  ;;  %s288_s20 = scalar_lea.vmem [#allocation6], %s287_s17 }
  0x2e   : > { %v318_v6 = vld [vmem:[%s2001_s27 + $0x40] sm:$0xff]  ;;  %v326_v7 = vpack.c.bf16 %v311_v5, %v310_v4  ;;  %v319_v8 = vld [vmem:[%s2001_s27 + $0x48] sm:$0xff]  ;;  %v313_v15 = vld [vmem:[%s2001_s27 + $0x18] sm:$0xff]  ;;  %s1447_s21 = sshll.u32 %s288_s20, 4  ;;  %s1888_s11 = smov [#allocation6]   ;;  %s1448_s21 = int_to_ptr.vmem [resolvable:$true] %s1447_s21 }
  0x2f   : > { %v330_v9 = vpack.c.bf16 %v319_v8, %v318_v6  ;;  %v320_v16 = vld [vmem:[%s2001_s27 + $0x50] sm:$0xff]  ;;  %v321_v17 = vld [vmem:[%s2001_s27 + $0x58] sm:$0xff]  ;;  %v314_v18 = vld [vmem:[%s2001_s27 + $0x20] sm:$0xff]  ;;  %v327_v22 = vpack.c.bf16 %v313_v15, %v312_v14  ;;  %s1817_s10 = scalar_lea.vmem %s1448_s21, 16 }
  0x30   : > { %1570 = vmatpush3.bf16.msra.mxu0 %v1673_v2  ;;  %1607 = vmatpush3.bf16.msra.mxu1 %v1673_v2  ;;  %v315_v19 = vld [vmem:[%s2001_s27 + $0x28] sm:$0xff]  ;;  %v322_v20 = vld [vmem:[%s2001_s27 + $0x60] sm:$0xff]  ;;  %v331_v23 = vpack.c.bf16 %v321_v17, %v320_v16  ;;  %v316_v26 = vld [vmem:[%s2001_s27 + $0x30] sm:$0xff]  ;;  %p1818_p9 = scmp.ne.s32.totalorder %s1448_s21, %s1817_s10 }
  0x31   : > { %1571 = vmatprep.subr.bf16.mxu0 %v1674_v3  ;;  %1600 = vmatprep.subr.bf16.mxu1 %v1674_v3  ;;  %v323_v21 = vld [vmem:[%s2001_s27 + $0x68] sm:$0xff]  ;;  %v328_v24 = vpack.c.bf16 %v315_v19, %v314_v18  ;;  %v317_v27 = vld [vmem:[%s2001_s27 + $0x38] sm:$0xff]  ;;  %v324_v28 = vld [vmem:[%s2001_s27 + $0x70] sm:$0xff] }
  0x32   : > { %1581 = vmatprep.mubr.bf16.mxu0 %v326_v7  ;;  %1589 = vmatprep.mubr.bf16.mxu1 %v330_v9  ;;  %v332_v25 = vpack.c.bf16 %v323_v21, %v322_v20  ;;  %v325_v29 = vld [vmem:[%s2001_s27 + $0x78] sm:$0xff]  ;;  %v329_v30 = vpack.c.bf16 %v317_v27, %v316_v26  ;;  %p1819_p10 = pnand %p1818_p9, %p1965_p5 }
  0x33   : > { %v333_v31 = vpack.c.bf16 %v325_v29, %v324_v28 }
  0x34   : > { %1572 = vmatpush3.bf16.msra.mxu0 %v1674_v3  ;;  %1608 = vmatpush3.bf16.msra.mxu1 %v1674_v3  ;;  %p1820_p11 = pneg %p1819_p10 }
  0x35   : > { %1573 = vmatprep.subr.bf16.mxu0 %v1675_v10  ;;  %1601 = vmatprep.subr.bf16.mxu1 %v1675_v10 }
  0x38   : > { %1574 = vmatpush3.bf16.msra.mxu0 %v1675_v10  ;;  %1609 = vmatpush3.bf16.msra.mxu1 %v1675_v10 }
  0x39   : > { %1575 = vmatprep.subr.bf16.mxu0 %v1676_v11  ;;  %1602 = vmatprep.subr.bf16.mxu1 %v1676_v11 }
  0x3c   : > { %1576 = vmatpush3.bf16.msra.mxu0 %v1676_v11  ;;  %1610 = vmatpush3.bf16.msra.mxu1 %v1676_v11 }
  0x3d   : > { %1577 = vmatprep.subr.bf16.mxu0 %v1677_v12  ;;  %1603 = vmatprep.subr.bf16.mxu1 %v1677_v12 }
  0x40   : > { %1578 = vmatpush3.bf16.msra.mxu0 %v1677_v12  ;;  %1611 = vmatpush3.bf16.msra.mxu1 %v1677_v12 }
  0x41   : > { %1579 = vmatprep.subr.bf16.mxu0 %v1678_v13  ;;  %1604 = vmatprep.subr.bf16.mxu1 %v1678_v13 }
  0x44   : > { %1580 = vmatpush3.bf16.msra.mxu0 %v1678_v13  ;;  %1612 = vmatpush3.bf16.msra.mxu1 %v1678_v13 }
  0x47   : > { %1582 = vmatmul.mubr.bf16.vlgmr.msra.gmra.mxu0 %v327_v22  ;;  %1590 = vmatmul.mubr.bf16.vlgmr.msra.gmra.mxu1 %v331_v23 }
  0x48   : > { %1585 = vmatprep.mubr.bf16.mxu0 %v328_v24  ;;  %1593 = vmatprep.mubr.bf16.mxu1 %v332_v25 }
  0x4f   : > { %1586 = vmatmul.mubr.bf16.gmra.mxu0 %v329_v30  ;;  %1594 = vmatmul.mubr.bf16.gmra.mxu1 %v333_v31 }
 0x107   : > { %v1583_v33 = vpop.f32.mrf.mxu0  ;;  %v1591_v34 = vpop.f32.mrf.mxu1 }
 0x108   : > { %v2025_v35 = vadd.f32 %v1583_v33, %v2022_v32  ;;  %v2047_v56 = vadd.f32 %v1591_v34, %v2022_v32 }
 0x109   : > { %v439_v36 = vpop.f32.mrf.mxu0  ;;  %v471_v37 = vpop.f32.mrf.mxu1 }
 0x10a   : > { %v520_v38 = vmul.f32 %v2025_v35, %v2025_v35  ;;  %v2030_v39 = vadd.f32 %v2022_v32, %v439_v36  ;;  %v2040_v48 = vadd.f32 %v2022_v32, %v471_v37  ;;  %v504_v55 = vmul.f32 0.7978846, %v2025_v35 }
 0x10b   : > { %v1584_v40 = vpop.f32.mrf.mxu0  ;;  %v1592_v41 = vpop.f32.mrf.mxu1  ;;  %v528_v5 = vmul.f32 %v2047_v56, %v2047_v56  ;;  %v512_v31 = vmul.f32 0.7978846, %v2047_v56 }
 0x10c   : > { %v536_v42 = vmul.f32 0.044715, %v520_v38  ;;  %v2033_v43 = vadd.f32 %v1584_v40, %v2022_v32  ;;  %v518_v44 = vmul.f32 %v2030_v39, %v2030_v39  ;;  %v526_v62 = vmul.f32 %v2040_v48, %v2040_v48 }
 0x10d   : > { %v442_v45 = vpop.f32.mrf.mxu0  ;;  %v474_v46 = vpop.f32.mrf.mxu1  ;;  %v502_v6 = vmul.f32 0.7978846, %v2030_v39  ;;  %v2064_v7 = vadd.f32 %v1592_v41, %v2022_v32  ;;  %v544_v19 = vmul.f32 0.044715, %v528_v5  ;;  %v510_v26 = vmul.f32 0.7978846, %v2040_v48 }
 0x10e   : > { %v521_v47 = vmul.f32 %v2033_v43, %v2033_v43  ;;  %v552_v50 = vadd.f32 1.0, %v536_v42  ;;  %v534_v51 = vmul.f32 0.044715, %v518_v44  ;;  %v2043_v53 = vadd.f32 %v2022_v32, %v442_v45 }
 0x10f   : > { %v1587_v49 = vpop.f32.mrf.mxu0  ;;  %v1595_v54 = vpop.f32.mrf.mxu1  ;;  %v505_v57 = vmul.f32 0.7978846, %v2033_v43  ;;  %v2053_v60 = vadd.f32 %v2022_v32, %v474_v46  ;;  %v542_v15 = vmul.f32 0.044715, %v526_v62  ;;  %v529_v20 = vmul.f32 %v2064_v7, %v2064_v7 }
 0x110   : > { %v537_v52 = vmul.f32 0.044715, %v521_v47  ;;  %v519_v59 = vmul.f32 %v2043_v53, %v2043_v53  ;;  %v2056_v61 = vadd.f32 %v1587_v49, %v2022_v32  ;;  %v568_v63 = vmul.f32 %v552_v50, %v504_v55 }
 0x111   : > { %v550_v0 = vadd.f32 1.0, %v534_v51  ;;  %v455_v3 = vpop.f32.mrf.mxu0  ;;  %v487_v4 = vpop.f32.mrf.mxu1  ;;  %v503_v8 = vmul.f32 0.7978846, %v2043_v53  ;;  %v527_v11 = vmul.f32 %v2053_v60, %v2053_v60  ;;  %v558_v27 = vadd.f32 1.0, %v542_v15 }
 0x112   : > { %v553_v58 = vadd.f32 1.0, %v537_v52  ;;  %v535_v2 = vmul.f32 0.044715, %v519_v59  ;;  %v524_v12 = vmul.f32 %v2056_v61, %v2056_v61  ;;  %v2072_v13 = vadd.f32 %v2022_v32, %v455_v3 }
 0x113   : > { %v566_v14 = vmul.f32 %v550_v0, %v502_v6  ;;  %v1588_v17 = vpop.f32.mrf.mxu0  ;;  %v1596_v18 = vpop.f32.mrf.mxu1  ;;  %v543_v22 = vmul.f32 0.044715, %v527_v11  ;;  %v2083_v28 = vadd.f32 %v2022_v32, %v487_v4  ;;  %v560_v33 = vadd.f32 1.0, %v544_v19 }
 0x114   : > { %v569_v1 = vmul.f32 %v553_v58, %v505_v57  ;;  %v551_v10 = vadd.f32 1.0, %v535_v2  ;;  %v540_v23 = vmul.f32 0.044715, %v524_v12  ;;  %v522_v24 = vmul.f32 %v2072_v13, %v2072_v13 }
 0x115   : > { %v2079_v25 = vadd.f32 %v1588_v17, %v2022_v32  ;;  %v458_v29 = vpop.f32.mrf.mxu0  ;;  %v490_v30 = vpop.f32.mrf.mxu1  ;;  %v545_v34 = vmul.f32 0.044715, %v529_v20  ;;  %v511_v37 = vmul.f32 0.7978846, %v2053_v60  ;;  %v559_v38 = vadd.f32 1.0, %v543_v22 }
 0x116   : > { %v583_v9 = vpack.c.bf16 %v569_v1, %v568_v63  ;;  %v567_v16 = vmul.f32 %v551_v10, %v503_v8  ;;  %v556_v40 = vadd.f32 1.0, %v540_v23  ;;  %v2090_v41 = vadd.f32 %v1595_v54, %v2022_v32 }
 0x117   : > { %v525_v36 = vmul.f32 %v2079_v25, %v2079_v25  ;;  %v538_v42 = vmul.f32 0.044715, %v522_v24  ;;  %v2093_v45 = vadd.f32 %v2022_v32, %v458_v29  ;;  %v2096_v46 = vadd.f32 %v2022_v32, %v490_v30 }
 0x118   : > { %1679 = vtanh.bf16 %v583_v9  ;;  %v582_v21 = vpack.c.bf16 %v567_v16, %v566_v14  ;;  %v574_v47 = vmul.f32 %v558_v27, %v510_v26  ;;  %v513_v49 = vmul.f32 0.7978846, %v2064_v7 }
 0x119   : > { %v541_v44 = vmul.f32 0.044715, %v525_v36  ;;  %v530_v50 = vmul.f32 %v2083_v28, %v2083_v28  ;;  %v2102_v51 = vadd.f32 %v1596_v18, %v2022_v32  ;;  %v508_v52 = vmul.f32 0.7978846, %v2056_v61 }
 0x11a   : > { %1681 = vtanh.bf16 %v582_v21  ;;  %v509_v54 = vmul.f32 0.7978846, %v2079_v25  ;;  %v523_v57 = vmul.f32 %v2093_v45, %v2093_v45  ;;  %v561_v58 = vadd.f32 1.0, %v545_v34 }
 0x11b   : > { %v557_v55 = vadd.f32 1.0, %v541_v44  ;;  %v575_v59 = vmul.f32 %v559_v38, %v511_v37  ;;  %v532_v62 = vmul.f32 %v2090_v41, %v2090_v41  ;;  %v531_v63 = vmul.f32 %v2096_v46, %v2096_v46 }
 0x11c   : > { %v572_v0 = vmul.f32 %v556_v40, %v508_v52  ;;  %v554_v1 = vadd.f32 1.0, %v538_v42  ;;  %v539_v2 = vmul.f32 0.044715, %v523_v57  ;;  %v576_v3 = vmul.f32 %v560_v33, %v512_v31 }
 0x11d   : > { %v573_v32 = vmul.f32 %v557_v55, %v509_v54  ;;  %v506_v4 = vmul.f32 0.7978846, %v2072_v13  ;;  %v546_v5 = vmul.f32 0.044715, %v530_v50  ;;  %v533_v6 = vmul.f32 %v2102_v51, %v2102_v51 }
 0x11e   : > { %v507_v9 = vmul.f32 0.7978846, %v2093_v45  ;;  %v555_v10 = vadd.f32 1.0, %v539_v2  ;;  %v547_v11 = vmul.f32 0.044715, %v531_v63  ;;  %v577_v14 = vmul.f32 %v561_v58, %v513_v49 }
 0x11f   : > { %v585_v8 = vpack.c.bf16 %v573_v32, %v572_v0  ;;  %v586_v15 = vpack.c.bf16 %v575_v59, %v574_v47  ;;  %v548_v16 = vmul.f32 0.044715, %v532_v62  ;;  %v514_v17 = vmul.f32 0.7978846, %v2083_v28 }
 0x120   : > { %v570_v18 = vmul.f32 %v554_v1, %v506_v4  ;;  %v571_v19 = vmul.f32 %v555_v10, %v507_v9  ;;  %v562_v22 = vadd.f32 1.0, %v546_v5  ;;  %v549_v23 = vmul.f32 0.044715, %v533_v6 }
 0x121   : > { %v515_v24 = vmul.f32 0.7978846, %v2096_v46  ;;  %v616_v26 = vmul.f32 0.5, %v2025_v35  ;;  %1683 = vtanh.bf16 %v585_v8  ;;  %v563_v29 = vadd.f32 1.0, %v547_v11 }
 0x122   : > { %v584_v27 = vpack.c.bf16 %v571_v19, %v570_v18  ;;  %v587_v33 = vpack.c.bf16 %v577_v14, %v576_v3  ;;  %1685 = vtanh.bf16 %v586_v15  ;;  %v516_v34 = vmul.f32 0.7978846, %v2090_v41 }
 0x123   : > { %v564_v36 = vadd.f32 1.0, %v548_v16  ;;  %v578_v42 = vmul.f32 %v562_v22, %v514_v17  ;;  %v517_v44 = vmul.f32 0.7978846, %v2102_v51  ;;  %v614_v35 = vmul.f32 0.5, %v2030_v39 }
 0x124   : > { %1687 = vtanh.bf16 %v584_v27  ;;  %v565_v49 = vadd.f32 1.0, %v549_v23  ;;  %v579_v50 = vmul.f32 %v563_v29, %v515_v24  ;;  %v617_v54 = vmul.f32 0.5, %v2033_v43 }
 0x125   : > { %1689 = vtanh.bf16 %v587_v33  ;;  %v580_v59 = vmul.f32 %v564_v36, %v516_v34  ;;  %v615_v39 = vmul.f32 0.5, %v2043_v53  ;;  %v619_v8 = vmul.f32 0.5, %v2093_v45 }
 0x126   : > { %v1680_v12 = vpop.eup %1679  ;;  %v581_v62 = vmul.f32 %v565_v49, %v517_v44  ;;  %v588_v63 = vpack.c.bf16 %v579_v50, %v578_v42  ;;  %v618_v10 = vmul.f32 0.5, %v2072_v13  ;;  %v621_v19 = vmul.f32 0.5, %v2079_v25 }
 0x127   : > { %v600_v20 = vunpack.c.l.bf16 %v1680_v12  ;;  %v601_v21 = vunpack.c.h.bf16 %v1680_v12  ;;  %v620_v45 = vmul.f32 0.5, %v2056_v61  ;;  %v623_v27 = vmul.f32 0.5, %v2053_v60 }
 0x128   : > { %v1682_v31 = vpop.eup %1681  ;;  %v589_v1 = vpack.c.bf16 %v581_v62, %v580_v59  ;;  %1691 = vtanh.bf16 %v588_v63  ;;  %v622_v29 = vmul.f32 0.5, %v2040_v48  ;;  %v627_v48 = vmul.f32 0.5, %v2096_v46 }
 0x129   : > { %v632_v30 = vadd.f32 1.0, %v600_v20  ;;  %v598_v38 = vunpack.c.l.bf16 %v1682_v31  ;;  %v633_v40 = vadd.f32 1.0, %v601_v21  ;;  %v599_v47 = vunpack.c.h.bf16 %v1682_v31 }
 0x12a   : > { %1693 = vtanh.bf16 %v589_v1  ;;  %v626_v44 = vmul.f32 0.5, %v2083_v28 }
 0x12b   : > { %v2120_v37 = vmul.f32 %v632_v30, %v616_v26  ;;  %v630_v52 = vadd.f32 1.0, %v598_v38  ;;  %v2128_v57 = vmul.f32 %v633_v40, %v617_v54  ;;  %v631_v58 = vadd.f32 1.0, %v599_v47 }
 0x12c   : > { %v625_v38 = vmul.f32 0.5, %v2064_v7  ;;  %v624_v40 = vmul.f32 0.5, %v2047_v56  ;;  %v629_v7 = vmul.f32 0.5, %v2102_v51  ;;  %v628_v56 = vmul.f32 0.5, %v2090_v41 }
 0x12d   : > { %666 = vadd.xlane.f32.xlu1 %v2120_v37  ;;  %v2126_v55 = vmul.f32 %v630_v52, %v614_v35  ;;  %v2133_v0 = vmul.f32 %v631_v58, %v615_v39 }
 0x12f   : > { %662 = vadd.xlane.f32.xlu0 %v2126_v55  ;;  %v1684_v43 = vpop.eup %1683 }
 0x130   : > { %v1686_v32 = vpop.eup %1685  ;;  %v605_v5 = vunpack.c.h.bf16 %v1684_v43  ;;  %v604_v6 = vunpack.c.l.bf16 %v1684_v43 }
 0x131   : > { %668 = vadd.xlane.f32.xlu1 %v2128_v57  ;;  %v607_v11 = vunpack.c.h.bf16 %v1686_v32  ;;  %v606_v12 = vunpack.c.l.bf16 %v1686_v32 }
 0x132   : > { %v1688_v2 = vpop.eup %1687  ;;  %v637_v17 = vadd.f32 1.0, %v605_v5  ;;  %v636_v18 = vadd.f32 1.0, %v604_v6 }
 0x133   : > { %664 = vadd.xlane.f32.xlu0 %v2133_v0  ;;  %v603_v3 = vunpack.c.h.bf16 %v1688_v2  ;;  %v602_v4 = vunpack.c.l.bf16 %v1688_v2  ;;  %v1690_v14 = vpop.eup %1689  ;;  %v639_v23 = vadd.f32 1.0, %v607_v11  ;;  %v638_v24 = vadd.f32 1.0, %v606_v12 }
 0x134   : > { %v609_v20 = vunpack.c.h.bf16 %v1690_v14  ;;  %v608_v13 = vunpack.c.l.bf16 %v1690_v14  ;;  %v2146_v21 = vmul.f32 %v637_v17, %v621_v19  ;;  %v2148_v22 = vmul.f32 %v636_v18, %v620_v45 }
 0x135   : > { %v635_v9 = vadd.f32 1.0, %v603_v3  ;;  %v634_v53 = vadd.f32 1.0, %v602_v4  ;;  %v655_v61 = vmul.f32 %v639_v23, %v623_v27  ;;  %v2154_v31 = vmul.f32 %v638_v24, %v622_v29  ;;  %v2203_v24 = vld [vmem:[%s3180_s5] ss:$0 sm:$0xff] }
 0x136   : > { %v1692_v26 = vpop.eup %1691  ;;  %v641_v25 = vadd.f32 1.0, %v609_v20  ;;  %v640_v30 = vadd.f32 1.0, %v608_v13 }
 0x137   : > { %v2138_v15 = vmul.f32 %v635_v9, %v619_v8  ;;  %v2140_v16 = vmul.f32 %v634_v53, %v618_v10  ;;  %v611_v33 = vunpack.c.h.bf16 %v1692_v26  ;;  %v610_v34 = vunpack.c.l.bf16 %v1692_v26 }
 0x138   : > { %v1694_v36 = vpop.eup %1693  ;;  %v2159_v42 = vmul.f32 %v641_v25, %v625_v38  ;;  %v656_v60 = vmul.f32 %v640_v30, %v624_v40 }
 0x139   : > { %672 = vadd.xlane.f32.xlu1 %v2138_v15  ;;  %670 = vadd.xlane.f32.xlu0 %v2140_v16  ;;  %v643_v35 = vadd.f32 1.0, %v611_v33  ;;  %v642_v47 = vadd.f32 1.0, %v610_v34  ;;  %v613_v49 = vunpack.c.h.bf16 %v1694_v36  ;;  %v612_v50 = vunpack.c.l.bf16 %v1694_v36 }
 0x13b   : > { %v2166_v52 = vmul.f32 %v643_v35, %v627_v48  ;;  %v2168_v54 = vmul.f32 %v642_v47, %v626_v44  ;;  %v645_v58 = vadd.f32 1.0, %v613_v49  ;;  %v644_v59 = vadd.f32 1.0, %v612_v50 }
 0x13d   : > { %676 = vadd.xlane.f32.xlu1 %v2146_v21  ;;  %674 = vadd.xlane.f32.xlu0 %v2148_v22  ;;  %v2172_v28 = vmul.f32 %v645_v58, %v629_v7  ;;  %v2174_v46 = vmul.f32 %v644_v59, %v628_v56 }
 0x141   : > { %680 = vadd.xlane.f32.xlu1 %v655_v61  ;;  %678 = vadd.xlane.f32.xlu0 %v2154_v31 }
 0x145   : > { %684 = vadd.xlane.f32.xlu1 %v2159_v42  ;;  %682 = vadd.xlane.f32.xlu0 %v656_v60 }
 0x149   : > { %688 = vadd.xlane.f32.xlu1 %v2166_v52  ;;  %686 = vadd.xlane.f32.xlu0 %v2168_v54 }
 0x14d   : > { %692 = vadd.xlane.f32.xlu1 %v2172_v28  ;;  %690 = vadd.xlane.f32.xlu0 %v2174_v46 }
 0x1b6   : > { %v667_v51 = vpop.xlane.xlu1 %666 }
 0x1b7   : > { %v697_v41 = vmul.f32 0.0078125, %v667_v51 }
 0x1b8   : > { %v663_v63 = vpop.xlane.xlu0 %662 }
 0x1b9   : > { %v2179_v62 = vsub.f32 %v2120_v37, %v697_v41  ;;  %v695_v11 = vmul.f32 0.0078125, %v663_v63 }
 0x1ba   : > { %v669_v39 = vpop.xlane.xlu1 %668 }
 0x1bb   : > { %v698_v1 = vmul.f32 0.0078125, %v669_v39  ;;  %v729_v43 = vmul.f32 %v2179_v62, %v2179_v62  ;;  %v711_v18 = vsub.f32 %v2126_v55, %v695_v11 }
 0x1bc   : > { %v665_v2 = vpop.xlane.xlu0 %664 }
 0x1bd   : > { %v2184_v32 = vsub.f32 %v2128_v57, %v698_v1  ;;  %747 = vadd.xlane.f32.xlu0 %v729_v43  ;;  %v696_v3 = vmul.f32 0.0078125, %v665_v2  ;;  %v830_v55 = vmul.f32 %v2203_v24, %v711_v18  ;;  %v832_v1 = vmul.f32 %v2203_v24, %v2179_v62 }
 0x1bf   : > { %v730_v4 = vmul.f32 %v2184_v32, %v2184_v32  ;;  %v2189_v5 = vsub.f32 %v2133_v0, %v696_v3  ;;  %v833_v43 = vmul.f32 %v2203_v24, %v2184_v32 }
 0x1c1   : > { %749 = vadd.xlane.f32.xlu1 %v730_v4  ;;  %v728_v37 = vmul.f32 %v2189_v5, %v2189_v5 }
 0x1c2   : > { %v673_v6 = vpop.xlane.xlu1 %672  ;;  %v671_v8 = vpop.xlane.xlu0 %670 }
 0x1c3   : > { %v700_v13 = vmul.f32 0.0078125, %v673_v6 }
 0x1c5   : > { %745 = vadd.xlane.f32.xlu1 %v728_v37  ;;  %v716_v30 = vsub.f32 %v2138_v15, %v700_v13 }
 0x1c6   : > { %v677_v9 = vpop.xlane.xlu1 %676  ;;  %v675_v10 = vpop.xlane.xlu0 %674 }
 0x1c7   : > { %v702_v0 = vmul.f32 0.0078125, %v677_v9  ;;  %v701_v33 = vmul.f32 0.0078125, %v675_v10 }
 0x1c9   : > { %v718_v26 = vsub.f32 %v2146_v21, %v702_v0  ;;  %v699_v21 = vmul.f32 0.0078125, %v671_v8  ;;  %v717_v48 = vsub.f32 %v2148_v22, %v701_v33 }
 0x1ca   : > { %v681_v57 = vpop.xlane.xlu1 %680  ;;  %v679_v53 = vpop.xlane.xlu0 %678 }
 0x1cb   : > { %v704_v12 = vmul.f32 0.0078125, %v681_v57  ;;  %v703_v27 = vmul.f32 0.0078125, %v679_v53  ;;  %v734_v38 = vmul.f32 %v718_v26, %v718_v26  ;;  %v715_v15 = vsub.f32 %v2140_v16, %v699_v21 }
 0x1cc   : > { %v733_v56 = vmul.f32 %v717_v48, %v717_v48  ;;  %v831_v16 = vmul.f32 %v2203_v24, %v2189_v5  ;;  %v837_v3 = vmul.f32 %v2203_v24, %v718_v26  ;;  %v836_v4 = vmul.f32 %v2203_v24, %v717_v48 }
 0x1cd   : > { %v2193_v14 = vsub.f32 %v655_v61, %v704_v12  ;;  %v727_v61 = vmul.f32 %v711_v18, %v711_v18  ;;  %v719_v34 = vsub.f32 %v2154_v31, %v703_v27  ;;  %v731_v22 = vmul.f32 %v715_v15, %v715_v15 }
 0x1ce   : > { %v683_v17 = vpop.xlane.xlu0 %682  ;;  %v685_v25 = vpop.xlane.xlu1 %684  ;;  %v2253_v48 = vstv %s894_s12  ;;  %s1821_s12 = sshll.u32 %s1888_s11, 4  ;;  %s1822_s12 = int_to_ptr.vmem [resolvable:$false] %s1821_s12 }
 0x1cf   : > { %v705_v19 = vmul.f32 0.0078125, %v683_v17  ;;  %v736_v45 = vmul.f32 %v2193_v14, %v2193_v14  ;;  %v706_v36 = vmul.f32 0.0078125, %v685_v25  ;;  %v735_v47 = vmul.f32 %v719_v34, %v719_v34  ;;  %s1823_s13 = scalar_lea.vmem %s1822_s12, 32  ;;  %p1824_p12 = scmp.lt.s32.totalorder %s1448_s21, %s1822_s12 }
 0x1d0   : > { %v839_v62 = vmul.f32 %v2203_v24, %v2193_v14  ;;  %v838_v5 = vmul.f32 %v2203_v24, %v719_v34  ;;  %p1825_p13 = scmp.lt.s32.totalorder %s1823_s13, %s1817_s10 }
 0x1d1   : > { %v2198_v20 = vsub.f32 %v656_v60, %v705_v19  ;;  %761 = vadd.xlane.f32.xlu1 %v736_v45  ;;  %v732_v60 = vmul.f32 %v716_v30, %v716_v30  ;;  %v722_v44 = vsub.f32 %v2159_v42, %v706_v36 }
 0x1d2   : > { %v687_v23 = vpop.xlane.xlu0 %686  ;;  %v689_v49 = vpop.xlane.xlu1 %688  ;;  %p1826_p0 = por %p1825_p13, %p1824_p12 }
 0x1d3   : > { %v737_v29 = vmul.f32 %v2198_v20, %v2198_v20  ;;  %v707_v50 = vmul.f32 0.0078125, %v687_v23  ;;  %v738_v7 = vmul.f32 %v722_v44, %v722_v44  ;;  %v708_v58 = vmul.f32 0.0078125, %v689_v49 }
 0x1d4   : > { %v841_v32 = vmul.f32 %v2203_v24, %v722_v44  ;;  %v840_v6 = vmul.f32 %v2203_v24, %v2198_v20  ;;  %p1827_p1 = pnand %p1826_p0, %p1820_p11 }
 0x1d5   : > { %846 = vadd.xlane.f32.xlu1 %v830_v55  ;;  %763 = vadd.xlane.f32.xlu0 %v737_v29  ;;  %v723_v59 = vsub.f32 %v2168_v54, %v707_v50  ;;  %v724_v41 = vsub.f32 %v2166_v52, %v708_v58  ;;  %v834_v52 = vmul.f32 %v2203_v24, %v715_v15  ;;  %v2258_v15 = vld [vmem:[%s2251_s16 + $0x8] sm:$0xff]  ;;  %v2264_v58 = vld [vmem:[%s2251_s16] sm:$0xff] }
 0x1d6   : > { %v691_v40 = vpop.xlane.xlu0 %690  ;;  %v693_v42 = vpop.xlane.xlu1 %692  ;;  %vm945_vm0 = vcmp.eq.s32.totalorder %v2258_v15, 0  ;;  %vm944_vm1 = vcmp.eq.s32.totalorder %v2264_v58, 0  ;;  %vm3183_vm3 = vcmp.ge.s32.totalorder %v2258_v15, 0  ;;  %vm3182_vm5 = vcmp.ge.s32.totalorder %v2264_v58, 0 }
 0x1d7   : > { %v709_v35 = vmul.f32 0.0078125, %v691_v40  ;;  %v710_v63 = vmul.f32 0.0078125, %v693_v42  ;;  %v739_v39 = vmul.f32 %v723_v59, %v723_v59  ;;  %v740_v54 = vmul.f32 %v724_v41, %v724_v41 }
 0x1d8   : > { %v843_v37 = vmul.f32 %v2203_v24, %v724_v41  ;;  %v842_v9 = vmul.f32 %v2203_v24, %v723_v59  ;;  %vm1305_vm6 = vcmp.eq.s32.totalorder %v2264_v58, 1  ;;  %vm1306_vm7 = vcmp.eq.s32.totalorder %v2258_v15, 1 }
 0x1d9   : > { %757 = vadd.xlane.f32.xlu1 %v734_v38  ;;  %743 = vadd.xlane.f32.xlu0 %v727_v61  ;;  %v725_v31 = vsub.f32 %v2174_v46, %v709_v35  ;;  %v726_v46 = vsub.f32 %v2172_v28, %v710_v63  ;;  %v835_v28 = vmul.f32 %v2203_v24, %v716_v30 }
 0x1db   : > { %v741_v51 = vmul.f32 %v725_v31, %v725_v31  ;;  %v742_v2 = vmul.f32 %v726_v46, %v726_v46  ;;  %v845_v8 = vmul.f32 %v2203_v24, %v726_v46  ;;  %v844_v10 = vmul.f32 %v2203_v24, %v725_v31  ;;  %v2276_v46 = vld [vmem:[%s2251_s16 + $0x10] sm:$0xff] }
 0x1dc   : > { %vm946_vm2 = vcmp.eq.s32.totalorder %v2276_v46, 0  ;;  %vm1307_vm11 = vcmp.eq.s32.totalorder %v2276_v46, 1 }
 0x1dd   : > { %753 = vadd.xlane.f32.xlu1 %v732_v60  ;;  %759 = vadd.xlane.f32.xlu0 %v735_v47 }
 0x1e1   : > { %765 = vadd.xlane.f32.xlu1 %v738_v7  ;;  %755 = vadd.xlane.f32.xlu0 %v733_v56 }
 0x1e5   : > { %751 = vadd.xlane.f32.xlu0 %v731_v22  ;;  %771 = vadd.xlane.f32.xlu1 %v741_v51 }
 0x1e9   : > { %848 = vadd.xlane.f32.xlu0 %v831_v16  ;;  %767 = vadd.xlane.f32.xlu1 %v739_v39 }
 0x1ed   : > { %850 = vadd.xlane.f32.xlu0 %v832_v1  ;;  %769 = vadd.xlane.f32.xlu1 %v740_v54 }
 0x1f1   : > { %852 = vadd.xlane.f32.xlu0 %v833_v43  ;;  %773 = vadd.xlane.f32.xlu1 %v742_v2 }
 0x1f5   : > { %854 = vadd.xlane.f32.xlu0 %v834_v52  ;;  %860 = vadd.xlane.f32.xlu1 %v837_v3 }
 0x1f9   : > { %856 = vadd.xlane.f32.xlu0 %v835_v28  ;;  %864 = vadd.xlane.f32.xlu1 %v839_v62 }
 0x1fd   : > { %858 = vadd.xlane.f32.xlu0 %v836_v4  ;;  %868 = vadd.xlane.f32.xlu1 %v841_v32 }
 0x201   : > { %862 = vadd.xlane.f32.xlu0 %v838_v5  ;;  %872 = vadd.xlane.f32.xlu1 %v843_v37 }
 0x205   : > { %866 = vadd.xlane.f32.xlu0 %v840_v6  ;;  %876 = vadd.xlane.f32.xlu1 %v845_v8 }
 0x209   : > { %870 = vadd.xlane.f32.xlu0 %v842_v9 }
 0x20d   : > { %874 = vadd.xlane.f32.xlu0 %v844_v10 }
 0x246   : > { %v748_v11 = vpop.xlane.xlu0 %747 }
 0x247   : > { %v777_v19 = vmul.f32 0.0078125, %v748_v11  ;;  %v2296_v11 = vld [vmem:[%s2251_s16 + $0x18] sm:$0xff] }
 0x248   : > { %vm947_vm4 = vcmp.eq.s32.totalorder %v2296_v11, 0 }
 0x249   : > { %v793_v24 = vadd.f32 1e-12, %v777_v19 }
 0x24a   : > { %v750_v57 = vpop.xlane.xlu1 %749 }
 0x24b   : > { %v778_v26 = vmul.f32 0.0078125, %v750_v57 }
 0x24d   : > { %v794_v25 = vadd.f32 1e-12, %v778_v26 }
 0x24e   : > { %v746_v53 = vpop.xlane.xlu1 %745 }
 0x24f   : > { %v776_v14 = vmul.f32 0.0078125, %v746_v53 }
 0x251   : > { %v792_v0 = vadd.f32 1e-12, %v776_v14 }
 0x253   : > { %1695 = vrsqrt.f32 %v792_v0 }
 0x25a   : > { %v762_v12 = vpop.xlane.xlu1 %761 }
 0x25b   : > { %v784_v47 = vmul.f32 0.0078125, %v762_v12 }
 0x25d   : > { %v800_v42 = vadd.f32 1e-12, %v784_v47 }
 0x25e   : > { %v847_v17 = vpop.xlane.xlu1 %846  ;;  %v2238_v18 = vpop.xlane.xlu0 %763 }
 0x25f   : > { %v785_v47 = vmul.f32 0.0078125, %v2238_v18 }
 0x260   : > { %v1696_v60 = vpop.eup %1695 }
 0x262   : > { %v758_v45 = vpop.xlane.xlu1 %757  ;;  %v744_v20 = vpop.xlane.xlu0 %743 }
 0x263   : > { %v775_v13 = vmul.f32 0.0078125, %v744_v20  ;;  %v782_v29 = vmul.f32 0.0078125, %v758_v45 }
 0x265   : > { %v791_v23 = vadd.f32 1e-12, %v775_v13  ;;  %v798_v33 = vadd.f32 1e-12, %v782_v29 }
 0x266   : > { %v754_v27 = vpop.xlane.xlu1 %753  ;;  %v2241_v55 = vpop.xlane.xlu0 %759 }
 0x267   : > { %1697 = vrsqrt.f32 %v791_v23  ;;  %v780_v40 = vmul.f32 0.0078125, %v754_v27  ;;  %v2311_v27 = vld [vmem:[%s2251_s16 + $0x38] sm:$0xff] }
 0x268   : > { %1699 = vrsqrt.f32 %v793_v24  ;;  %vm951_vm12 = vcmp.eq.s32.totalorder %v2311_v27, 0 }
 0x269   : > { %1701 = vrsqrt.f32 %v794_v25  ;;  %v796_v50 = vadd.f32 1e-12, %v780_v40 }
 0x26a   : > { %v766_v30 = vpop.xlane.xlu1 %765  ;;  %v2244_v61 = vpop.xlane.xlu0 %755  ;;  %1703 = vrsqrt.f32 %v798_v33 }
 0x26b   : > { %v786_v0 = vmul.f32 0.0078125, %v766_v30  ;;  %v781_v20 = vmul.f32 0.0078125, %v2244_v61  ;;  %v2314_v30 = vld [vmem:[%s2251_s16 + $0x20] sm:$0xff] }
 0x26c   : > { %vm948_vm14 = vcmp.eq.s32.totalorder %v2314_v30, 0 }
 0x26d   : > { %v802_v25 = vadd.f32 1e-12, %v786_v0  ;;  %v797_v40 = vadd.f32 1e-12, %v781_v20 }
 0x26e   : > { %v2246_v34 = vpop.xlane.xlu1 %771  ;;  %v752_v36 = vpop.xlane.xlu0 %751 }
 0x26f   : > { %v779_v38 = vmul.f32 0.0078125, %v752_v36 }
 0x271   : > { %v795_v21 = vadd.f32 1e-12, %v779_v38 }
 0x272   : > { %v2255_v44 = vpop.xlane.xlu1 %767  ;;  %v849_v35 = vpop.xlane.xlu0 %848 }
 0x273   : > { %v879_v49 = vmul.f32 %v1696_v60, %v849_v35  ;;  %1705 = vrsqrt.f32 %v795_v21 }
 0x274   : > { %v1698_v31 = vpop.eup %1697  ;;  %1707 = vrsqrt.f32 %v796_v50 }
 0x275   : > { %v2261_v7 = vadd.f32 %v2253_v48, %v879_v49  ;;  %v878_v56 = vmul.f32 %v1698_v31, %v847_v17  ;;  %v1700_v51 = vpop.eup %1699  ;;  %1709 = vrsqrt.f32 %v800_v42 }
 0x276   : > { %v2267_v59 = vpop.xlane.xlu1 %769  ;;  %v851_v22 = vpop.xlane.xlu0 %850 }
 0x277   : > { %v961_v41 = vsub.f32 0.0, %v2261_v7  ;;  %v896_v63 = vadd.f32 %v2253_v48, %v878_v56  ;;  %v880_v16 = vmul.f32 %v1700_v51, %v851_v22  ;;  %v1702_v52 = vpop.eup %1701  ;;  %vm1290_vm8 = vcmp.gt.f32.partialorder %v2261_v7, 0.0 }
 0x278   : > { %v1704_v37 = vpop.eup %1703  ;;  %vm2324_vm10 = vmxor %vm1290_vm8, %vm1306_vm7  ;;  %v783_v22 = vmul.f32 0.0078125, %v2241_v55  ;;  %v789_v55 = vmul.f32 0.0078125, %v2246_v34  ;;  %vm1309_vm8 = vcmp.eq.s32.totalorder %v2314_v30, 1  ;;  %v2530_v34 = vld [vmem:[%s2251_s16 + $0x30] sm:$0xff] }
 0x279   : > { %v2273_v39 = vsel %vm945_vm0, %v2261_v7, %v961_v41  ;;  %v960_v1 = vsub.f32 0.0, %v896_v63  ;;  %v2282_v3 = vadd.f32 %v2253_v48, %v880_v16  ;;  %vm1289_vm9 = vcmp.gt.f32.partialorder %v896_v63, 0.0 }
 0x27a   : > { %v1009_v54 = vand.u32 2147483647, %v2273_v39  ;;  %v2279_v43 = vpop.xlane.xlu1 %773  ;;  %v853_v2 = vpop.xlane.xlu0 %852  ;;  %vm2334_vm13 = vmxor %vm1289_vm9, %vm1305_vm6  ;;  %vm1886_vm0 = vmmov 1   ;;  %vm1248_vm6 = vcmask 7168   ;;  %vm1312_vm9 = vcmp.eq.s32.totalorder %v2311_v27, 1 }
 0x27b   : > { %v2284_v28 = vsel %vm944_vm1, %v896_v63, %v960_v1  ;;  %v881_v4 = vmul.f32 %v1702_v52, %v853_v2  ;;  %v962_v5 = vsub.f32 0.0, %v2282_v3  ;;  %vm1291_vm15 = vcmp.gt.f32.partialorder %v2282_v3, 0.0  ;;  %vm2346_vm1 = vmxor %vm2324_vm10, %vm1886_vm0  ;;  %v2387_v1 = vld [vmem:[%s2251_s16 + $0x48] sm:$0xff] }
 0x27c   : > { %v1025_v62 = vsub.f32 0.0, %v1009_v54  ;;  %v1008_v32 = vand.u32 2147483647, %v2284_v28  ;;  %vm2359_vm7 = vmxor %vm2334_vm13, %vm1886_vm0  ;;  %v788_v63 = vmul.f32 0.0078125, %v2267_v59  ;;  %v2390_v59 = vld [vmem:[%s2251_s16 + $0x28] sm:$0xff]  ;;  %vm953_vm13 = vcmp.eq.s32.totalorder %v2387_v1, 0 }
 0x27d   : > { %v2290_v6 = vadd.f32 %v2253_v48, %v881_v4  ;;  %v2293_v53 = vsel %vm946_vm2, %v2282_v3, %v962_v5  ;;  %vm930_vm2 = vcmp.ge.s32.totalorder %v2276_v46, 0  ;;  %vm2375_vm10 = vmxor %vm1291_vm15, %vm1307_vm11  ;;  %v801_v54 = vadd.f32 1e-12, %v785_v47 }
 0x27e   : > { %v861_v8 = vpop.xlane.xlu1 %860  ;;  %v855_v9 = vpop.xlane.xlu0 %854  ;;  %v1024_v10 = vsub.f32 0.0, %v1008_v32  ;;  %v1042_v57 = vmul.f32 1.442695, %v1025_v62  ;;  %v1010_v14 = vand.u32 2147483647, %v2293_v53  ;;  %vm2396_vm11 = vmand %vm2346_vm1, %vm3183_vm3 }
 0x27f   : > { %v885_v12 = vmul.f32 %v1704_v37, %v861_v8  ;;  %v963_v45 = vsub.f32 0.0, %v2290_v6  ;;  %v799_v62 = vadd.f32 1e-12, %v783_v22  ;;  %v805_v37 = vadd.f32 1e-12, %v789_v55  ;;  %vm2418_vm1 = vmxor %vm2375_vm10, %vm1886_vm0 }
 0x280   : > { %v1706_v17 = vpop.eup %1705  ;;  %v1040_v19 = vmul.f32 1.442695, %v1024_v10  ;;  %1711 = vpow2.f32 %v1042_v57  ;;  %v1026_v26 = vsub.f32 0.0, %v1010_v14  ;;  %v787_v57 = vmul.f32 0.0078125, %v2255_v44 }
 0x281   : > { %v2305_v13 = vadd.f32 %v2253_v48, %v885_v12  ;;  %v882_v23 = vmul.f32 %v1706_v17, %v855_v9  ;;  %v1708_v29 = vpop.eup %1707  ;;  %v2322_v33 = vsel %vm947_vm4, %v2290_v6, %v963_v45  ;;  %vm1308_vm4 = vcmp.eq.s32.totalorder %v2296_v11, 1 }
 0x282   : > { %v857_v24 = vpop.xlane.xlu0 %856  ;;  %1713 = vpow2.f32 %v1040_v19  ;;  %v865_v36 = vpop.xlane.xlu1 %864  ;;  %v1044_v50 = vmul.f32 1.442695, %v1026_v26  ;;  %v1011_v7 = vand.u32 2147483647, %v2322_v33  ;;  %v804_v12 = vadd.f32 1e-12, %v788_v63 }
 0x283   : > { %v2317_v61 = vadd.f32 %v2253_v48, %v882_v23  ;;  %v883_v38 = vmul.f32 %v1708_v29, %v857_v24  ;;  %v967_v60 = vsub.f32 0.0, %v2305_v13  ;;  %v1710_v35 = vpop.eup %1709  ;;  %1715 = vrsqrt.f32 %v802_v25 }
 0x284   : > { %v887_v56 = vmul.f32 %v1710_v35, %v865_v36  ;;  %1717 = vrsqrt.f32 %v797_v40  ;;  %v1027_v52 = vsub.f32 0.0, %v1011_v7  ;;  %vm1296_vm15 = vcmp.gt.f32.partialorder %v2305_v13, 0.0 }
 0x285   : > { %v964_v31 = vsub.f32 0.0, %v2317_v61  ;;  %v2353_v51 = vadd.f32 %v2253_v48, %v883_v38  ;;  %v2368_v41 = vsel %vm951_vm12, %v2305_v13, %v967_v60  ;;  %1719 = vpow2.f32 %v1044_v50  ;;  %v2505_v50 = vld [vmem:[%s2251_s16 + $0x58] sm:$0xff] }
 0x286   : > { %vm1292_vm12 = vcmp.gt.f32.partialorder %v2290_v6, 0.0  ;;  %v2402_v3 = vadd.f32 %v2253_v48, %v887_v56  ;;  %v1015_v32 = vand.u32 2147483647, %v2368_v41  ;;  %vm3188_vm10 = vcmp.ge.s32.totalorder %v2314_v30, 0  ;;  %v869_v60 = vpop.xlane.xlu1 %868  ;;  %v859_v18 = vpop.xlane.xlu0 %858 }
 0x287   : > { %v2384_v16 = vsel %vm948_vm14, %v2317_v61, %v964_v31  ;;  %vm2408_vm14 = vmand %vm2359_vm7, %vm3182_vm5  ;;  %v965_v5 = vsub.f32 0.0, %v2353_v51  ;;  %vm949_vm5 = vcmp.eq.s32.totalorder %v2390_v59, 0  ;;  %vm1310_vm7 = vcmp.eq.s32.totalorder %v2390_v59, 1 }
 0x288   : > { %v1012_v9 = vand.u32 2147483647, %v2384_v16  ;;  %vm2432_vm3 = vmxor %vm1292_vm12, %vm1308_vm4  ;;  %1721 = vrsqrt.f32 %v801_v54  ;;  %v1887_v17 = vmov 0.0   ;;  %v1046_v0 = vmul.f32 1.442695, %v1027_v52 }
 0x289   : > { %v1369_v44 = vsel %vm2408_vm14, 1.0, %v1887_v17  ;;  %vm2446_vm4 = vmxor %vm1296_vm15, %vm1312_vm9  ;;  %v969_v19 = vsub.f32 0.0, %v2402_v3  ;;  %1723 = vrsqrt.f32 %v799_v62  ;;  %v1031_v23 = vsub.f32 0.0, %v1015_v32  ;;  %v2641_v62 = vld [vmem:[%s2251_s16 + $0x68] sm:$0xff] }
 0x28a   : > { %vm2457_vm12 = vmand %vm2418_vm1, %vm930_vm2  ;;  %vm1293_vm14 = vcmp.gt.f32.partialorder %v2317_v61, 0.0  ;;  %v2465_v13 = vsel %vm949_vm5, %v2353_v51, %v965_v5  ;;  %1725 = vrsqrt.f32 %v805_v37  ;;  %v1370_v26 = vsel %vm2396_vm11, 1.0, %v1887_v17 }
 0x28b   : > { %vm2474_vm9 = vmxor %vm2432_vm3, %vm1886_vm0  ;;  %v1028_v25 = vsub.f32 0.0, %v1012_v9  ;;  %v803_v36 = vadd.f32 1e-12, %v787_v57  ;;  %v1385_v38 = vsel %vm1248_vm6, %v1369_v44, 0.0  ;;  %1727 = vrsqrt.f32 %v804_v12 }
 0x28c   : > { %v790_v40 = vmul.f32 0.0078125, %v2279_v43  ;;  %vm2483_vm5 = vmxor %vm2446_vm4, %vm1886_vm0  ;;  %vm3185_vm11 = vcmp.ge.s32.totalorder %v2387_v1, 0  ;;  %1729 = vpow2.f32 %v1046_v0  ;;  %v2500_v43 = vsel %vm953_vm13, %v2402_v3, %v969_v19 }
 0x28d   : > { %v2425_v10 = vpop.eup %1711  ;;  %vm2493_vm3 = vmxor %vm1293_vm14, %vm1309_vm8  ;;  %vm3187_vm15 = vcmp.ge.s32.totalorder %v2390_v59, 0  ;;  %v1013_v49 = vand.u32 2147483647, %v2465_v13  ;;  %v1386_v7 = vsel %vm1248_vm6, %v1370_v26, 0.0  ;;  %v1371_v61 = vsel %vm2457_vm12, 1.0, %v1887_v17 }
 0x28e   : > { %v1081_v24 = vadd.f32 1.0, %v2425_v10  ;;  %vm3222_vm8 = vcmp.ge.s32.totalorder %v2296_v11, 0  ;;  %v1054_v22 = vmul.f32 1.442695, %v1031_v23  ;;  %vm1298_vm1 = vcmp.gt.f32.partialorder %v2402_v3, 0.0 }
 0x28f   : > { %v2451_v45 = vpop.eup %1713  ;;  %vm2515_vm13 = vmand %vm2474_vm9, %vm3222_vm8  ;;  %vm3225_vm4 = vcmp.ge.s32.totalorder %v2311_v27, 0  ;;  %v1048_v42 = vmul.f32 1.442695, %v1028_v25  ;;  %vm1294_vm12 = vcmp.gt.f32.partialorder %v2353_v51, 0.0  ;;  %v1387_v2 = vadd.f32 %v1386_v7, %v1385_v38 }
 0x290   : > { %v1072_v35 = vadd.f32 1.0, %v2451_v45  ;;  %v1716_v31 = vpop.eup %1715  ;;  %1731 = vlog2.f32 %v1081_v24  ;;  %vm2524_vm14 = vmand %vm2483_vm5, %vm3225_vm4  ;;  %v806_v52 = vadd.f32 1e-12, %v790_v40  ;;  %v1017_v4 = vand.u32 2147483647, %v2500_v43 }
 0x291   : > { %v889_v63 = vmul.f32 %v1716_v31, %v869_v60  ;;  %v1718_v54 = vpop.eup %1717  ;;  %1733 = vrsqrt.f32 %v803_v36  ;;  %vm2535_vm9 = vmxor %vm2493_vm3, %vm1886_vm0  ;;  %vm1316_vm5 = vcmp.eq.s32.totalorder %v2505_v50, 1  ;;  %v1372_v5 = vsel %vm2515_vm13, 1.0, %v1887_v17 }
 0x292   : > { %v2541_v32 = vpop.eup %1719  ;;  %1735 = vlog2.f32 %v1072_v35  ;;  %vm3230_vm8 = vcmp.eq.s32.totalorder %v2387_v1, 1  ;;  %v1029_v8 = vsub.f32 0.0, %v1013_v49  ;;  %v884_v9 = vmul.f32 %v1718_v54, %v859_v18  ;;  %vm2559_vm3 = vmxor %vm1294_vm12, %vm1310_vm7 }
 0x293   : > { %vm2550_vm4 = vmxor %vm1298_vm1, %vm3230_vm8  ;;  %v1388_v57 = vsel %vm1248_vm6, %v1371_v61, 0.0  ;;  %1737 = vpow2.f32 %v1054_v22  ;;  %vm955_vm13 = vcmp.eq.s32.totalorder %v2505_v50, 0  ;;  %vm950_vm1 = vcmp.eq.s32.totalorder %v2530_v34, 0 }
 0x294   : > { %v992_v3 = vmax.f32 %v2284_v28, 0.0  ;;  %v993_v14 = vmax.f32 %v2273_v39, 0.0  ;;  %1739 = vpow2.f32 %v1048_v42  ;;  %vm2571_vm8 = vmand %vm2535_vm9, %vm3188_vm10  ;;  %v907_v51 = vadd.f32 %v2253_v48, %v889_v63  ;;  %v873_v42 = vpop.xlane.xlu1 %872 }
 0x295   : > { %v1090_v0 = vadd.f32 1.0, %v2541_v32  ;;  %v1390_v6 = vsel %vm1248_vm6, %v1372_v5, 0.0  ;;  %v1033_v19 = vsub.f32 0.0, %v1017_v4  ;;  %vm2581_vm7 = vmxor %vm2550_vm4, %vm1886_vm0  ;;  %vm1311_vm12 = vcmp.eq.s32.totalorder %v2530_v34, 1  ;;  %v2597_v36 = vpop.eup %1721 }
 0x296   : > { %v2587_v23 = vadd.f32 %v2253_v48, %v884_v9  ;;  %v1389_v26 = vadd.f32 %v1388_v57, %v1387_v2  ;;  %1741 = vrsqrt.f32 %v806_v52  ;;  %v1050_v29 = vmul.f32 1.442695, %v1029_v8  ;;  %vm2593_vm9 = vmxor %vm2559_vm3, %vm1886_vm0  ;;  %v2608_v35 = vpop.eup %1723 }
 0x297   : > { %v1376_v40 = vsel %vm2524_vm14, 1.0, %v1887_v17  ;;  %v1373_v21 = vsel %vm2571_vm8, 1.0, %v1887_v17  ;;  %vm3184_vm4 = vcmp.ge.s32.totalorder %v2505_v50, 0  ;;  %v1084_v47 = vmul.f32 -0.5, %v2425_v10  ;;  %vm2616_vm14 = vmand %vm2581_vm7, %vm3185_vm11  ;;  %v2620_v56 = vpop.eup %1725 }
 0x298   : > { %v966_v60 = vsub.f32 0.0, %v2587_v23  ;;  %v1391_v49 = vadd.f32 %v1390_v6, %v1389_v26  ;;  %v971_v61 = vsub.f32 0.0, %v907_v51  ;;  %1743 = vlog2.f32 %v1090_v0  ;;  %vm2626_vm3 = vmand %vm2593_vm9, %vm3187_vm15  ;;  %v1728_v63 = vpop.eup %1727 }
 0x299   : > { %v1058_v22 = vmul.f32 1.442695, %v1033_v19  ;;  %vm1300_vm8 = vcmp.gt.f32.partialorder %v907_v51, 0.0  ;;  %v2636_v54 = vsel %vm1248_vm6, %v1376_v40, 0.0  ;;  %v1392_v52 = vsel %vm1248_vm6, %v1373_v21, 0.0  ;;  %v2643_v4 = vpop.eup %1729 }
 0x29a   : > { %v2633_v55 = vsel %vm950_vm1, %v2587_v23, %v966_v60  ;;  %1745 = vpow2.f32 %v1050_v29  ;;  %v1075_v5 = vmul.f32 -0.5, %v2451_v45  ;;  %v1087_v37 = vand.u32 2147483647, %v2425_v10  ;;  %vm2662_vm7 = vmxor %vm1300_vm8, %vm1316_vm5  ;;  %v2675_v60 = vld [vmem:[%s2251_s16 + $0x40] sm:$0xff] }
 0x29b   : > { %v1378_v8 = vsel %vm2616_vm14, 1.0, %v1887_v17  ;;  %vm3186_vm1 = vcmp.ge.s32.totalorder %v2530_v34, 0  ;;  %v1014_v9 = vand.u32 2147483647, %v2633_v55  ;;  %v1085_v57 = vadd.f32 1.0, %v1084_v47 }
 0x29c   : > { %v1374_v12 = vsel %vm2626_vm3, 1.0, %v1887_v17  ;;  %v2657_v44 = vsel %vm955_vm13, %v907_v51, %v971_v61  ;;  %v891_v6 = vmul.f32 %v1728_v63, %v873_v42  ;;  %v1093_v20 = vmul.f32 -0.5, %v2541_v32  ;;  %vm2688_vm13 = vmxor %vm2662_vm7, %vm1886_vm0 }
 0x29d   : > { %v1732_v19 = vpop.eup %1731  ;;  %1747 = vpow2.f32 %v1058_v22  ;;  %v1030_v26 = vsub.f32 0.0, %v1014_v9  ;;  %vm1295_vm9 = vcmp.gt.f32.partialorder %v2587_v23, 0.0  ;;  %vm957_vm14 = vcmp.eq.s32.totalorder %v2641_v62, 0  ;;  %v863_v9 = vpop.xlane.xlu0 %862 }
 0x29e   : > { %v2669_v29 = vpop.eup %1733  ;;  %v1078_v25 = vand.u32 2147483647, %v2451_v45  ;;  %v1099_v51 = vadd.f32 1.0, %v2643_v4  ;;  %v1102_v40 = vmul.f32 -0.5, %v2643_v4  ;;  %v1393_v21 = vadd.f32 %v1392_v52, %v1391_v49  ;;  %vm2700_vm3 = vmxor %vm1295_vm9, %vm1311_vm12 }
 0x29f   : > { %v1736_v47 = vpop.eup %1735  ;;  %v1076_v7 = vadd.f32 1.0, %v1075_v5  ;;  %vm2677_vm5 = vcmp.lt.f32.partialorder %v1087_v37, 0.0004427343  ;;  %v2682_v22 = vsel %vm1248_vm6, %v1378_v8, 0.0  ;;  %v1019_v18 = vand.u32 2147483647, %v2657_v44  ;;  %vm2719_vm12 = vmand %vm2688_vm13, %vm3184_vm4 }
 0x2a0   : > { %v2692_v49 = vpop.eup %1737  ;;  %v1083_v63 = vmul.f32 0.6931472, %v1732_v19  ;;  %v1086_v52 = vmul.f32 %v2425_v10, %v1085_v57  ;;  %v1394_v5 = vsel %vm1248_vm6, %v1374_v12, 0.0  ;;  %v2705_v8 = vadd.f32 %v2253_v48, %v891_v6  ;;  %vm2734_vm9 = vmxor %vm2700_vm3, %vm1886_vm0 }
 0x2a1   : > { %v2707_v0 = vpop.eup %1739  ;;  %v1094_v19 = vadd.f32 1.0, %v1093_v20  ;;  %v1096_v10 = vand.u32 2147483647, %v2541_v32  ;;  %v1052_v12 = vmul.f32 1.442695, %v1030_v26  ;;  %1749 = vlog2.f32 %v1099_v51  ;;  %v2725_v20 = vld [vmem:[%s2251_s16 + $0x78] sm:$0xff]  ;;  %vm2773_vm11 = vmand %vm2734_vm9, %vm3186_vm1  ;;  %v867_v2 = vpop.xlane.xlu0 %866 }
 0x2a2   : > { %v1074_v31 = vmul.f32 0.6931472, %v1736_v47  ;;  %vm2711_vm8 = vcmp.lt.f32.partialorder %v1078_v25, 0.0004427343  ;;  %v1103_v23 = vadd.f32 1.0, %v1102_v40  ;;  %vm1313_vm7 = vcmp.eq.s32.totalorder %v2675_v60, 1 }
 0x2a3   : > { %v1742_v26 = vpop.eup %1741  ;;  %v1077_v25 = vmul.f32 %v2451_v45, %v1076_v7  ;;  %v1135_v47 = vadd.f32 1.0, %v2692_v49  ;;  %v2729_v57 = vadd.f32 %v1394_v5, %v1393_v21  ;;  %v1035_v51 = vsub.f32 0.0, %v1019_v18 }
 0x2a4   : > { %vm952_vm13 = vcmp.eq.s32.totalorder %v2675_v60, 0  ;;  %v1089_v42 = vsel %vm2677_vm5, %v1086_v52, %v1083_v63  ;;  %v1138_v45 = vmul.f32 -0.5, %v2692_v49  ;;  %v1108_v7 = vadd.f32 1.0, %v2707_v0  ;;  %v877_v63 = vpop.xlane.xlu1 %876  ;;  %v2756_v52 = vld [vmem:[%s2251_s16 + $0x50] sm:$0xff] }
 0x2a5   : > { %v973_v21 = vsub.f32 0.0, %v2705_v8  ;;  %vm3189_vm4 = vcmp.ge.s32.totalorder %v2675_v60, 0  ;;  %v2746_v18 = vmul.f32 %v2541_v32, %v1094_v19  ;;  %vm2748_vm3 = vcmp.lt.f32.partialorder %v1096_v10, 0.0004427343  ;;  %v1744_v38 = vpop.eup %1743 }
 0x2a6   : > { %v1105_v37 = vand.u32 2147483647, %v2643_v4  ;;  %v1111_v61 = vmul.f32 -0.5, %v2707_v0  ;;  %1751 = vpow2.f32 %v1052_v12  ;;  %vm959_vm5 = vcmp.eq.s32.totalorder %v2725_v20, 0  ;;  %v2827_v12 = vld [vmem:[%s2251_s16 + $0x60] sm:$0xff] }
 0x2a7   : > { %v1080_v24 = vsel %vm2711_vm8, %v1077_v25, %v1074_v31  ;;  %v2761_v32 = vmul.f32 %v2643_v4, %v1103_v23  ;;  %v2767_v10 = vsel %vm2719_vm12, 1.0, %v1887_v17  ;;  %v2777_v31 = vpop.eup %1745  ;;  %v1217_v4 = vadd.f32 %v1089_v42, %v993_v14 }
 0x2a8   : > { %1753 = vlog2.f32 %v1135_v47  ;;  %v1062_v23 = vmul.f32 1.442695, %v1035_v51  ;;  %vm1318_vm8 = vcmp.eq.s32.totalorder %v2641_v62, 1  ;;  %v886_v6 = vmul.f32 %v2608_v35, %v863_v9 }
 0x2a9   : > { %v2783_v25 = vadd.f32 1.0, %v1138_v45  ;;  %1755 = vlog2.f32 %v1108_v7  ;;  %v2788_v40 = vsel %vm957_vm14, %v2705_v8, %v973_v21  ;;  %v893_v19 = vmul.f32 %v1742_v26, %v877_v63 }
 0x2aa   : > { %vm954_vm12 = vcmp.eq.s32.totalorder %v2756_v52, 0  ;;  %vm1315_vm9 = vcmp.eq.s32.totalorder %v2756_v52, 1  ;;  %v1216_v39 = vadd.f32 %v1080_v24, %v992_v3  ;;  %v1112_v14 = vadd.f32 1.0, %v1111_v61  ;;  %v2798_v47 = vpop.eup %1747 }
 0x2ab   : > { %v1375_v35 = vsel %vm2773_vm11, 1.0, %v1887_v17  ;;  %v888_v9 = vmul.f32 %v2597_v36, %v867_v2  ;;  %v1092_v51 = vmul.f32 0.6931472, %v1744_v38  ;;  %v1114_v42 = vand.u32 2147483647, %v2707_v0 }
 0x2ac   : > { %v1117_v26 = vadd.f32 1.0, %v2777_v31  ;;  %v904_v45 = vadd.f32 %v2253_v48, %v886_v6  ;;  %vm3263_vm1 = vcmp.ge.s32.totalorder %v2258_v15, 0  ;;  %1757 = vpow2.f32 %v1062_v23 }
 0x2ad   : > { %v1233_v28 = vsel %vm3263_vm1, %v1217_v4, 0.0  ;;  %v998_v3 = vmax.f32 %v2633_v55, 0.0  ;;  %v1021_v24 = vand.u32 2147483647, %v2788_v40  ;;  %v1396_v36 = vsel %vm1248_vm6, %v1375_v35, 0.0  ;;  %v2855_v35 = vld [vmem:[%s2251_s16 + $0x70] sm:$0xff] }
 0x2ae   : > { %v968_v38 = vsub.f32 0.0, %v904_v45  ;;  %vm1297_vm11 = vcmp.gt.f32.partialorder %v904_v45, 0.0  ;;  %v2810_v7 = vadd.f32 %v2253_v48, %v893_v19  ;;  %vm1320_vm15 = vcmp.eq.s32.totalorder %v2725_v20, 1  ;;  %v1750_v2 = vpop.eup %1749 }
 0x2af   : > { %vm3264_vm10 = vcmp.ge.s32.totalorder %v2264_v58, 0  ;;  %vm2815_vm14 = vcmp.lt.f32.partialorder %v1105_v37, 0.0004427343  ;;  %v2820_v61 = vmul.f32 %v2707_v0, %v1112_v14  ;;  %v1153_v63 = vadd.f32 1.0, %v2798_v47  ;;  %vm1329_vm1 = vmxor %vm1297_vm11, %vm1313_vm7 }
 0x2b0   : > { %v1232_v21 = vsel %vm3264_vm10, %v1216_v39, 0.0  ;;  %v906_v19 = vadd.f32 %v2253_v48, %v888_v9  ;;  %v1098_v58 = vsel %vm2748_vm3, %v2746_v18, %v1092_v51  ;;  %1759 = vlog2.f32 %v1117_v26  ;;  %vm1345_vm10 = vmxor %vm1329_vm1, %vm1886_vm0 }
 0x2b1   : > { %v2834_v37 = vsel %vm952_vm13, %v904_v45, %v968_v38  ;;  %v975_v0 = vsub.f32 0.0, %v2810_v7  ;;  %vm3190_vm7 = vcmp.ge.s32.totalorder %v2641_v62, 0  ;;  %v1397_v4 = vadd.f32 %v1396_v36, %v2729_v57  ;;  %vm1361_vm3 = vmand %vm1345_vm10, %vm3189_vm4  ;;  %v871_v57 = vpop.xlane.xlu0 %870 }
 0x2b2   : > { %v1037_v23 = vsub.f32 0.0, %v1021_v24  ;;  %vm1302_vm11 = vcmp.gt.f32.partialorder %v2705_v8, 0.0  ;;  %v1016_v18 = vand.u32 2147483647, %v2834_v37  ;;  %v1250_v5 = vsel %vm1248_vm6, %v1233_v28, 0.0 }
 0x2b3   : > { %v2846_v6 = vmul.f32 -0.5, %v2798_v47  ;;  %v2851_v39 = vsel %vm959_vm5, %v2810_v7, %v975_v0  ;;  %v970_v14 = vsub.f32 0.0, %v906_v19  ;;  %vm1317_vm13 = vcmp.eq.s32.totalorder %v2827_v12, 1  ;;  %v2862_v24 = vpop.eup %1751  ;;  %vm2868_vm5 = vmxor %vm1302_vm11, %vm1318_vm8 }
 0x2b4   : > { %v1249_v9 = vsel %vm1248_vm6, %v1232_v21, 0.0  ;;  %v3267_v51 = vmax.f32 %v2293_v53, 0.0  ;;  %v1032_v45 = vsub.f32 0.0, %v1016_v18  ;;  %v1377_v28 = vsel %vm1361_vm3, 1.0, %v1887_v17 }
 0x2b5   : > { %v1101_v36 = vmul.f32 0.6931472, %v1750_v2  ;;  %1761 = vlog2.f32 %v1153_v63  ;;  %v1023_v53 = vand.u32 2147483647, %v2851_v39  ;;  %vm1299_vm10 = vcmp.gt.f32.partialorder %v906_v19, 0.0  ;;  %v1754_v8 = vpop.eup %1753 }
 0x2b6   : > { %v1218_v26 = vadd.f32 %v1098_v58, %v3267_v51  ;;  %v1126_v21 = vadd.f32 1.0, %v2862_v24  ;;  %v1066_v58 = vmul.f32 1.442695, %v1037_v23  ;;  %v1399_v0 = vadd.f32 %v2636_v54, %v1397_v4  ;;  %vm1331_vm8 = vmxor %vm1299_vm10, %vm1315_vm9 }
 0x2b7   : > { %v2878_v63 = vsel %vm954_vm12, %v906_v19, %v970_v14  ;;  %vm1319_vm11 = vcmp.eq.s32.totalorder %v2855_v35, 1  ;;  %vm2883_vm3 = vcmp.lt.f32.partialorder %v1114_v42, 0.0004427343  ;;  %v1056_v18 = vmul.f32 1.442695, %v1032_v45  ;;  %vm1347_vm1 = vmxor %vm1331_vm8, %vm1886_vm0  ;;  %v1756_v19 = vpop.eup %1755 }
 0x2b8   : > { %v1400_v51 = vsel %vm1248_vm6, %v1377_v28, 0.0  ;;  %vm1304_vm4 = vcmp.gt.f32.partialorder %v2810_v7, 0.0  ;;  %v890_v54 = vmul.f32 %v2669_v29, %v871_v57  ;;  %vm958_vm12 = vcmp.eq.s32.totalorder %v2855_v35, 0 }
 0x2b9   : > { %v2892_v4 = vadd.f32 %v1250_v5, %v1249_v9  ;;  %v1234_v42 = vsel %vm930_vm2, %v1218_v26, 0.0  ;;  %1763 = vlog2.f32 %v1126_v21  ;;  %v1039_v23 = vsub.f32 0.0, %v1023_v53  ;;  %vm2910_vm2 = vmxor %vm2868_vm5, %vm1886_vm0  ;;  %v875_v9 = vpop.xlane.xlu0 %874  ;;  %v2925_v15 = vpop.eup %1757 }
 0x2ba   : > { %vm3272_vm9 = vcmp.ge.s32.totalorder %v2756_v52, 0  ;;  %vm942_vm8 = vcmp.ge.s32.totalorder %v2855_v35, 0  ;;  %v1107_v29 = vsel %vm2815_vm14, %v2761_v32, %v1101_v36  ;;  %v1120_v5 = vmul.f32 -0.5, %v2777_v31 }
 0x2bb   : > { %vm2898_vm10 = vmand %vm1347_vm1, %vm3272_vm9  ;;  %1765 = vpow2.f32 %v1056_v18  ;;  %v1018_v57 = vand.u32 2147483647, %v2878_v63  ;;  %v1123_v26 = vand.u32 2147483647, %v2777_v31  ;;  %v1401_v45 = vadd.f32 %v1400_v51, %v1399_v0 }
 0x2bc   : > { %1767 = vpow2.f32 %v1066_v58  ;;  %v1070_v28 = vmul.f32 1.442695, %v1039_v23  ;;  %vm2921_vm1 = vmxor %vm1304_vm4, %vm1320_vm15  ;;  %v2928_v36 = vsel %vm1248_vm6, %v1234_v42, 0.0  ;;  %v1379_v53 = vsel %vm2898_vm10, 1.0, %v1887_v17 }
 0x2bd   : > { %v1034_v38 = vsub.f32 0.0, %v1018_v57  ;;  %v908_v21 = vadd.f32 %v2253_v48, %v890_v54  ;;  %v3279_v58 = vmax.f32 %v2322_v33, 0.0  ;;  %v2936_v7 = vmul.f32 0.6931472, %v1754_v8  ;;  %vm2943_vm15 = vmand %vm2910_vm2, %vm3190_vm7 }
 0x2be   : > { %v1110_v18 = vmul.f32 0.6931472, %v1756_v19  ;;  %v892_v51 = vmul.f32 %v2620_v56, %v875_v9  ;;  %v1129_v23 = vmul.f32 -0.5, %v2862_v24  ;;  %vm2951_vm5 = vmxor %vm2921_vm1, %vm1886_vm0  ;;  %v1760_v56 = vpop.eup %1759  ;;  %1769 = vpow2.f32 %v1070_v28 }
 0x2bf   : > { %v1219_v0 = vadd.f32 %v1107_v29, %v3279_v58  ;;  %v1060_v14 = vmul.f32 1.442695, %v1034_v38  ;;  %v972_v54 = vsub.f32 0.0, %v908_v21  ;;  %vm1301_vm4 = vcmp.gt.f32.partialorder %v908_v21, 0.0 }
 0x2c0   : > { %v1404_v8 = vsel %vm1248_vm6, %v1379_v53, 0.0  ;;  %vm1333_vm9 = vmxor %vm1301_vm4, %vm1317_vm13  ;;  %v910_v19 = vadd.f32 %v2253_v48, %v892_v51  ;;  %v1403_v29 = vadd.f32 %v2682_v22, %v1401_v45  ;;  %v1121_v46 = vadd.f32 1.0, %v1120_v5 }
 0x2c1   : > { %vm2960_vm10 = vcmp.lt.f32.partialorder %v1123_v26, 0.0004427343  ;;  %1771 = vpow2.f32 %v1060_v14  ;;  %vm3286_vm2 = vcmp.eq.s32.totalorder %v2827_v12, 0  ;;  %vm1349_vm1 = vmxor %vm1333_vm9, %vm1886_vm0  ;;  %v1116_v28 = vsel %vm2883_vm3, %v2820_v61, %v1110_v18 }
 0x2c2   : > { %v2966_v9 = vsel %vm3286_vm2, %v908_v21, %v972_v54  ;;  %vm3287_vm13 = vcmp.ge.s32.totalorder %v2827_v12, 0  ;;  %v974_v22 = vsub.f32 0.0, %v910_v19  ;;  %vm1303_vm7 = vcmp.gt.f32.partialorder %v910_v19, 0.0  ;;  %v1762_v38 = vpop.eup %1761 }
 0x2c3   : > { %v1020_v48 = vand.u32 2147483647, %v2966_v9  ;;  %vm1365_vm4 = vmand %vm1349_vm1, %vm3287_vm13  ;;  %v1119_v5 = vmul.f32 0.6931472, %v1760_v56  ;;  %v1130_v26 = vadd.f32 1.0, %v1129_v23  ;;  %v1405_v32 = vadd.f32 %v1404_v8, %v1403_v29 }
 0x2c4   : > { %vm1335_vm14 = vmxor %vm1303_vm7, %vm1319_vm11  ;;  %v1381_v45 = vsel %vm1365_vm4, 1.0, %v1887_v17  ;;  %v2980_v61 = vsel %vm958_vm12, %v910_v19, %v974_v22  ;;  %v1406_v2 = vsel %vm1248_vm6, %v2767_v10, 0.0  ;;  %v1122_v58 = vmul.f32 %v2777_v31, %v1121_v46 }
 0x2c5   : > { %v1036_v53 = vsub.f32 0.0, %v1020_v48  ;;  %vm1351_vm3 = vmxor %vm1335_vm14, %vm1886_vm0  ;;  %v1408_v21 = vsel %vm1248_vm6, %v1381_v45, 0.0  ;;  %v1171_v18 = vadd.f32 1.0, %v2925_v15  ;;  %v1022_v51 = vand.u32 2147483647, %v2980_v61 }
 0x2c6   : > { %vm1367_vm7 = vmand %vm1351_vm3, %vm942_vm8  ;;  %v1407_v23 = vadd.f32 %v1406_v2, %v1405_v32  ;;  %v1132_v14 = vand.u32 2147483647, %v2862_v24  ;;  %v1382_v56 = vsel %vm2943_vm15, 1.0, %v1887_v17  ;;  %v1764_v8 = vpop.eup %1763  ;;  %vm3288_vm0 = vcmp.ge.s32.totalorder %v2296_v11, 0 }
 0x2c7   : > { %v1064_v54 = vmul.f32 1.442695, %v1036_v53  ;;  %v1383_v10 = vsel %vm1367_vm7, 1.0, %v1887_v17  ;;  %v1235_v31 = vsel %vm3288_vm0, %v1219_v0, 0.0  ;;  %v3289_v19 = vmax.f32 %v2384_v16, 0.0 }
 0x2c8   : > { %v1038_v46 = vsub.f32 0.0, %v1022_v51  ;;  %vm3290_vm11 = vcmp.ge.s32.totalorder %v2725_v20, 0  ;;  %v1409_v48 = vadd.f32 %v1408_v21, %v1407_v23  ;;  %v3004_v22 = vpop.eup %1765  ;;  %v1125_v42 = vsel %vm2960_vm10, %v1122_v58, %v1119_v5 }
 0x2c9   : > { %v1220_v29 = vadd.f32 %v1116_v28, %v3289_v19  ;;  %vm1368_vm12 = vmand %vm2951_vm5, %vm3290_vm11  ;;  %v1128_v45 = vmul.f32 0.6931472, %v1764_v8  ;;  %v1131_v32 = vmul.f32 %v2862_v24, %v1130_v26  ;;  %1773 = vpow2.f32 %v1064_v54  ;;  %v3009_v11 = vpop.eup %1767 }
 0x2ca   : > { %v1144_v16 = vadd.f32 1.0, %v3004_v22  ;;  %v1068_v0 = vmul.f32 1.442695, %v1038_v46  ;;  %v1410_v28 = vsel %vm1248_vm6, %v1382_v56, 0.0  ;;  %v1412_v33 = vsel %vm1248_vm6, %v1383_v10, 0.0 }
 0x2cb   : > { %1775 = vlog2.f32 %v1171_v18  ;;  %vm3014_vm14 = vcmp.lt.f32.partialorder %v1132_v14, 0.0004427343  ;;  %v1384_v57 = vsel %vm1368_vm12, 1.0, %v1887_v17  ;;  %v1411_v5 = vadd.f32 %v1410_v28, %v1409_v48  ;;  %v3027_v23 = vpop.eup %1769 }
 0x2cc   : > { %v1254_v24 = vsel %vm1248_vm6, %v1235_v31, 0.0  ;;  %vm3293_vm15 = vcmp.ge.s32.totalorder %v2314_v30, 0  ;;  %v1134_v2 = vsel %vm3014_vm14, %v1131_v32, %v1128_v45  ;;  %1777 = vlog2.f32 %v1144_v16 }
 0x2cd   : > { %v1236_v26 = vsel %vm3293_vm15, %v1220_v29, 0.0  ;;  %v3294_v21 = vmax.f32 %v2465_v13, 0.0  ;;  %1779 = vpow2.f32 %v1068_v0  ;;  %v1413_v18 = vadd.f32 %v1412_v33, %v1411_v5 }
 0x2ce   : > { %v1189_v51 = vadd.f32 1.0, %v3009_v11  ;;  %v1253_v17 = vadd.f32 %v2928_v36, %v2892_v4  ;;  %v1140_v30 = vmul.f32 %v2692_v49, %v2783_v25  ;;  %v3295_v14 = vand.u32 2147483647, %v2692_v49  ;;  %v3040_v56 = vpop.eup %1771 }
 0x2cf   : > { %v1221_v58 = vadd.f32 %v1125_v42, %v3294_v21  ;;  %v1414_v13 = vsel %vm1248_vm6, %v1384_v57, 0.0  ;;  %v1157_v10 = vadd.f32 1.0, %v2846_v6  ;;  %v1159_v8 = vand.u32 2147483647, %v2798_v47 }
 0x2d0   : > { %vm3035_vm5 = vcmp.lt.f32.partialorder %v3295_v14, 0.0004427343  ;;  %v1222_v4 = vadd.f32 %v1134_v2, %v998_v3  ;;  %v1415_v36 = vadd.f32 %v1414_v13, %v1413_v18  ;;  %v1255_v31 = vadd.f32 %v1254_v24, %v1253_v17 }
 0x2d1   : > { %v1143_v49 = vsel %vm3035_vm5, %v1140_v30, %v2936_v7  ;;  %v1256_v25 = vsel %vm1248_vm6, %v1236_v26, 0.0  ;;  %v1162_v19 = vadd.f32 1.0, %v3040_v56  ;;  %v1155_v29 = vmul.f32 0.6931472, %v1762_v38 }
 0x2d2   : > { %vm3298_vm9 = vcmp.ge.s32.totalorder %v2390_v59, 0  ;;  %1416 = vadd.xlane.f32.xlu1 %v1415_v36  ;;  %1781 = vlog2.f32 %v1189_v51  ;;  %v1207_v6 = vadd.f32 1.0, %v3027_v23  ;;  %v1147_v55 = vmul.f32 -0.5, %v3004_v22 }
 0x2d3   : > { %v1237_v46 = vsel %vm3298_vm9, %v1221_v58, 0.0  ;;  %1783 = vlog2.f32 %v1162_v19  ;;  %v3299_v3 = vmax.f32 %v2368_v41, 0.0  ;;  %v1257_v42 = vadd.f32 %v1256_v25, %v1255_v31 }
 0x2d4   : > { %v1158_v7 = vmul.f32 %v2798_v47, %v1157_v10  ;;  %vm3300_vm10 = vcmp.ge.s32.totalorder %v2530_v34, 0  ;;  %vm1160_vm2 = vcmp.lt.f32.partialorder %v1159_v8, 0.0004427343  ;;  %v1258_v59 = vsel %vm1248_vm6, %v1237_v46, 0.0 }
 0x2d5   : > { %v1223_v48 = vadd.f32 %v1143_v49, %v3299_v3  ;;  %v1238_v45 = vsel %vm3300_vm10, %v1222_v4, 0.0  ;;  %v1174_v38 = vmul.f32 -0.5, %v2925_v15  ;;  %1785 = vlog2.f32 %v1207_v6 }
 0x2d6   : > { %v1161_v32 = vsel %vm1160_vm2, %v1158_v7, %v1155_v29  ;;  %v3062_v16 = vpop.eup %1773  ;;  %v1001_v0 = vmax.f32 %v2500_v43, 0.0  ;;  %v1260_v41 = vsel %vm1248_vm6, %v1238_v45, 0.0  ;;  %v1148_v28 = vadd.f32 1.0, %v1147_v55 }
 0x2d7   : > { %vm3301_vm1 = vcmp.ge.s32.totalorder %v2311_v27, 0  ;;  %v1259_v33 = vadd.f32 %v1258_v59, %v1257_v42  ;;  %v1150_v34 = vand.u32 2147483647, %v3004_v22  ;;  %v1180_v53 = vadd.f32 1.0, %v3062_v16 }
 0x2d8   : > { %v1239_v47 = vsel %vm3301_vm1, %v1223_v48, 0.0  ;;  %v1776_v57 = vpop.eup %1775  ;;  %v1225_v5 = vadd.f32 %v1161_v32, %v1001_v0  ;;  %v1175_v24 = vadd.f32 1.0, %v1174_v38  ;;  %v1165_v26 = vmul.f32 -0.5, %v3040_v56 }
 0x2d9   : > { %v1778_v2 = vpop.eup %1777  ;;  %v1177_v21 = vand.u32 2147483647, %v2925_v15  ;;  %v1261_v43 = vadd.f32 %v1260_v41, %v1259_v33  ;;  %1787 = vlog2.f32 %v1180_v53  ;;  %v1262_v27 = vsel %vm1248_vm6, %v1239_v47, 0.0 }
 0x2da   : > { %v3072_v58 = vpop.eup %1779  ;;  %v1146_v18 = vmul.f32 0.6931472, %v1778_v2  ;;  %v1149_v51 = vmul.f32 %v3004_v22, %v1148_v28  ;;  %v1192_v17 = vmul.f32 -0.5, %v3009_v11  ;;  %v1173_v30 = vmul.f32 0.6931472, %v1776_v57 }
 0x2db   : > { %v1000_v14 = vmax.f32 %v2834_v37, 0.0  ;;  %vm1151_vm13 = vcmp.lt.f32.partialorder %v1150_v34, 0.0004427343  ;;  %v1198_v54 = vadd.f32 1.0, %v3072_v58  ;;  %vm3302_vm4 = vcmp.ge.s32.totalorder %v2387_v1, 0 }
 0x2dc   : > { %v1241_v13 = vsel %vm3302_vm4, %v1225_v5, 0.0  ;;  %v1176_v10 = vmul.f32 %v2925_v15, %v1175_v24  ;;  %v1152_v8 = vsel %vm1151_vm13, %v1149_v51, %v1146_v18  ;;  %v1166_v4 = vadd.f32 1.0, %v1165_v26 }
 0x2dd   : > { %v1263_v36 = vadd.f32 %v1262_v27, %v1261_v43  ;;  %v1224_v31 = vadd.f32 %v1152_v8, %v1000_v14  ;;  %v1168_v49 = vand.u32 2147483647, %v3040_v56  ;;  %1789 = vlog2.f32 %v1198_v54 }
 0x2de   : > { %v1003_v25 = vmax.f32 %v2657_v44, 0.0  ;;  %vm3084_vm3 = vcmp.lt.f32.partialorder %v1177_v21, 0.0004427343  ;;  %v1193_v19 = vadd.f32 1.0, %v1192_v17  ;;  %v1210_v1 = vmul.f32 -0.5, %v3027_v23 }
 0x2df   : > { %v1782_v22 = vpop.eup %1781  ;;  %v1266_v15 = vsel %vm1248_vm6, %v1241_v13, 0.0  ;;  %v1179_v46 = vsel %vm3084_vm3, %v1176_v10, %v1173_v30  ;;  %vm3305_vm7 = vcmp.ge.s32.totalorder %v2675_v60, 0  ;;  %v1183_v55 = vmul.f32 -0.5, %v3062_v16 }
 0x2e0   : > { %v1784_v29 = vpop.eup %1783  ;;  %v1240_v6 = vsel %vm3305_vm7, %v1224_v31, 0.0  ;;  %v1167_v48 = vmul.f32 %v3040_v56, %v1166_v4  ;;  %v1195_v42 = vand.u32 2147483647, %v3009_v11  ;;  %v1002_v45 = vmax.f32 %v2878_v63, 0.0 }
 0x2e1   : > { %v1264_v44 = vsel %vm1248_vm6, %v1240_v6, 0.0  ;;  %v1164_v3 = vmul.f32 0.6931472, %v1784_v29  ;;  %vm1169_vm0 = vcmp.lt.f32.partialorder %v1168_v49, 0.0004427343  ;;  %v1227_v32 = vadd.f32 %v1179_v46, %v1003_v25 }
 0x2e2   : > { %v1265_v7 = vadd.f32 %v1264_v44, %v1263_v36  ;;  %v1191_v59 = vmul.f32 0.6931472, %v1782_v22  ;;  %v1786_v38 = vpop.eup %1785  ;;  %v1194_v60 = vmul.f32 %v3009_v11, %v1193_v19  ;;  %v1211_v41 = vadd.f32 1.0, %v1210_v1 }
 0x2e3   : > { %v1170_v0 = vsel %vm1169_vm0, %v1167_v48, %v1164_v3  ;;  %v1184_v47 = vadd.f32 1.0, %v1183_v55  ;;  %v1201_v33 = vmul.f32 -0.5, %v3072_v58  ;;  %v1186_v56 = vand.u32 2147483647, %v3062_v16 }
 0x2e4   : > { %v1226_v28 = vadd.f32 %v1170_v0, %v1002_v45  ;;  %v1267_v34 = vadd.f32 %v1266_v15, %v1265_v7  ;;  %vm3102_vm11 = vcmp.lt.f32.partialorder %v1195_v42, 0.0004427343  ;;  %v1213_v63 = vand.u32 2147483647, %v3027_v23 }
 0x2e5   : > { %v1005_v57 = vmax.f32 %v2788_v40, 0.0  ;;  %vm3308_vm12 = vcmp.ge.s32.totalorder %v2756_v52, 0  ;;  %v1197_v11 = vsel %vm3102_vm11, %v1194_v60, %v1191_v59  ;;  %v1209_v24 = vmul.f32 0.6931472, %v1786_v38 }
 0x2e6   : > { %v1242_v5 = vsel %vm3308_vm12, %v1226_v28, 0.0  ;;  %v1788_v26 = vpop.eup %1787  ;;  %v1004_v2 = vmax.f32 %v2966_v9, 0.0  ;;  %v1212_v21 = vmul.f32 %v3027_v23, %v1211_v41  ;;  %vm3309_vm14 = vcmp.ge.s32.totalorder %v2505_v50, 0 }
 0x2e7   : > { %v1243_v43 = vsel %vm3309_vm14, %v1227_v32, 0.0  ;;  %v1268_v27 = vsel %vm1248_vm6, %v1242_v5, 0.0  ;;  %v1182_v18 = vmul.f32 0.6931472, %v1788_v26  ;;  %v1185_v40 = vmul.f32 %v3062_v16, %v1184_v47 }
 0x2e8   : > { %v1202_v51 = vadd.f32 1.0, %v1201_v33  ;;  %v1269_v52 = vadd.f32 %v1268_v27, %v1267_v34  ;;  %vm1187_vm15 = vcmp.lt.f32.partialorder %v1186_v56, 0.0004427343  ;;  %v1204_v17 = vand.u32 2147483647, %v3072_v58 }
 0x2e9   : > { %vm1214_vm5 = vcmp.lt.f32.partialorder %v1213_v63, 0.0004427343  ;;  %v1229_v30 = vadd.f32 %v1197_v11, %v1005_v57  ;;  %v1188_v14 = vsel %vm1187_vm15, %v1185_v40, %v1182_v18  ;;  %v1270_v9 = vsel %vm1248_vm6, %v1243_v43, 0.0 }
 0x2ea   : > { %v1215_v54 = vsel %vm1214_vm5, %v1212_v21, %v1209_v24  ;;  %v1790_v23 = vpop.eup %1789  ;;  %v1228_v13 = vadd.f32 %v1188_v14, %v1004_v2  ;;  %v1007_v50 = vmax.f32 %v2851_v39, 0.0  ;;  %v1271_v10 = vadd.f32 %v1270_v9, %v1269_v52 }
 0x2eb   : > { %v1006_v8 = vmax.f32 %v2980_v61, 0.0  ;;  %v1200_v4 = vmul.f32 0.6931472, %v1790_v23  ;;  %v1203_v16 = vmul.f32 %v3072_v58, %v1202_v51  ;;  %vm1205_vm9 = vcmp.lt.f32.partialorder %v1204_v17, 0.0004427343 }
 0x2ec   : > { %v1231_v36 = vadd.f32 %v1215_v54, %v1007_v50  ;;  %vm3310_vm10 = vcmp.ge.s32.totalorder %v2827_v12, 0  ;;  %vm3311_vm2 = vcmp.ge.s32.totalorder %v2641_v62, 0  ;;  %vm3312_vm1 = vcmp.ge.s32.totalorder %v2725_v20, 0 }
 0x2ed   : > { %v1244_v31 = vsel %vm3310_vm10, %v1228_v13, 0.0  ;;  %v1245_v49 = vsel %vm3311_vm2, %v1229_v30, 0.0  ;;  %v1206_v22 = vsel %vm1205_vm9, %v1203_v16, %v1200_v4  ;;  %v1425_v0 = vlaneseq }
 0x2ee   : > { %v1272_v25 = vsel %vm1248_vm6, %v1244_v31, 0.0  ;;  %v1230_v37 = vadd.f32 %v1206_v22, %v1006_v8  ;;  %v1274_v39 = vsel %vm1248_vm6, %v1245_v49, 0.0  ;;  %v1247_v58 = vsel %vm3312_vm1, %v1231_v36, 0.0 }
 0x2ef   : > { %v1273_v19 = vadd.f32 %v1272_v25, %v1271_v10  ;;  %v1278_v62 = vsel %vm1248_vm6, %v1247_v58, 0.0  ;;  %v1426_v60 = vand.u32 127, %v1425_v0 }
 0x2f0   : > { %v1246_v61 = vsel %vm942_vm8, %v1230_v37, 0.0 }
 0x2f1   : > { %v1275_v1 = vadd.f32 %v1274_v39, %v1273_v19  ;;  %v1276_v12 = vsel %vm1248_vm6, %v1246_v61, 0.0  ;;  %vm1428_vm6 = vcmp.eq.s32.totalorder %v1426_v60, 1  ;;  %vm1427_vm8 = vcmp.eq.s32.totalorder %v1426_v60, 0 }
 0x2f3   : > { %v1277_v29 = vadd.f32 %v1276_v12, %v1275_v1 }
 0x2f5   : > { %v1279_v15 = vadd.f32 %v1278_v62, %v1277_v29 }
 0x2f7   : > { %1280 = vadd.xlane.f32.xlu0 %v1279_v15 }
 0x35b   : > { %v1417_v46 = vpop.xlane.xlu1 %1416 }
 0x35c   : > { %v1418_v6 = vrot.slane %v1417_v46, 4 }
 0x35e   : > { %v1419_v55 = vadd.f32 %v1418_v6, %v1417_v46 }
 0x360   : > { %v1420_v44 = vrot.slane %v1419_v55, 2 }
 0x362   : > { %v1421_v42 = vadd.f32 %v1420_v44, %v1419_v55 }
 0x364   : > { %v1422_v45 = vrot.slane %v1421_v42, 1 }
 0x366   : > { %v1423_v32 = vadd.f32 %v1422_v45, %v1421_v42 }
 0x380   : > { %v1281_v3 = vpop.xlane.xlu0 %1280 }
 0x381   : > { %v1282_v48 = vrot.slane %v1281_v3, 4 }
 0x383   : > { %v1283_v35 = vadd.f32 %v1282_v48, %v1281_v3 }
 0x385   : > { %v1284_v7 = vrot.slane %v1283_v35, 2 }
 0x387   : > { %v1285_v20 = vadd.f32 %v1284_v7, %v1283_v35 }
 0x389   : > { %v1286_v59 = vrot.slane %v1285_v20, 1 }
 0x38b   : > { %v1287_v38 = vadd.f32 %v1286_v59, %v1285_v20 }
 0x38d   : > { %1613 = vpush %v1287_v38 }
 0x38e   : > { %1615 = vpush %v1423_v32 }
 0x3be   : > { %s1614_s19 = spop %1613 }
 0x3bf   : > { %v1431_v41 = vstv %s1614_s19  ;;  %s1616_s22 = spop %1615 }
 0x3c0   : > { %v1429_v28 = vstv %s1616_s22 }
 0x3c1   : > { %v1430_v47 = vsel %vm1428_vm6, %v1429_v28, 0.0 }
 0x3c2   : > { %v1432_v33 = vsel %vm1427_vm8, %v1431_v41, %v1430_v47 }
 0x3c3   : > { %1433 = vst [vmem:[%s288_s20] sm:$0x1] %v1432_v33 }
 0x3c4   : > { %1830 = shalt.err (!%p1827_p1)
}
 0x3c5   : > { %s1831_s18 = scalar_lea.hbm %s3140_s29, 16  ;;  %s1835_s16 = scalar_lea.hbm %s3181_s6, 32 }
 0x3c6   : > { %p1832_p2 = scmp.ne.s32.totalorder %s3140_s29, %s1831_s18  ;;  %p1836_p7 = scmp.lt.s32.totalorder %s3140_s29, %s3181_s6 }
 0x3c7   : > { %p1837_p6 = scmp.lt.s32.totalorder %s1835_s16, %s1831_s18 }
 0x3c8   : > { %p1833_p3 = pnand %p1832_p2, %p1965_p5 }
 0x3c9   : > { %p1838_p8 = por %p1837_p6, %p1836_p7 }
 0x3ca   : > { %p1834_p4 = pneg %p1833_p3 }
 0x3cc   : > { %p1839_p9 = pnand %p1838_p8, %p1834_p4 }
 0x3ce   : > { %1842 = shalt.err (!%p1839_p9)
}
 0x3cf   : > { %1621 = dma.vmem_to_hbm [thread:$0]  (%p1965_p5), %s1448_s21, 16, %s3140_s29, %s1435_s30  }
 0x3d0 PF: > { %p1633_p10 = scmp.ge.s32.totalorder %s1881_s26, 2  ;;  %s1459_s20 = sand.u32 1, %s1869_s23  }
 0x3d1   : > { %p3313_p11 = scmp.ne.s32.totalorder %s3192_s9, 0  ;;  %s1460_s22 = scalar_lea.sflag [#allocation5], %s1459_s20 }
 0x3d3   : > { %p1628_p12 = pnand %p1633_p10, %p3313_p11 }
 0x3d5   : > { %p1629_p13 = pneg %p1628_p12 }
 0x3d7   : > { %1864 = dma.done.wait (%p1629_p13), %s1460_s22, 16  }
 0x3d8   : > { %1866 = vsyncadd (%p1629_p13), %s1460_s22, 4294967280  ;;  %p18_p0 = scmp.ge.s32.totalorder %s1952_s28, 4   ;;  %s3314_s23 = smov %s1873_s24 }
 0x3d9   : > { %s3315_s24 = smov %s1877_s25  ;;  %s3316_s25 = smov %s1963_s7 }
 0x3da   : > { %s3317_s26 = smov %s1952_s28  ;;  %20 = sbr.rel (!%p18_p0) target bundleno = 6 (0x6), region = 87 }
 0x3df   :  { %1464 = vsyncpa [#allocation4], 1 }
 0x3e0   :  { %1466 = vsyncpa [#allocation4 + $0x1], 1 }
 0x3e1   :  { %1467 = vsyncpa [#allocation5], 1 }
 0x3e2   :  { %1469 = vsyncpa [#allocation5 + $0x1], 1 }

</bundles_post_ra>
